<compile_context>
chip_gen: v6e
topology: v6e:2x2x1
jax: 0.10.0
libtpu: 0.0.40
codegen_flags: <defaults>
</compile_context>

<pallas_src>
import jax
import jax.numpy as jnp
import numpy as np
from jax.experimental import pallas as pl
from jax.experimental.pallas import tpu as pltpu

# n_subs is accepted by this repo's ResBlock/ResAttentionBlock signature but does not
# affect the forward computation.  # TODO(synk): n_subs unused in forward.

MM_DTYPE = jnp.bfloat16  # matmul operand dtype (accumulation stays f32)


def make_ssb_kernel(H, W, C, res_scale):
    WC = W * C

    def kernel(xp_ref, x_ref, B1_ref, b1_ref, B2_ref, b2_ref,
               w3_ref, b3_ref, w4_ref, b4_ref,
               wd_ref, bd_ref, wu_ref, bu_ref,
               tpool_ref, ttile_ref,
               o_ref, pad_ref):
        f32 = jnp.float32
        xp = xp_ref[...]                      # (H+2, (W+2)*C) padded input, f32
        xf = x_ref[...]                       # (H, W*C)      unpadded input, f32

        # -------- spa: ResBlock  conv3x3 -> ReLU -> conv3x3 -> *res_scale -> +x -----
        # conv1: one banded matmul per kernel row dy; dx/channel structure is baked
        # into B1, row shifts are plain sublane slices of the padded input.
        acc1 = jnp.dot(xp[0:H, :].astype(MM_DTYPE), B1_ref[0],
                       preferred_element_type=f32)
        acc1 = acc1 + jnp.dot(xp[1:H + 1, :].astype(MM_DTYPE), B1_ref[1],
                              preferred_element_type=f32)
        acc1 = acc1 + jnp.dot(xp[2:H + 2, :].astype(MM_DTYPE), B1_ref[2],
                              preferred_element_type=f32)
        h1 = jnp.maximum(acc1 + b1_ref[...], 0.0)            # (H, W*C) f32

        # conv2 needs h1 zero-padded along H only (W zero-pad is folded into B2):
        # write h1 into the persistent scratch and re-zero just the 2 halo rows.
        pad_ref[0:1, :] = jnp.zeros((1, WC), f32)
        pad_ref[H + 1:H + 2, :] = jnp.zeros((1, WC), f32)
        pad_ref[1:H + 1, :] = h1
        hp = pad_ref[...]                                     # (H+2, W*C) f32

        acc2 = jnp.dot(hp[0:H, :].astype(MM_DTYPE), B2_ref[0],
                       preferred_element_type=f32)
        acc2 = acc2 + jnp.dot(hp[1:H + 1, :].astype(MM_DTYPE), B2_ref[1],
                              preferred_element_type=f32)
        acc2 = acc2 + jnp.dot(hp[2:H + 2, :].astype(MM_DTYPE), B2_ref[2],
                              preferred_element_type=f32)
        y1 = xf + res_scale * (acc2 + b2_ref[...])            # (H, W*C) f32

        # ------ spc: ResAttentionBlock  1x1 -> ReLU -> 1x1 -> CA -> *res_scale -> + --
        # 1x1 convs are block-diagonal matmuls in the lane-dense layout.
        h3 = jnp.maximum(
            jnp.dot(y1.astype(MM_DTYPE), w3_ref[...], preferred_element_type=f32)
            + b3_ref[...], 0.0)
        h4 = jnp.dot(h3.astype(MM_DTYPE), w4_ref[...],
                     preferred_element_type=f32) + b4_ref[...]        # (H, W*C)

        # CALayer: GAP over H*W = row-sum + pooling matmul (1/(H*W) folded into tpool),
        # squeeze/excite MLP in f32, gate broadcast back to W*C lanes via ttile.
        rowsum = jnp.sum(h4, axis=0, keepdims=True)                            # (1, W*C)
        pooled = jnp.dot(rowsum, tpool_ref[...], preferred_element_type=f32)   # (1, C)
        z = jnp.maximum(
            jnp.dot(pooled, wd_ref[...], preferred_element_type=f32) + bd_ref[...],
            0.0)                                                               # (1, Cr)
        gate = jax.nn.sigmoid(
            jnp.dot(z, wu_ref[...], preferred_element_type=f32) + bu_ref[...])  # (1, C)
        gate_wide = jnp.dot(gate, ttile_ref[...], preferred_element_type=f32)   # (1, W*C)
        ca = h4 * gate_wide

        o_ref[...] = y1 + res_scale * ca                      # lane-dense (H, W*C) store

    return kernel


def _full_spec(shape):
    nd = len(shape)
    return pl.BlockSpec(shape, lambda *args, _nd=nd: (0,) * _nd)


def _banded_conv_weight(w_hwio, W, in_cols, col_offset):
    """B[dy] of shape (in_cols*Cin, W*Cout): sum_dy slab_dy @ B[dy] == 3x3 SAME conv
    in the flattened (row, W*C) layout.  col_offset=0: input already W-padded
    (in_cols = W+2); col_offset=1: unpadded input, zero column padding folded in."""
    kh, kw, Ci, Co = w_hwio.shape
    B = np.zeros((kh, in_cols * Ci, W * Co), dtype=np.float32)
    for dy in range(kh):
        for j in range(W):
            for dx in range(kw):
                k = j + dx - col_offset
                if 0 <= k < in_cols:
                    B[dy, k * Ci:(k + 1) * Ci, j * Co:(j + 1) * Co] = w_hwio[dy, dx]
    return B


def _block_diag(w, W):
    Ci, Co = w.shape
    out = np.zeros((W * Ci, W * Co), dtype=np.float32)
    for j in range(W):
        out[j * Ci:(j + 1) * Ci, j * Co:(j + 1) * Co] = w
    return out


def ssb_forward(x, params, res_scale):
    """x: (N, H, W, C) float32 NHWC."""
    (w1, b1, w2, b2, w3, b3, w4, b4, wd, bd, wu, bu) = params
    N, H, W, C = x.shape
    WC = W * C
    WpC = (W + 2) * C

    # ---- wrapper-side weight preprocessing (host/XLA, amortized & free vs kernel) ----
    w1n, w2n, w3n, w4n = (np.asarray(a, np.float32) for a in (w1, w2, w3, w4))
    B1 = jnp.asarray(_banded_conv_weight(w1n, W, W + 2, 0), MM_DTYPE)   # (3, (W+2)C, WC)
    B2 = jnp.asarray(_banded_conv_weight(w2n, W, W, 1), MM_DTYPE)       # (3, WC, WC)
    w3bd = jnp.asarray(_block_diag(w3n, W), MM_DTYPE)                   # (WC, WC)
    w4bd = jnp.asarray(_block_diag(w4n, W), MM_DTYPE)                   # (WC, WC)
    b1t = jnp.tile(jnp.asarray(b1, jnp.float32), (1, W))                # (1, WC)
    b2t = jnp.tile(jnp.asarray(b2, jnp.float32), (1, W))
    b3t = jnp.tile(jnp.asarray(b3, jnp.float32), (1, W))
    b4t = jnp.tile(jnp.asarray(b4, jnp.float32), (1, W))
    tpool = jnp.asarray(np.tile(np.eye(C, dtype=np.float32), (W, 1)) / (H * W))  # (WC, C)
    ttile = jnp.asarray(np.tile(np.eye(C, dtype=np.float32), (1, W)))            # (C, WC)

    xpad = jnp.pad(x, ((0, 0), (1, 1), (1, 1), (0, 0))).reshape(N, H + 2, WpC)
    xflat = x.reshape(N, H, WC)

    kernel = make_ssb_kernel(H, W, C, res_scale)

    grid_spec = pltpu.PrefetchScalarGridSpec(
        num_scalar_prefetch=0,
        grid=(N,),
        in_specs=[
            pl.BlockSpec((pl.Squeezed(), H + 2, WpC), lambda n: (n, 0, 0)),
            pl.BlockSpec((pl.Squeezed(), H, WC), lambda n: (n, 0, 0)),
            _full_spec(B1.shape), _full_spec(b1t.shape),
            _full_spec(B2.shape), _full_spec(b2t.shape),
            _full_spec(w3bd.shape), _full_spec(b3t.shape),
            _full_spec(w4bd.shape), _full_spec(b4t.shape),
            _full_spec(wd.shape), _full_spec(bd.shape),
            _full_spec(wu.shape), _full_spec(bu.shape),
            _full_spec(tpool.shape), _full_spec(ttile.shape),
        ],
        out_specs=pl.BlockSpec((pl.Squeezed(), H, WC), lambda n: (n, 0, 0)),
        scratch_shapes=[pltpu.VMEM((H + 2, WC), jnp.float32)],
    )

    out = pl.pallas_call(
        kernel,
        out_shape=jax.ShapeDtypeStruct((N, H, WC), jnp.float32),
        grid_spec=grid_spec,
        compiler_params=pltpu.CompilerParams(dimension_semantics=("parallel",)),
    )(xpad, xflat, B1, b1t, B2, b2t, w3bd, b3t, w4bd, b4t,
      jnp.asarray(wd, jnp.float32), jnp.asarray(bd, jnp.float32),
      jnp.asarray(wu, jnp.float32), jnp.asarray(bu, jnp.float32),
      tpool, ttile)

    return out.reshape(N, H, W, C)


# ------------------------------ pure-JAX reference ------------------------------
def ssb_reference(x, params, res_scale):
    (w1, b1, w2, b2, w3, b3, w4, b4, wd, bd, wu, bu) = params

    def conv3x3(inp, w, b):
        y = jax.lax.conv_general_dilated(
            inp, w, (1, 1), "SAME", dimension_numbers=("NHWC", "HWIO", "NHWC"))
        return y + b

    # spa
    h = jax.nn.relu(conv3x3(x, w1, b1))
    y1 = x + res_scale * conv3x3(h, w2, b2)
    # spc
    h3 = jax.nn.relu(jnp.einsum("nhwc,cd->nhwd", y1, w3) + b3)
    h4 = jnp.einsum("nhwc,cd->nhwd", h3, w4) + b4
    pooled = jnp.mean(h4, axis=(1, 2), keepdims=True)
    z = jax.nn.relu(jnp.einsum("nhwc,cd->nhwd", pooled, wd) + bd)
    gate = jax.nn.sigmoid(jnp.einsum("nhwd,dc->nhwc", z, wu) + bu)
    return y1 + res_scale * (h4 * gate)


if __name__ == "__main__":
    # Small shapes consistent with the module: n_feats channels, square spatial.
    N, H, W = 2, 16, 16
    n_feats = 32
    kernel_size = 3                      # spa conv size (spc uses 1x1)
    res_scale = 0.1
    reduction = 16
    Cr = max(n_feats // reduction, 1)

    key = jax.random.PRNGKey(0)
    keys = jax.random.split(key, 14)
    s = 0.1
    x = jax.random.normal(keys[0], (N, H, W, n_feats), jnp.float32)

    w1 = s * jax.random.normal(keys[1], (kernel_size, kernel_size, n_feats, n_feats), jnp.float32)
    b1 = s * jax.random.normal(keys[2], (1, n_feats), jnp.float32)
    w2 = s * jax.random.normal(keys[3], (kernel_size, kernel_size, n_feats, n_feats), jnp.float32)
    b2 = s * jax.random.normal(keys[4], (1, n_feats), jnp.float32)
    w3 = s * jax.random.normal(keys[5], (n_feats, n_feats), jnp.float32)
    b3 = s * jax.random.normal(keys[6], (1, n_feats), jnp.float32)
    w4 = s * jax.random.normal(keys[7], (n_feats, n_feats), jnp.float32)
    b4 = s * jax.random.normal(keys[8], (1, n_feats), jnp.float32)
    wd = s * jax.random.normal(keys[9], (n_feats, Cr), jnp.float32)
    bd = s * jax.random.normal(keys[10], (1, Cr), jnp.float32)
    wu = s * jax.random.normal(keys[11], (Cr, n_feats), jnp.float32)
    bu = s * jax.random.normal(keys[12], (1, n_feats), jnp.float32)

    params = (w1, b1, w2, b2, w3, b3, w4, b4, wd, bd, wu, bu)

    out = ssb_forward(x, params, res_scale)
    out = jax.block_until_ready(out)

    ref = jax.block_until_ready(ssb_reference(x, params, res_scale))
    err = float(jnp.max(jnp.abs(out - ref)))
    assert out.shape == (N, H, W, n_feats) and out.dtype == jnp.float32
    # tolerance accounts for bf16 matmul operands (f32 accumulation, f32 elementwise)
    assert err < 2e-2, f"mismatch vs f32 reference: {err}"

    print("KERNEL_OK")
</pallas_src>

<mosaic_0001>
module attributes {stable_mosaic.version = 11 : i64} {
  func.func @kernel(%arg0: i32, %arg1: memref<1x18x576xf32, #tpu.memory_space<vmem>>, %arg2: memref<1x16x512xf32, #tpu.memory_space<vmem>>, %arg3: memref<3x576x512xbf16, #tpu.memory_space<vmem>>, %arg4: memref<1x512xf32, #tpu.memory_space<vmem>>, %arg5: memref<3x512x512xbf16, #tpu.memory_space<vmem>>, %arg6: memref<1x512xf32, #tpu.memory_space<vmem>>, %arg7: memref<512x512xbf16, #tpu.memory_space<vmem>>, %arg8: memref<1x512xf32, #tpu.memory_space<vmem>>, %arg9: memref<512x512xbf16, #tpu.memory_space<vmem>>, %arg10: memref<1x512xf32, #tpu.memory_space<vmem>>, %arg11: memref<32x2xf32, #tpu.memory_space<vmem>>, %arg12: memref<1x2xf32, #tpu.memory_space<vmem>>, %arg13: memref<2x32xf32, #tpu.memory_space<vmem>>, %arg14: memref<1x32xf32, #tpu.memory_space<vmem>>, %arg15: memref<512x32xf32, #tpu.memory_space<vmem>>, %arg16: memref<32x512xf32, #tpu.memory_space<vmem>>, %arg17: memref<1x16x512xf32, #tpu.memory_space<vmem>>, %arg18: memref<18x512xf32, #tpu.memory_space<vmem>>) attributes {dimension_semantics = [#tpu.dimension_semantics<parallel>], iteration_bounds = array<i64: 2>, scalar_prefetch = 0 : i64, scratch_operands = 1 : i64, tpu.core_type = #tpu.core_type<tc>, window_params = [{transform_indices = @transform_0, window_bounds = array<i64: 1, 18, 576>}, {transform_indices = @transform_1, window_bounds = array<i64: 1, 16, 512>}, {pipeline_mode = #tpu.pipeline_mode<synchronous>, transform_indices = @transform_2, window_bounds = array<i64: 3, 576, 512>}, {pipeline_mode = #tpu.pipeline_mode<synchronous>, transform_indices = @transform_3, window_bounds = array<i64: 1, 512>}, {pipeline_mode = #tpu.pipeline_mode<synchronous>, transform_indices = @transform_4, window_bounds = array<i64: 3, 512, 512>}, {pipeline_mode = #tpu.pipeline_mode<synchronous>, transform_indices = @transform_5, window_bounds = array<i64: 1, 512>}, {pipeline_mode = #tpu.pipeline_mode<synchronous>, transform_indices = @transform_6, window_bounds = array<i64: 512, 512>}, {pipeline_mode = #tpu.pipeline_mode<synchronous>, transform_indices = @transform_7, window_bounds = array<i64: 1, 512>}, {pipeline_mode = #tpu.pipeline_mode<synchronous>, transform_indices = @transform_8, window_bounds = array<i64: 512, 512>}, {pipeline_mode = #tpu.pipeline_mode<synchronous>, transform_indices = @transform_9, window_bounds = array<i64: 1, 512>}, {pipeline_mode = #tpu.pipeline_mode<synchronous>, transform_indices = @transform_10, window_bounds = array<i64: 32, 2>}, {pipeline_mode = #tpu.pipeline_mode<synchronous>, transform_indices = @transform_11, window_bounds = array<i64: 1, 2>}, {pipeline_mode = #tpu.pipeline_mode<synchronous>, transform_indices = @transform_12, window_bounds = array<i64: 2, 32>}, {pipeline_mode = #tpu.pipeline_mode<synchronous>, transform_indices = @transform_13, window_bounds = array<i64: 1, 32>}, {pipeline_mode = #tpu.pipeline_mode<synchronous>, transform_indices = @transform_14, window_bounds = array<i64: 512, 32>}, {pipeline_mode = #tpu.pipeline_mode<synchronous>, transform_indices = @transform_15, window_bounds = array<i64: 32, 512>}, {transform_indices = @transform_16, window_bounds = array<i64: 1, 16, 512>}]} {
    %c0 = arith.constant 0 : index
    %c0_0 = arith.constant 0 : index
    %c0_1 = arith.constant 0 : index
    %0 = vector.load %arg1[%c0, %c0_0, %c0_1] : memref<1x18x576xf32, #tpu.memory_space<vmem>>, vector<1x18x576xf32>
    %1 = vector.shape_cast %0 : vector<1x18x576xf32> to vector<18x576xf32>
    %c0_2 = arith.constant 0 : index
    %c0_3 = arith.constant 0 : index
    %c0_4 = arith.constant 0 : index
    %2 = vector.load %arg2[%c0_2, %c0_3, %c0_4] : memref<1x16x512xf32, #tpu.memory_space<vmem>>, vector<1x16x512xf32>
    %3 = vector.shape_cast %2 : vector<1x16x512xf32> to vector<16x512xf32>
    %4 = vector.extract_strided_slice %1 {offsets = [0, 0], sizes = [16, 576], strides = [1, 1]} : vector<18x576xf32> to vector<16x576xf32>
    %5 = arith.truncf %4 : vector<16x576xf32> to vector<16x576xbf16>
    %c0_5 = arith.constant 0 : index
    %c0_6 = arith.constant 0 : index
    %c0_7 = arith.constant 0 : index
    %6 = vector.load %arg3[%c0_5, %c0_6, %c0_7] : memref<3x576x512xbf16, #tpu.memory_space<vmem>>, vector<1x576x512xbf16>
    %7 = vector.shape_cast %6 : vector<1x576x512xbf16> to vector<576x512xbf16>
    %cst = arith.constant dense<0.000000e+00> : vector<16x512xf32>
    %8 = tpu.matmul %5, %7, %cst {dimension_numbers = #tpu.dot_dimension_numbers<[1], [0], [0], [1], [0, 0, 1, 1], [], []>} : vector<16x576xbf16>, vector<576x512xbf16>, vector<16x512xf32> -> vector<16x512xf32>
    %9 = vector.extract_strided_slice %1 {offsets = [1, 0], sizes = [16, 576], strides = [1, 1]} : vector<18x576xf32> to vector<16x576xf32>
    %10 = arith.truncf %9 : vector<16x576xf32> to vector<16x576xbf16>
    %c1 = arith.constant 1 : index
    %c0_8 = arith.constant 0 : index
    %c0_9 = arith.constant 0 : index
    %11 = vector.load %arg3[%c1, %c0_8, %c0_9] : memref<3x576x512xbf16, #tpu.memory_space<vmem>>, vector<1x576x512xbf16>
    %12 = vector.shape_cast %11 : vector<1x576x512xbf16> to vector<576x512xbf16>
    %cst_10 = arith.constant dense<0.000000e+00> : vector<16x512xf32>
    %13 = tpu.matmul %10, %12, %cst_10 {dimension_numbers = #tpu.dot_dimension_numbers<[1], [0], [0], [1], [0, 0, 1, 1], [], []>} : vector<16x576xbf16>, vector<576x512xbf16>, vector<16x512xf32> -> vector<16x512xf32>
    %14 = arith.addf %8, %13 : vector<16x512xf32>
    %15 = vector.extract_strided_slice %1 {offsets = [2, 0], sizes = [16, 576], strides = [1, 1]} : vector<18x576xf32> to vector<16x576xf32>
    %16 = arith.truncf %15 : vector<16x576xf32> to vector<16x576xbf16>
    %c2 = arith.constant 2 : index
    %c0_11 = arith.constant 0 : index
    %c0_12 = arith.constant 0 : index
    %17 = vector.load %arg3[%c2, %c0_11, %c0_12] : memref<3x576x512xbf16, #tpu.memory_space<vmem>>, vector<1x576x512xbf16>
    %18 = vector.shape_cast %17 : vector<1x576x512xbf16> to vector<576x512xbf16>
    %cst_13 = arith.constant dense<0.000000e+00> : vector<16x512xf32>
    %19 = tpu.matmul %16, %18, %cst_13 {dimension_numbers = #tpu.dot_dimension_numbers<[1], [0], [0], [1], [0, 0, 1, 1], [], []>} : vector<16x576xbf16>, vector<576x512xbf16>, vector<16x512xf32> -> vector<16x512xf32>
    %20 = arith.addf %14, %19 : vector<16x512xf32>
    %c0_14 = arith.constant 0 : index
    %c0_15 = arith.constant 0 : index
    %21 = vector.load %arg4[%c0_14, %c0_15] : memref<1x512xf32, #tpu.memory_space<vmem>>, vector<1x512xf32>
    %22 = vector.broadcast %21 : vector<1x512xf32> to vector<16x512xf32>
    %23 = arith.addf %20, %22 : vector<16x512xf32>
    %cst_16 = arith.constant 0.000000e+00 : f32
    %24 = vector.broadcast %cst_16 : f32 to vector<16x512xf32>
    %25 = arith.maximumf %23, %24 : vector<16x512xf32>
    %cst_17 = arith.constant 0.000000e+00 : f32
    %26 = vector.broadcast %cst_17 : f32 to vector<1x512xf32>
    %c0_18 = arith.constant 0 : index
    %c0_19 = arith.constant 0 : index
    %27 = vector.load %arg18[%c0_18, %c0_19] : memref<18x512xf32, #tpu.memory_space<vmem>>, vector<1x512xf32>
    tpu.vector_store %arg18[%c0_18, %c0_19], %26 {strides = array<i32>} : memref<18x512xf32, #tpu.memory_space<vmem>>, vector<1x512xf32>,
    %cst_20 = arith.constant 0.000000e+00 : f32
    %28 = vector.broadcast %cst_20 : f32 to vector<1x512xf32>
    %c17 = arith.constant 17 : index
    %c0_21 = arith.constant 0 : index
    %29 = vector.load %arg18[%c17, %c0_21] : memref<18x512xf32, #tpu.memory_space<vmem>>, vector<1x512xf32>
    tpu.vector_store %arg18[%c17, %c0_21], %28 {strides = array<i32>} : memref<18x512xf32, #tpu.memory_space<vmem>>, vector<1x512xf32>,
    %c1_22 = arith.constant 1 : index
    %c0_23 = arith.constant 0 : index
    %30 = vector.load %arg18[%c1_22, %c0_23] : memref<18x512xf32, #tpu.memory_space<vmem>>, vector<16x512xf32>
    tpu.vector_store %arg18[%c1_22, %c0_23], %25 {strides = array<i32>} : memref<18x512xf32, #tpu.memory_space<vmem>>, vector<16x512xf32>,
    %c0_24 = arith.constant 0 : index
    %c0_25 = arith.constant 0 : index
    %31 = vector.load %arg18[%c0_24, %c0_25] : memref<18x512xf32, #tpu.memory_space<vmem>>, vector<18x512xf32>
    %32 = vector.extract_strided_slice %31 {offsets = [0, 0], sizes = [16, 512], strides = [1, 1]} : vector<18x512xf32> to vector<16x512xf32>
    %33 = arith.truncf %32 : vector<16x512xf32> to vector<16x512xbf16>
    %c0_26 = arith.constant 0 : index
    %c0_27 = arith.constant 0 : index
    %c0_28 = arith.constant 0 : index
    %34 = vector.load %arg5[%c0_26, %c0_27, %c0_28] : memref<3x512x512xbf16, #tpu.memory_space<vmem>>, vector<1x512x512xbf16>
    %35 = vector.shape_cast %34 : vector<1x512x512xbf16> to vector<512x512xbf16>
    %cst_29 = arith.constant dense<0.000000e+00> : vector<16x512xf32>
    %36 = tpu.matmul %33, %35, %cst_29 {dimension_numbers = #tpu.dot_dimension_numbers<[1], [0], [0], [1], [0, 0, 1, 1], [], []>} : vector<16x512xbf16>, vector<512x512xbf16>, vector<16x512xf32> -> vector<16x512xf32>
    %37 = vector.extract_strided_slice %31 {offsets = [1, 0], sizes = [16, 512], strides = [1, 1]} : vector<18x512xf32> to vector<16x512xf32>
    %38 = arith.truncf %37 : vector<16x512xf32> to vector<16x512xbf16>
    %c1_30 = arith.constant 1 : index
    %c0_31 = arith.constant 0 : index
    %c0_32 = arith.constant 0 : index
    %39 = vector.load %arg5[%c1_30, %c0_31, %c0_32] : memref<3x512x512xbf16, #tpu.memory_space<vmem>>, vector<1x512x512xbf16>
    %40 = vector.shape_cast %39 : vector<1x512x512xbf16> to vector<512x512xbf16>
    %cst_33 = arith.constant dense<0.000000e+00> : vector<16x512xf32>
    %41 = tpu.matmul %38, %40, %cst_33 {dimension_numbers = #tpu.dot_dimension_numbers<[1], [0], [0], [1], [0, 0, 1, 1], [], []>} : vector<16x512xbf16>, vector<512x512xbf16>, vector<16x512xf32> -> vector<16x512xf32>
    %42 = arith.addf %36, %41 : vector<16x512xf32>
    %43 = vector.extract_strided_slice %31 {offsets = [2, 0], sizes = [16, 512], strides = [1, 1]} : vector<18x512xf32> to vector<16x512xf32>
    %44 = arith.truncf %43 : vector<16x512xf32> to vector<16x512xbf16>
    %c2_34 = arith.constant 2 : index
    %c0_35 = arith.constant 0 : index
    %c0_36 = arith.constant 0 : index
    %45 = vector.load %arg5[%c2_34, %c0_35, %c0_36] : memref<3x512x512xbf16, #tpu.memory_space<vmem>>, vector<1x512x512xbf16>
    %46 = vector.shape_cast %45 : vector<1x512x512xbf16> to vector<512x512xbf16>
    %cst_37 = arith.constant dense<0.000000e+00> : vector<16x512xf32>
    %47 = tpu.matmul %44, %46, %cst_37 {dimension_numbers = #tpu.dot_dimension_numbers<[1], [0], [0], [1], [0, 0, 1, 1], [], []>} : vector<16x512xbf16>, vector<512x512xbf16>, vector<16x512xf32> -> vector<16x512xf32>
    %48 = arith.addf %42, %47 : vector<16x512xf32>
    %c0_38 = arith.constant 0 : index
    %c0_39 = arith.constant 0 : index
    %49 = vector.load %arg6[%c0_38, %c0_39] : memref<1x512xf32, #tpu.memory_space<vmem>>, vector<1x512xf32>
    %50 = vector.broadcast %49 : vector<1x512xf32> to vector<16x512xf32>
    %51 = arith.addf %48, %50 : vector<16x512xf32>
    %cst_40 = arith.constant 1.000000e-01 : f32
    %52 = vector.broadcast %cst_40 : f32 to vector<16x512xf32>
    %53 = arith.mulf %52, %51 : vector<16x512xf32>
    %54 = arith.addf %3, %53 : vector<16x512xf32>
    %55 = arith.truncf %54 : vector<16x512xf32> to vector<16x512xbf16>
    %c0_41 = arith.constant 0 : index
    %c0_42 = arith.constant 0 : index
    %56 = vector.load %arg7[%c0_41, %c0_42] : memref<512x512xbf16, #tpu.memory_space<vmem>>, vector<512x512xbf16>
    %cst_43 = arith.constant dense<0.000000e+00> : vector<16x512xf32>
    %57 = tpu.matmul %55, %56, %cst_43 {dimension_numbers = #tpu.dot_dimension_numbers<[1], [0], [0], [1], [0, 0, 1, 1], [], []>} : vector<16x512xbf16>, vector<512x512xbf16>, vector<16x512xf32> -> vector<16x512xf32>
    %c0_44 = arith.constant 0 : index
    %c0_45 = arith.constant 0 : index
    %58 = vector.load %arg8[%c0_44, %c0_45] : memref<1x512xf32, #tpu.memory_space<vmem>>, vector<1x512xf32>
    %59 = vector.broadcast %58 : vector<1x512xf32> to vector<16x512xf32>
    %60 = arith.addf %57, %59 : vector<16x512xf32>
    %cst_46 = arith.constant 0.000000e+00 : f32
    %61 = vector.broadcast %cst_46 : f32 to vector<16x512xf32>
    %62 = arith.maximumf %60, %61 : vector<16x512xf32>
    %63 = arith.truncf %62 : vector<16x512xf32> to vector<16x512xbf16>
    %c0_47 = arith.constant 0 : index
    %c0_48 = arith.constant 0 : index
    %64 = vector.load %arg9[%c0_47, %c0_48] : memref<512x512xbf16, #tpu.memory_space<vmem>>, vector<512x512xbf16>
    %cst_49 = arith.constant dense<0.000000e+00> : vector<16x512xf32>
    %65 = tpu.matmul %63, %64, %cst_49 {dimension_numbers = #tpu.dot_dimension_numbers<[1], [0], [0], [1], [0, 0, 1, 1], [], []>} : vector<16x512xbf16>, vector<512x512xbf16>, vector<16x512xf32> -> vector<16x512xf32>
    %c0_50 = arith.constant 0 : index
    %c0_51 = arith.constant 0 : index
    %66 = vector.load %arg10[%c0_50, %c0_51] : memref<1x512xf32, #tpu.memory_space<vmem>>, vector<1x512xf32>
    %67 = vector.broadcast %66 : vector<1x512xf32> to vector<16x512xf32>
    %68 = arith.addf %65, %67 : vector<16x512xf32>
    %cst_52 = arith.constant dense<0.000000e+00> : vector<512xf32>
    %69 = vector.multi_reduction <add>, %68, %cst_52 [0] : vector<16x512xf32> to vector<512xf32>
    %70 = vector.shape_cast %69 : vector<512xf32> to vector<1x512xf32>
    %c0_53 = arith.constant 0 : index
    %c0_54 = arith.constant 0 : index
    %71 = vector.load %arg15[%c0_53, %c0_54] : memref<512x32xf32, #tpu.memory_space<vmem>>, vector<512x32xf32>
    %cst_55 = arith.constant dense<0.000000e+00> : vector<1x32xf32>
    %72 = tpu.matmul %70, %71, %cst_55 {dimension_numbers = #tpu.dot_dimension_numbers<[1], [0], [0], [1], [0, 0, 1, 1], [], []>} : vector<1x512xf32>, vector<512x32xf32>, vector<1x32xf32> -> vector<1x32xf32>
    %c0_56 = arith.constant 0 : index
    %c0_57 = arith.constant 0 : index
    %73 = vector.load %arg11[%c0_56, %c0_57] : memref<32x2xf32, #tpu.memory_space<vmem>>, vector<32x2xf32>
    %cst_58 = arith.constant dense<0.000000e+00> : vector<1x2xf32>
    %74 = tpu.matmul %72, %73, %cst_58 {dimension_numbers = #tpu.dot_dimension_numbers<[1], [0], [0], [1], [0, 0, 1, 1], [], []>} : vector<1x32xf32>, vector<32x2xf32>, vector<1x2xf32> -> vector<1x2xf32>
    %c0_59 = arith.constant 0 : index
    %c0_60 = arith.constant 0 : index
    %75 = vector.load %arg12[%c0_59, %c0_60] : memref<1x2xf32, #tpu.memory_space<vmem>>, vector<1x2xf32>
    %76 = arith.addf %74, %75 : vector<1x2xf32>
    %cst_61 = arith.constant 0.000000e+00 : f32
    %77 = vector.broadcast %cst_61 : f32 to vector<1x2xf32>
    %78 = arith.maximumf %76, %77 : vector<1x2xf32>
    %c0_62 = arith.constant 0 : index
    %c0_63 = arith.constant 0 : index
    %79 = vector.load %arg13[%c0_62, %c0_63] : memref<2x32xf32, #tpu.memory_space<vmem>>, vector<2x32xf32>
    %cst_64 = arith.constant dense<0.000000e+00> : vector<1x32xf32>
    %80 = tpu.matmul %78, %79, %cst_64 {dimension_numbers = #tpu.dot_dimension_numbers<[1], [0], [0], [1], [0, 0, 1, 1], [], []>} : vector<1x2xf32>, vector<2x32xf32>, vector<1x32xf32> -> vector<1x32xf32>
    %c0_65 = arith.constant 0 : index
    %c0_66 = arith.constant 0 : index
    %81 = vector.load %arg14[%c0_65, %c0_66] : memref<1x32xf32, #tpu.memory_space<vmem>>, vector<1x32xf32>
    %82 = arith.addf %80, %81 : vector<1x32xf32>
    %83 = arith.negf %82 : vector<1x32xf32>
    %84 = math.exp %83 : vector<1x32xf32>
    %cst_67 = arith.constant 1.000000e+00 : f32
    %85 = vector.broadcast %cst_67 : f32 to vector<1x32xf32>
    %86 = arith.addf %85, %84 : vector<1x32xf32>
    %87 = arith.divf %85, %86 : vector<1x32xf32>
    %c0_68 = arith.constant 0 : index
    %c0_69 = arith.constant 0 : index
    %88 = vector.load %arg16[%c0_68, %c0_69] : memref<32x512xf32, #tpu.memory_space<vmem>>, vector<32x512xf32>
    %cst_70 = arith.constant dense<0.000000e+00> : vector<1x512xf32>
    %89 = tpu.matmul %87, %88, %cst_70 {dimension_numbers = #tpu.dot_dimension_numbers<[1], [0], [0], [1], [0, 0, 1, 1], [], []>} : vector<1x32xf32>, vector<32x512xf32>, vector<1x512xf32> -> vector<1x512xf32>
    %90 = vector.broadcast %89 : vector<1x512xf32> to vector<16x512xf32>
    %91 = arith.mulf %68, %90 : vector<16x512xf32>
    %cst_71 = arith.constant 1.000000e-01 : f32
    %92 = vector.broadcast %cst_71 : f32 to vector<16x512xf32>
    %93 = arith.mulf %92, %91 : vector<16x512xf32>
    %94 = arith.addf %54, %93 : vector<16x512xf32>
    %c0_72 = arith.constant 0 : index
    %c0_73 = arith.constant 0 : index
    %c0_74 = arith.constant 0 : index
    %95 = vector.load %arg17[%c0_72, %c0_73, %c0_74] : memref<1x16x512xf32, #tpu.memory_space<vmem>>, vector<1x16x512xf32>
    %96 = vector.shape_cast %95 : vector<1x16x512xf32> to vector<16x512xf32>
    %97 = vector.shape_cast %94 : vector<16x512xf32> to vector<1x16x512xf32>
    tpu.vector_store %arg17[%c0_72, %c0_73, %c0_74], %97 {strides = array<i32>} : memref<1x16x512xf32, #tpu.memory_space<vmem>>, vector<1x16x512xf32>,
    return
  }
  func.func @transform_0(%arg0: i32) -> (i32, i32, i32) {
    %c0_i32 = arith.constant 0 : i32
    %c0_i32_0 = arith.constant 0 : i32
    %c0_i32_1 = arith.constant 0 : i32
    return %arg0, %c0_i32, %c0_i32_0 : i32, i32, i32
  }
  func.func @transform_1(%arg0: i32) -> (i32, i32, i32) {
    %c0_i32 = arith.constant 0 : i32
    %c0_i32_0 = arith.constant 0 : i32
    %c0_i32_1 = arith.constant 0 : i32
    return %arg0, %c0_i32, %c0_i32_0 : i32, i32, i32
  }
  func.func @transform_2(%arg0: i32) -> (i32, i32, i32) {
    %c0_i32 = arith.constant 0 : i32
    %c0_i32_0 = arith.constant 0 : i32
    %c0_i32_1 = arith.constant 0 : i32
    %c0_i32_2 = arith.constant 0 : i32
    return %c0_i32, %c0_i32_0, %c0_i32_1 : i32, i32, i32
  }
  func.func @transform_3(%arg0: i32) -> (i32, i32) {
    %c0_i32 = arith.constant 0 : i32
    %c0_i32_0 = arith.constant 0 : i32
    %c0_i32_1 = arith.constant 0 : i32
    return %c0_i32, %c0_i32_0 : i32, i32
  }
  func.func @transform_4(%arg0: i32) -> (i32, i32, i32) {
    %c0_i32 = arith.constant 0 : i32
    %c0_i32_0 = arith.constant 0 : i32
    %c0_i32_1 = arith.constant 0 : i32
    %c0_i32_2 = arith.constant 0 : i32
    return %c0_i32, %c0_i32_0, %c0_i32_1 : i32, i32, i32
  }
  func.func @transform_5(%arg0: i32) -> (i32, i32) {
    %c0_i32 = arith.constant 0 : i32
    %c0_i32_0 = arith.constant 0 : i32
    %c0_i32_1 = arith.constant 0 : i32
    return %c0_i32, %c0_i32_0 : i32, i32
  }
  func.func @transform_6(%arg0: i32) -> (i32, i32) {
    %c0_i32 = arith.constant 0 : i32
    %c0_i32_0 = arith.constant 0 : i32
    %c0_i32_1 = arith.constant 0 : i32
    return %c0_i32, %c0_i32_0 : i32, i32
  }
  func.func @transform_7(%arg0: i32) -> (i32, i32) {
    %c0_i32 = arith.constant 0 : i32
    %c0_i32_0 = arith.constant 0 : i32
    %c0_i32_1 = arith.constant 0 : i32
    return %c0_i32, %c0_i32_0 : i32, i32
  }
  func.func @transform_8(%arg0: i32) -> (i32, i32) {
    %c0_i32 = arith.constant 0 : i32
    %c0_i32_0 = arith.constant 0 : i32
    %c0_i32_1 = arith.constant 0 : i32
    return %c0_i32, %c0_i32_0 : i32, i32
  }
  func.func @transform_9(%arg0: i32) -> (i32, i32) {
    %c0_i32 = arith.constant 0 : i32
    %c0_i32_0 = arith.constant 0 : i32
    %c0_i32_1 = arith.constant 0 : i32
    return %c0_i32, %c0_i32_0 : i32, i32
  }
  func.func @transform_10(%arg0: i32) -> (i32, i32) {
    %c0_i32 = arith.constant 0 : i32
    %c0_i32_0 = arith.constant 0 : i32
    %c0_i32_1 = arith.constant 0 : i32
    return %c0_i32, %c0_i32_0 : i32, i32
  }
  func.func @transform_11(%arg0: i32) -> (i32, i32) {
    %c0_i32 = arith.constant 0 : i32
    %c0_i32_0 = arith.constant 0 : i32
    %c0_i32_1 = arith.constant 0 : i32
    return %c0_i32, %c0_i32_0 : i32, i32
  }
  func.func @transform_12(%arg0: i32) -> (i32, i32) {
    %c0_i32 = arith.constant 0 : i32
    %c0_i32_0 = arith.constant 0 : i32
    %c0_i32_1 = arith.constant 0 : i32
    return %c0_i32, %c0_i32_0 : i32, i32
  }
  func.func @transform_13(%arg0: i32) -> (i32, i32) {
    %c0_i32 = arith.constant 0 : i32
    %c0_i32_0 = arith.constant 0 : i32
    %c0_i32_1 = arith.constant 0 : i32
    return %c0_i32, %c0_i32_0 : i32, i32
  }
  func.func @transform_14(%arg0: i32) -> (i32, i32) {
    %c0_i32 = arith.constant 0 : i32
    %c0_i32_0 = arith.constant 0 : i32
    %c0_i32_1 = arith.constant 0 : i32
    return %c0_i32, %c0_i32_0 : i32, i32
  }
  func.func @transform_15(%arg0: i32) -> (i32, i32) {
    %c0_i32 = arith.constant 0 : i32
    %c0_i32_0 = arith.constant 0 : i32
    %c0_i32_1 = arith.constant 0 : i32
    return %c0_i32, %c0_i32_0 : i32, i32
  }
  func.func @transform_16(%arg0: i32) -> (i32, i32, i32) {
    %c0_i32 = arith.constant 0 : i32
    %c0_i32_0 = arith.constant 0 : i32
    %c0_i32_1 = arith.constant 0 : i32
    return %arg0, %c0_i32, %c0_i32_0 : i32, i32, i32
  }
}

</mosaic_0001>

<bundles_post_ra>
// kernel: tpu_custom_call.1
= control target key start
LH: loop header
LB: loop body
LE: loop exit
PB: predicated region body
PF: predicated region fallthrough
CT: control target
= control target key end

     0   :  { %s14681_s0 = inlined_call_operand.vmem [shape: f32[2,18,576], index: 0, kind: input, shape index: {}]   ;;  %s14682_s1 = inlined_call_operand.hbm [shape: f32[2,16,512], index: 1, kind: input, shape index: {}]   ;;  %s14683_s2 = inlined_call_operand.hbm [shape: bf16[3,576,512], index: 2, kind: input, shape index: {}]   ;;  %s14684_s3 = inlined_call_operand.hbm [shape: f32[1,512], index: 3, kind: input, shape index: {}]   ;;  %s14685_s4 = inlined_call_operand.hbm [shape: bf16[3,512,512], index: 4, kind: input, shape index: {}]   ;;  %s14686_s5 = inlined_call_operand.hbm [shape: f32[1,512], index: 5, kind: input, shape index: {}]   ;;  %s14687_s6 = inlined_call_operand.hbm [shape: bf16[512,512], index: 6, kind: input, shape index: {}]   ;;  %s14688_s7 = inlined_call_operand.hbm [shape: f32[1,512], index: 7, kind: input, shape index: {}]   ;;  %s14689_s8 = inlined_call_operand.hbm [shape: bf16[512,512], index: 8, kind: input, shape index: {}]   ;;  %s14690_s9 = inlined_call_operand.hbm [shape: f32[1,512], index: 9, kind: input, shape index: {}]   ;;  %s14691_s10 = inlined_call_operand.vmem [shape: f32[32,2], index: 10, kind: input, shape index: {}]   ;;  %s14692_s11 = inlined_call_operand.hbm [shape: f32[1,2], index: 11, kind: input, shape index: {}]   ;;  %s14693_s12 = inlined_call_operand.hbm [shape: f32[2,32], index: 12, kind: input, shape index: {}]   ;;  %s14694_s13 = inlined_call_operand.hbm [shape: f32[1,32], index: 13, kind: input, shape index: {}]   ;;  %s14695_s14 = inlined_call_operand.vmem [shape: f32[512,32], index: 14, kind: input, shape index: {}]   ;;  %s14696_s15 = inlined_call_operand.hbm [shape: f32[32,512], index: 15, kind: input, shape index: {}]   ;;  %s14697_s16 = inlined_call_operand.hbm [shape: f32[2,16,512], index: 16, kind: output, shape index: {}]  }
   0x1   :  { %14706 = sst [smem:[#allocation33_spill]] %s14681_s0 }
   0x2   :  { %14707 = sst [smem:[#allocation34_spill]] %s14683_s2 }
   0x3   :  { %14708 = sst [smem:[#allocation35_spill]] %s14684_s3 }
   0x4   :  { %14709 = sst [smem:[#allocation36_spill]] %s14685_s4 }
   0x5   :  { %14710 = sst [smem:[#allocation37_spill]] %s14686_s5 }
   0x6   :  { %14711 = sst [smem:[#allocation38_spill]] %s14687_s6 }
   0x7   :  { %14712 = sst [smem:[#allocation39_spill]] %s14688_s7 }
   0x8   :  { %14713 = sst [smem:[#allocation40_spill]] %s14689_s8 }
   0x9   :  { %14714 = sst [smem:[#allocation41_spill]] %s14691_s10 }
   0xa   :  { %14715 = sst [smem:[#allocation42_spill]] %s14697_s16 }
   0xb   :  { %21 = vsyncpa [#allocation4], 0 }
   0xc   :  { %23 = vsyncpa [#allocation4 + $0x1], 0 }
   0xd   :  { %24 = vsyncpa [#allocation7], 0 }
   0xe   :  { %25 = vsyncpa [#allocation10], 0 }
   0xf   :  { %26 = vsyncpa [#allocation13], 0 }
  0x10   :  { %27 = vsyncpa [#allocation16], 0 }
  0x11   :  { %28 = vsyncpa [#allocation19], 0 }
  0x12   :  { %29 = vsyncpa [#allocation22], 0 }
  0x13   :  { %30 = vsyncpa [#allocation5], 0 }
  0x14   :  { %32 = vsyncpa [#allocation5 + $0x1], 0  ;;  %s13603_s21 = smov 0   ;;  %s13605_s22 = smov 0  }
  0x15   :  { %s13607_s23 = smov 0   ;;  %s13609_s24 = smov 0  }
  0x16 LB: > { %s13495_s25 = smov [#allocation6]   ;;  %s13624_s27 = sadd.s32 4294967295, %s13493_s24   ;;  %s13493_s24 = sphi %s13609_s24, %s14757_s24   ;;  %s13489_s23 = sphi %s13607_s23, %s14756_s23   ;;  %s13485_s22 = sphi %s13605_s22, %s14755_s22   ;;  %s13481_s21 = sphi %s13603_s21, %s14754_s21  }
  0x17   : > { %s427_s26 = sshll.u32 %s13495_s25, 4  ;;  %p10059_p0 = scmp.ge.s32.totalorder %s13493_s24, 1  ;;  %s428_s26 = int_to_ptr.vmem [resolvable:$true] %s427_s26 }
  0x18   : > { %p14700_p1 = scmp.eq.s32.totalorder %s13624_s27, 0  ;;  %p415_p2 = scmp.lt.s32.totalorder %s13493_s24, 3 }
  0x19   : > { %s13496_s29 = smov [#allocation9]   ;;  %s13497_s17 = smov [#allocation12]  }
  0x1a   : > { %p13629_p3 = pnand %p10059_p0, %p415_p2  ;;  %s451_s30 = sshll.u32 %s13496_s29, 4  ;;  %s13642_s30 = int_to_ptr.vmem [resolvable:$true] %s451_s30 }
  0x1b   : > { %s475_s18 = sshll.u32 %s13497_s17, 4  ;;  %s13076_s20 = scalar_lea.vmem %s428_s26, 55296  ;;  %s13644_s18 = int_to_ptr.vmem [resolvable:$true] %s475_s18 }
  0x1c   : > { %s14716_s28 = scalar_select %p13629_p3, 1, 0 }
  0x1d   : > { %p11329_p5 = pneg %p13629_p3  ;;  %p13077_p8 = scmp.ne.s32.totalorder %s428_s26, %s13076_s20 }
  0x1e   : > { %p13084_p11 = scmp.lt.s32.totalorder %s428_s26, %s428_s26  ;;  %p13085_p12 = scmp.lt.s32.totalorder %s13076_s20, %s13076_s20 }
  0x1f   : > { %p13638_p6 = pnand %p11329_p5, %p14700_p1 }
  0x20   : > { %p13086_p13 = por %p13085_p12, %p13084_p11 }
  0x21   : > { %p13648_p7 = pneg %p13638_p6 }
  0x23   : > { %p13079_p9 = pnand %p13077_p8, %p13648_p7 }
  0x25   : > { %p13080_p10 = pneg %p13079_p9 }
  0x27   : > { %p13087_p0 = pnand %p13086_p13, %p13080_p10 }
  0x29   : > { %13090 = shalt.err (!%p13087_p0)
}
  0x2a   : > { %s13498_s25 = smov 256   ;;  %s13499_s29 = smov 16  }
  0x2b   : > { %s14719_s2 = sld [smem:[#allocation34_spill]]  ;;  %s13102_s10 = scalar_lea.vmem %s13642_s30, 49152 }
  0x2c   : > { %p13103_p2 = scmp.ne.s32.totalorder %s13642_s30, %s13102_s10  ;;  %p13110_p9 = scmp.lt.s32.totalorder %s13642_s30, %s13642_s30 }
  0x2d   : > { %p13111_p10 = scmp.lt.s32.totalorder %s13102_s10, %s13102_s10 }
  0x2e   : > { %p13105_p5 = pnand %p13103_p2, %p13648_p7 }
  0x2f   : > { %p13112_p11 = por %p13111_p10, %p13110_p9 }
  0x30   : > { %p13106_p8 = pneg %p13105_p5 }
  0x31   : > { %11332 = dma.hbm_to_vmem [thread:$0]  (!%p13638_p6), %s14719_s2, 55296, %s428_s26, [#allocation7], %s13498_s25, %s13498_s25, %s13499_s29  }
  0x32   : > { %p13113_p12 = pnand %p13112_p11, %p13106_p8 }
  0x34   : > { %13116 = shalt.err (!%p13113_p12)
}
  0x35   : > { %s14720_s4 = sld [smem:[#allocation36_spill]]  ;;  %s13128_s26 = scalar_lea.vmem %s13644_s18, 16384 }
  0x36   : > { %p13129_p13 = scmp.ne.s32.totalorder %s13644_s18, %s13128_s26  ;;  %p13136_p5 = scmp.lt.s32.totalorder %s13644_s18, %s13644_s18 }
  0x37   : > { %p13137_p8 = scmp.lt.s32.totalorder %s13128_s26, %s13128_s26 }
  0x38   : > { %p13131_p0 = pnand %p13129_p13, %p13648_p7 }
  0x39   : > { %p13138_p9 = por %p13137_p8, %p13136_p5 }
  0x3a   : > { %p13132_p2 = pneg %p13131_p0 }
  0x3b   : > { %11338 = dma.hbm_to_vmem [thread:$0]  (!%p13638_p6), %s14720_s4, 49152, %s13642_s30, [#allocation10], %s13498_s25, %s13498_s25, %s13499_s29  }
  0x3c   : > { %p13139_p10 = pnand %p13138_p9, %p13132_p2 }
  0x3e   : > { %13142 = shalt.err (!%p13139_p10)
}
  0x3f   : > { %s14721_s6 = sld [smem:[#allocation38_spill]]  ;;  %s13500_s30 = smov [#allocation15]  }
  0x40   : > { %s499_s20 = sshll.u32 %s13500_s30, 4  ;;  %s13501_s16 = smov [#allocation18]   ;;  %s500_s20 = int_to_ptr.vmem [resolvable:$true] %s499_s20 }
  0x41   : > { %s527_s2 = sshll.u32 %s13501_s16, 4  ;;  %s13154_s26 = scalar_lea.vmem %s500_s20, 16384  ;;  %s528_s2 = int_to_ptr.vmem [resolvable:$true] %s527_s2 }
  0x42   : > { %p13155_p11 = scmp.ne.s32.totalorder %s500_s20, %s13154_s26  ;;  %p13162_p0 = scmp.lt.s32.totalorder %s500_s20, %s500_s20 }
  0x43   : > { %p13163_p2 = scmp.lt.s32.totalorder %s13154_s26, %s13154_s26 }
  0x44   : > { %p13157_p12 = pnand %p13155_p11, %p13648_p7 }
  0x45   : > { %11344 = dma.hbm_to_vmem [thread:$0]  (!%p13638_p6), %s14721_s6, 16384, %s13644_s18, [#allocation13], %s13498_s25, %s13498_s25, %s13499_s29  }
  0x46   : > { %p13158_p13 = pneg %p13157_p12  ;;  %p13164_p5 = por %p13163_p2, %p13162_p0 }
  0x48   : > { %p13165_p8 = pnand %p13164_p5, %p13158_p13 }
  0x4a   : > { %13168 = shalt.err (!%p13165_p8)
}
  0x4b   : > { %s14722_s8 = sld [smem:[#allocation40_spill]]  ;;  %s13180_s17 = scalar_lea.vmem %s528_s2, 16 }
  0x4c   : > { %p13181_p9 = scmp.ne.s32.totalorder %s528_s2, %s13180_s17  ;;  %s13187_s30 = scalar_lea.vmem %s528_s2, 32 }
  0x4d   : > { %p13188_p12 = scmp.lt.s32.totalorder %s528_s2, %s528_s2  ;;  %p13189_p13 = scmp.lt.s32.totalorder %s13187_s30, %s13180_s17 }
  0x4e   : > { %p13183_p10 = pnand %p13181_p9, %p13648_p7 }
  0x4f   : > { %p13190_p0 = por %p13189_p13, %p13188_p12 }
  0x50   : > { %p13184_p11 = pneg %p13183_p10 }
  0x51   : > { %11350 = dma.hbm_to_vmem [thread:$0]  (!%p13638_p6), %s14722_s8, 16384, %s500_s20, [#allocation16], %s13498_s25, %s13498_s25, %s13499_s29  }
  0x52   : > { %p13191_p2 = pnand %p13190_p0, %p13184_p11 }
  0x54   : > { %13194 = shalt.err (!%p13191_p2)
}
  0x55   : > { %11356 = dma.hbm_to_vmem [thread:$0]  (!%p13638_p6), %s14692_s11, 16, %s528_s2, [#allocation19]  }
  0x56   : > { %s13502_s25 = smov [#allocation21]   ;;  %s13503_s20 = smov [#allocation8]  }
  0x57   : > { %s549_s29 = sshll.u32 %s13502_s25, 4  ;;  %s441_s18 = sshll.u32 %s13503_s20, 4  ;;  %s550_s29 = int_to_ptr.vmem [resolvable:$true] %s549_s29  ;;  %s442_s18 = int_to_ptr.vmem [resolvable:$true] %s441_s18 }
  0x58   : > { %s13206_s10 = scalar_lea.vmem %s550_s29, 16  ;;  %s13213_s17 = scalar_lea.vmem %s550_s29, 32 }
  0x59   : > { %p13207_p5 = scmp.ne.s32.totalorder %s550_s29, %s13206_s10  ;;  %p13214_p10 = scmp.lt.s32.totalorder %s550_s29, %s550_s29 }
  0x5a   : > { %p13215_p11 = scmp.lt.s32.totalorder %s13213_s17, %s13206_s10 }
  0x5b   : > { %p13209_p8 = pnand %p13207_p5, %p13648_p7 }
  0x5c   : > { %p13216_p12 = por %p13215_p11, %p13214_p10 }
  0x5d   : > { %p13210_p9 = pneg %p13209_p8 }
  0x5f   : > { %p13217_p13 = pnand %p13216_p12, %p13210_p9 }
  0x61   : > { %13220 = shalt.err (!%p13217_p13)
}
  0x62   : > { %11362 = dma.hbm_to_vmem [thread:$0]  (!%p13638_p6), %s14694_s13, 16, %s550_s29, [#allocation22]  }
  0x63   : > { %s13232_s16 = scalar_lea.vmem %s442_s18, 64  ;;  %p13240_p8 = scmp.lt.s32.totalorder %s442_s18, %s442_s18 }
  0x64   : > { %p13233_p0 = scmp.ne.s32.totalorder %s442_s18, %s13232_s16  ;;  %p13241_p4 = scmp.lt.s32.totalorder %s13232_s16, %s13232_s16 }
  0x66   : > { %p13235_p2 = pnand %p13233_p0, %p13648_p7  ;;  %p13242_p1 = por %p13241_p4, %p13240_p8 }
  0x68   : > { %p13236_p5 = pneg %p13235_p2 }
  0x6a   : > { %p13243_p3 = pnand %p13242_p1, %p13236_p5 }
  0x6c   : > { %13246 = shalt.err (!%p13243_p3)
}
  0x6d   : > { %s14723_s3 = sld [smem:[#allocation35_spill]]  ;;  %s13504_s20 = smov [#allocation11]  }
  0x6e   : > { %s465_s29 = sshll.u32 %s13504_s20, 4  ;;  %s13505_s10 = smov [#allocation14]   ;;  %s466_s29 = int_to_ptr.vmem [resolvable:$true] %s465_s29 }
  0x6f   : > { %s489_s17 = sshll.u32 %s13505_s10, 4  ;;  %s13258_s30 = scalar_lea.vmem %s466_s29, 64  ;;  %s490_s17 = int_to_ptr.vmem [resolvable:$true] %s489_s17 }
  0x70   : > { %p13259_p9 = scmp.ne.s32.totalorder %s466_s29, %s13258_s30  ;;  %p13266_p4 = scmp.lt.s32.totalorder %s466_s29, %s466_s29 }
  0x71   : > { %p13267_p1 = scmp.lt.s32.totalorder %s13258_s30, %s13258_s30 }
  0x72   : > { %p13261_p10 = pnand %p13259_p9, %p13648_p7 }
  0x73   : > { %11335 = dma.hbm_to_vmem [thread:$0]  (!%p13638_p6), %s14723_s3, 64, %s442_s18, [#allocation7]  }
  0x74   : > { %p13262_p11 = pneg %p13261_p10  ;;  %p13268_p3 = por %p13267_p1, %p13266_p4 }
  0x76   : > { %p13269_p12 = pnand %p13268_p3, %p13262_p11 }
  0x78   : > { %13272 = shalt.err (!%p13269_p12)
}
  0x79   : > { %s14724_s5 = sld [smem:[#allocation37_spill]]  ;;  %s13284_s18 = scalar_lea.vmem %s490_s17, 64 }
  0x7a   : > { %p13285_p13 = scmp.ne.s32.totalorder %s490_s17, %s13284_s18  ;;  %p13292_p5 = scmp.lt.s32.totalorder %s490_s17, %s490_s17 }
  0x7b   : > { %p13293_p8 = scmp.lt.s32.totalorder %s13284_s18, %s13284_s18 }
  0x7c   : > { %p13287_p0 = pnand %p13285_p13, %p13648_p7 }
  0x7d   : > { %p13294_p9 = por %p13293_p8, %p13292_p5 }
  0x7e   : > { %p13288_p2 = pneg %p13287_p0 }
  0x7f   : > { %11341 = dma.hbm_to_vmem [thread:$0]  (!%p13638_p6), %s14724_s5, 64, %s466_s29, [#allocation10]  }
  0x80   : > { %p13295_p10 = pnand %p13294_p9, %p13288_p2 }
  0x82   : > { %13298 = shalt.err (!%p13295_p10)
}
  0x83   : > { %s14725_s7 = sld [smem:[#allocation39_spill]]  ;;  %s13506_s20 = smov [#allocation17]  }
  0x84   : > { %s513_s29 = sshll.u32 %s13506_s20, 4  ;;  %s13507_s10 = smov [#allocation20]   ;;  %s514_s29 = int_to_ptr.vmem [resolvable:$true] %s513_s29 }
  0x85   : > { %s538_s30 = sshll.u32 %s13507_s10, 4  ;;  %s13310_s2 = scalar_lea.vmem %s514_s29, 64  ;;  %s539_s30 = int_to_ptr.vmem [resolvable:$true] %s538_s30 }
  0x86   : > { %p13311_p11 = scmp.ne.s32.totalorder %s514_s29, %s13310_s2  ;;  %p13318_p3 = scmp.lt.s32.totalorder %s514_s29, %s514_s29 }
  0x87   : > { %p13319_p12 = scmp.lt.s32.totalorder %s13310_s2, %s13310_s2 }
  0x88   : > { %p13313_p4 = pnand %p13311_p11, %p13648_p7 }
  0x89   : > { %11347 = dma.hbm_to_vmem [thread:$0]  (!%p13638_p6), %s14725_s7, 64, %s490_s17, [#allocation13]  }
  0x8a   : > { %p13314_p1 = pneg %p13313_p4  ;;  %p13320_p13 = por %p13319_p12, %p13318_p3 }
  0x8c   : > { %p13321_p0 = pnand %p13320_p13, %p13314_p1 }
  0x8e   : > { %13324 = shalt.err (!%p13321_p0)
}
  0x8f   : > { %11353 = dma.hbm_to_vmem [thread:$0]  (!%p13638_p6), %s14690_s9, 64, %s514_s29, [#allocation16]  }
  0x90   : > { %s13336_s17 = scalar_lea.vmem %s539_s30, 32  ;;  %p13344_p9 = scmp.lt.s32.totalorder %s539_s30, %s539_s30 }
  0x91   : > { %p13337_p2 = scmp.ne.s32.totalorder %s539_s30, %s13336_s17  ;;  %p13345_p10 = scmp.lt.s32.totalorder %s13336_s17, %s13336_s17 }
  0x93   : > { %p13339_p5 = pnand %p13337_p2, %p13648_p7  ;;  %p13346_p11 = por %p13345_p10, %p13344_p9 }
  0x95   : > { %p13340_p8 = pneg %p13339_p5 }
  0x97   : > { %p13347_p4 = pnand %p13346_p11, %p13340_p8 }
  0x99   : > { %13350 = shalt.err (!%p13347_p4)
}
  0x9a   : > { %11359 = dma.hbm_to_vmem [thread:$0]  (!%p13638_p6), %s14693_s12, 32, %s539_s30, [#allocation19]  }
  0x9b   : > { %s13508_s20 = smov [#allocation23]  }
  0x9c   : > { %s562_s29 = sshll.u32 %s13508_s20, 4  ;;  %s563_s29 = int_to_ptr.vmem [resolvable:$true] %s562_s29 }
  0x9d   : > { %s13362_s10 = scalar_lea.vmem %s563_s29, 2048  ;;  %p13370_p13 = scmp.lt.s32.totalorder %s563_s29, %s563_s29 }
  0x9e   : > { %p13363_p1 = scmp.ne.s32.totalorder %s563_s29, %s13362_s10  ;;  %p13371_p0 = scmp.lt.s32.totalorder %s13362_s10, %s13362_s10 }
  0xa0   : > { %p13365_p3 = pnand %p13363_p1, %p13648_p7  ;;  %p13372_p2 = por %p13371_p0, %p13370_p13 }
  0xa2   : > { %p13366_p12 = pneg %p13365_p3 }
  0xa4   : > { %p13373_p5 = pnand %p13372_p2, %p13366_p12 }
  0xa6   : > { %13376 = shalt.err (!%p13373_p5)
}
  0xa7   : > { %s14702_s2 = smov 512   ;;  %s14703_s19 = smov 32  }
  0xa8   : > { %11365 = dma.hbm_to_vmem [thread:$0]  (!%p13638_p6), %s14696_s15, 2048, %s563_s29, [#allocation22], %s14702_s2, %s14702_s2, %s14703_s19  }
  0xa9   : > { %s10058_s18 = sadd.s32 4294967294, %s13493_s24   ;;  %s13763_s17 = sadd.s32 1, %s13493_s24  }
  0xaa   : > { %s68_s26 = ssub.s32 %s13493_s24, %s13763_s17  ;;  %s71_s25 = sadd.s32 1, %s13489_s23 }
  0xab   : > { %p69_p7 = scmp.eq.s32.totalorder %s68_s26, 0  ;;  %p78_p8 = scmp.ne.s32.totalorder %s13489_s23, %s13485_s22 }
  0xac   : > { %p79_p9 = scmp.eq.s32.totalorder %s13493_s24, 0  ;;  %p84_p10 = scmp.ne.s32.totalorder %s13485_s22, %s13481_s21 }
  0xad   : > { %s13774_s0 = scalar_select %p69_p7, %s13489_s23, %s71_s25  }
  0xae   : > { %p13776_p11 = por %p79_p9, %p78_p8  ;;  %p14727_p4 = scmp.eq.s32.totalorder %s13624_s27, 0 }
  0xaf   : > { %p402_p1 = scmp.eq.s32.totalorder %s13624_s27, 1  ;;  %p408_p3 = scmp.eq.s32.totalorder %s10058_s18, 1 }
  0xb0   : > { %p13782_p6 = por %p14727_p4, %p84_p10  ;;  %p11386_p12 = scmp.lt.s32.totalorder %s13493_s24, 2 }
  0xb1   : > { %s584_s10 = sand.u32 1, %s13489_s23   ;;  %p13789_p13 = por %p402_p1, %p78_p8 }
  0xb2   : > { %s14728_s29 = scalar_select %p13782_p6, 1, 0 }
  0xb3   : > { %s14729_s30 = scalar_select %p13789_p13, 1, 0 }
  0xb4   : > { %p13793_p0 = por %p408_p3, %p84_p10  ;;  %s10073_s26 = sshll.u32 %s584_s10, 6 }
  0xb5   : > { %s11181_s25 = sshll.u32 %s13493_s24, 10  ;;  %s588_s18 = scalar_lea.vmem [#allocation3], %s10073_s26 }
  0xb6   : > { %s14730_s16 = scalar_select %p13793_p0, 1, 0 }
  0xb7   : > { %s13801_s3 = scalar_lea.hbm %s14682_s1, %s11181_s25  ;;  %s595_s4 = sshll.u32 %s588_s18, 4  ;;  %s13803_s4 = int_to_ptr.vmem [resolvable:$true] %s595_s4 }
  0xb8   : > { %p13807_p2 = pnand %p11386_p12, %p13776_p11  ;;  %s13811_s6 = scalar_lea.sflag [#allocation4], %s584_s10 }
  0xb9   : > { %s13377_s7 = scalar_lea.hbm %s13801_s3, 1024  ;;  %s13382_s26 = scalar_lea.hbm %s14682_s1, 2048 }
  0xba   : > { %p13378_p5 = scmp.ne.s32.totalorder %s13801_s3, %s13377_s7  ;;  %p13379_p7 = pneg %p13807_p2 }
  0xbb   : > { %p13383_p10 = scmp.lt.s32.totalorder %s13801_s3, %s14682_s1  ;;  %p13384_p11 = scmp.lt.s32.totalorder %s13382_s26, %s13377_s7 }
  0xbc   : > { %p13380_p8 = pnand %p13379_p7, %p13378_p5 }
  0xbd   : > { %p13385_p4 = por %p13384_p11, %p13383_p10 }
  0xbe   : > { %p13381_p9 = pneg %p13380_p8 }
  0xc0   : > { %p13386_p1 = pnand %p13385_p4, %p13381_p9 }
  0xc2   : > { %13389 = shalt.err (!%p13386_p1)
}
  0xc3   : > { %s13390_s20 = scalar_lea.vmem %s13803_s4, 1024  ;;  %s13511_s10 = smov [#allocation3]  }
  0xc4   : > { %p13391_p3 = scmp.ne.s32.totalorder %s13803_s4, %s13390_s20  ;;  %s13395_s8 = sshll.u32 %s13511_s10, 4  ;;  %s13396_s8 = int_to_ptr.vmem [resolvable:$false] %s13395_s8 }
  0xc5   : > { %s13397_s2 = scalar_lea.vmem %s13396_s8, 2048  ;;  %p13398_p8 = scmp.lt.s32.totalorder %s13803_s4, %s13396_s8 }
  0xc6   : > { %p13393_p12 = pnand %p13391_p3, %p13379_p7  ;;  %p13399_p0 = scmp.lt.s32.totalorder %s13397_s2, %s13390_s20 }
  0xc8   : > { %p13394_p5 = pneg %p13393_p12  ;;  %p13400_p13 = por %p13399_p0, %p13398_p8 }
  0xca   : > { %p13401_p6 = pnand %p13400_p13, %p13394_p5 }
  0xcc   : > { %13404 = shalt.err (!%p13401_p6)
}
  0xcd   : > { %s14732_s7 = smov 32   ;;  %s14733_s19 = smov 512  }
  0xce   : > { %11369 = dma.hbm_to_vmem [thread:$0]  (!%p13807_p2), %s13801_s3, 1024, %s13803_s4, %s13811_s6, %s14733_s19, %s14733_s19, %s14732_s7  }
  0xcf   : > { %p14734_p7 = scmp.ne.s32.totalorder %s14716_s28, 0 }
  0xd0   : > { %s13838_s26 = sand.u32 (!%p14734_p7), 1, %s13485_s22   ;;  %p14735_p6 = scmp.ne.s32.totalorder (!%p14734_p7), %s14728_s29, 0 }
  0xd1   : > { %607 = sbr.rel (%p14734_p7) target bundleno = 2819 (0xb03), region = 84  ;;  %s10077_s8 = sshll.u32 (!%p14734_p7), %s13838_s26, 6 }
  0xd2   : > { %s610_s25 = scalar_lea.sflag (!%p14734_p7), [#allocation4], %s13838_s26  ;;  %s13844_s5 = scalar_lea.vmem (!%p14734_p7), [#allocation3], %s10077_s8 }
  0xd6   : > { %13448 = dma.done.wait (%p14735_p6), %s610_s25, 1024  }
  0xd7   : > { %13450 = vsyncadd (%p14735_p6), %s610_s25, 4294966272  ;;  %p14736_p13 = scmp.eq.s32.totalorder %s13624_s27, 0 }
  0xd9   : > { %13452 = dma.done.wait (%p14736_p13), [#allocation7], 55360   ;;  %p14737_p0 = pmov %p14736_p13 }
  0xdb   : > { %13454 = vsyncadd (%p14737_p0), [#allocation7], 4294911936  ;;  %p14738_p2 = pmov %p14737_p0 }
  0xdc   : > { %p14739_p9 = pmov %p14737_p0 }
  0xdd   : > { %13456 = dma.done.wait (%p14738_p2), [#allocation10], 49216  }
  0xde   : > { %13458 = vsyncadd (%p14739_p9), [#allocation10], 4294918080  ;;  %p14740_p10 = pmov %p14737_p0 }
  0xdf   : > { %p14741_p11 = pmov %p14737_p0 }
  0xe0   : > { %13460 = dma.done.wait (%p14740_p10), [#allocation13], 16448  }
  0xe1   : > { %13462 = vsyncadd (%p14741_p11), [#allocation13], 4294950848  ;;  %p14742_p4 = pmov %p14737_p0 }
  0xe2   : > { %p14743_p1 = pmov %p14737_p0 }
  0xe3   : > { %13464 = dma.done.wait (%p14742_p4), [#allocation16], 16448  }
  0xe4   : > { %13466 = vsyncadd (%p14743_p1), [#allocation16], 4294950848  ;;  %p14744_p3 = pmov %p14737_p0 }
  0xe5   : > { %p14745_p12 = pmov %p14737_p0 }
  0xe6   : > { %13468 = dma.done.wait (%p14744_p3), [#allocation19], 48  }
  0xe7   : > { %13470 = vsyncadd (%p14745_p12), [#allocation19], 4294967248  ;;  %p14746_p5 = pmov %p14737_p0 }
  0xe8   : > { %p14747_p8 = pmov %p14737_p0 }
  0xe9   : > { %13472 = dma.done.wait (%p14746_p5), [#allocation22], 2064  }
  0xea   : > { %13474 = vsyncadd (%p14747_p8), [#allocation22], 4294965232  ;;  %v11453_v0 = vld [vmem:[#allocation6 + $0x564] ss:$16 sps:$4 sm:$0xff]   ;;  %v11457_v2 = vld [vmem:[#allocation6 + $0x560] ss:$16 sps:$4 sm:$0xff]  }
  0xeb   : > { %v11455_v1 = vld [vmem:[#allocation6 + $0x764] ss:$16 sps:$4 sm:$0xff]   ;;  %1832 = vmatprep.subr.bf16.mxu0 %v11453_v0  ;;  %v11458_v3 = vld [vmem:[#allocation6 + $0x760] ss:$16 sps:$4 sm:$0xff]   ;;  %p715_p7 = scmp.lt.s32.totalorder %s13624_s27, 1  ;;  %s14748_s29 = sld [smem:[#allocation33_spill]] }
  0xec   : > { %1875 = vmatprep.subr.bf16.mxu1 %v11455_v1  ;;  %v11459_v4 = vld [vmem:[#allocation6 + $0x544] ss:$16 sps:$4 sm:$0xff]   ;;  %1833 = vmatpush1.bf16.msra.mxu0 %v11457_v2  ;;  %v11463_v6 = vld [vmem:[#allocation6 + $0x540] ss:$16 sps:$4 sm:$0xff]   ;;  %vm1043_vm0 = vsmask.f32 7424 }
  0xed   : > { %1876 = vmatpush1.bf16.msra.mxu1 %v11458_v3  ;;  %v11461_v5 = vld [vmem:[#allocation6 + $0x744] ss:$16 sps:$4 sm:$0xff]   ;;  %1834 = vmatprep.subr.bf16.mxu0 %v11459_v4  ;;  %v11464_v7 = vld [vmem:[#allocation6 + $0x740] ss:$16 sps:$4 sm:$0xff]   ;;  %s716_s3 = scalar_select %p715_p7, %s13624_s27, 1  ;;  %vm1828_vm1 = vcmask 523264  }
  0xee   : > { %1877 = vmatprep.subr.bf16.mxu1 %v11461_v5  ;;  %v11465_v8 = vld [vmem:[#allocation6 + $0x524] ss:$16 sps:$4 sm:$0xff]   ;;  %v11469_v10 = vld [vmem:[#allocation6 + $0x520] ss:$16 sps:$4 sm:$0xff]   ;;  %vm3225_vm2 = vcmask 1046528   ;;  %vm4289_vm4 = vcmask 1040384  }
  0xef   : > { %v11467_v9 = vld [vmem:[#allocation6 + $0x724] ss:$16 sps:$4 sm:$0xff]   ;;  %v11470_v11 = vld [vmem:[#allocation6 + $0x720] ss:$16 sps:$4 sm:$0xff]   ;;  %s11276_s4 = smul.u32 120, %s716_s3  ;;  %s14749_s20 = sld [smem:[#allocation41_spill]] }
  0xf0   : > { %1835 = vmatpush1.bf16.msra.mxu0 %v11463_v6  ;;  %v11471_v12 = vld [vmem:[#allocation6 + $0x504] ss:$16 sps:$4 sm:$0xff]   ;;  %v11475_v14 = vld [vmem:[#allocation6 + $0x500] ss:$16 sps:$4 sm:$0xff]   ;;  %vm13514_vm5 = vmmov 0   ;;  %vm9475_vm6 = vcmask 261120  }
  0xf1   : > { %1878 = vmatpush1.bf16.msra.mxu1 %v11464_v7  ;;  %1836 = vmatprep.subr.bf16.mxu0 %v11465_v8  ;;  %v11473_v13 = vld [vmem:[#allocation6 + $0x704] ss:$16 sps:$4 sm:$0xff]   ;;  %v11476_v15 = vld [vmem:[#allocation6 + $0x700] ss:$16 sps:$4 sm:$0xff]   ;;  %s13879_s18 = scalar_lea.vmem %s14748_s29, %s11276_s4  ;;  %vm9556_vm7 = vcmask 1041408   ;;  %vm9552_vm8 = vcmask 15360  }
  0xf2   : > { %1879 = vmatprep.subr.bf16.mxu1 %v11467_v9  ;;  %v11477_v16 = vld [vmem:[#allocation6 + $0x4e4] ss:$16 sps:$4 sm:$0xff]   ;;  %v11481_v18 = vld [vmem:[#allocation6 + $0x4e0] ss:$16 sps:$4 sm:$0xff]   ;;  %v722_v48 = vld [vmem:[%s13879_s18 + $0x8] sm:$0xff]  ;;  %s11182_s3 = sshll.u32 %s13624_s27, 10 }
  0xf3   : > { %v11479_v17 = vld [vmem:[#allocation6 + $0x6e4] ss:$16 sps:$4 sm:$0xff]   ;;  %v11482_v19 = vld [vmem:[#allocation6 + $0x6e0] ss:$16 sps:$4 sm:$0xff]   ;;  %v732_v50 = vld [vmem:[%s13879_s18 + $0x58] sm:$0x3] }
  0xf4   : > { %1837 = vmatpush1.bf16.msra.mxu0 %v11469_v10  ;;  %v11483_v20 = vld [vmem:[#allocation6 + $0x4c4] ss:$16 sps:$4 sm:$0xff]   ;;  %v11487_v22 = vld [vmem:[#allocation6 + $0x4c0] ss:$16 sps:$4 sm:$0xff]   ;;  %v724_v51 = vld [vmem:[%s13879_s18 + $0x18] sm:$0xff]  ;;  %v13887_v54 = vpack.c.bf16 %v732_v50, %v732_v50  ;;  %s714_s4 = scalar_lea.vmem [#allocation24], %s10077_s8 }
  0xf5   : > { %1880 = vmatpush1.bf16.msra.mxu1 %v11470_v11  ;;  %1838 = vmatprep.subr.bf16.mxu0 %v11471_v12  ;;  %v11485_v21 = vld [vmem:[#allocation6 + $0x6c4] ss:$16 sps:$4 sm:$0xff]   ;;  %v11488_v23 = vld [vmem:[#allocation6 + $0x6c0] ss:$16 sps:$4 sm:$0xff]   ;;  %v734_v56 = vld [vmem:[%s13879_s18 + $0x68] sm:$0x3] }
  0xf6   : > { %1881 = vmatprep.subr.bf16.mxu1 %v11473_v13  ;;  %v11489_v24 = vld [vmem:[#allocation6 + $0x4a4] ss:$16 sps:$4 sm:$0xff]   ;;  %v11493_v26 = vld [vmem:[#allocation6 + $0x4a0] ss:$16 sps:$4 sm:$0xff]   ;;  %v13893_v59 = vpack.c.bf16 %v734_v56, %v734_v56  ;;  %v726_v61 = vld [vmem:[%s13879_s18 + $0x28] sm:$0xff]  ;;  %v1064_v2 = vshll.u32 %v13887_v54, 16 }
  0xf7   : > { %v11491_v25 = vld [vmem:[#allocation6 + $0x6a4] ss:$16 sps:$4 sm:$0xff]   ;;  %v11494_v27 = vld [vmem:[#allocation6 + $0x6a0] ss:$16 sps:$4 sm:$0xff]   ;;  %v728_v4 = vld [vmem:[%s13879_s18 + $0x38] sm:$0xff]  ;;  %s9859_s6 = sshll.u32 %s714_s4, 4  ;;  %s14637_s6 = int_to_ptr.vmem [resolvable:$true] %s9859_s6 }
  0xf8   : > { %1839 = vmatpush1.bf16.msra.mxu0 %v11475_v14  ;;  %v11495_v28 = vld [vmem:[#allocation6 + $0x484] ss:$16 sps:$4 sm:$0xff]   ;;  %v11499_v30 = vld [vmem:[#allocation6 + $0x480] ss:$16 sps:$4 sm:$0xff]   ;;  %v1088_v8 = vshll.u32 %v13893_v59, 16  ;;  %v1066_v11 = vrot.slane %v1064_v2, 1 }
  0xf9   : > { %1882 = vmatpush1.bf16.msra.mxu1 %v11476_v15  ;;  %1840 = vmatprep.subr.bf16.mxu0 %v11477_v16  ;;  %v11497_v29 = vld [vmem:[#allocation6 + $0x684] ss:$16 sps:$4 sm:$0xff]   ;;  %v11500_v31 = vld [vmem:[#allocation6 + $0x680] ss:$16 sps:$4 sm:$0xff]   ;;  %s14750_s28 = sld [smem:[#allocation42_spill]]  ;;  %s13405_s10 = scalar_lea.vmem %s14637_s6, 1024 }
  0xfa   : > { %1883 = vmatprep.subr.bf16.mxu1 %v11479_v17  ;;  %v11501_v32 = vld [vmem:[#allocation6 + $0x664] ss:$16 sps:$4 sm:$0xff]   ;;  %v11505_v34 = vld [vmem:[#allocation6 + $0x660] ss:$16 sps:$4 sm:$0xff]   ;;  %v1090_v15 = vrot.slane %v1088_v8, 1  ;;  %p13406_p6 = scmp.ne.s32.totalorder %s14637_s6, %s13405_s10  ;;  %p14751_p13 = scmp.ne.s32.totalorder %s14729_s30, 0 }
  0xfb   : > { %v11503_v33 = vld [vmem:[#allocation6 + $0x864] ss:$16 sps:$4 sm:$0xff]   ;;  %v11506_v35 = vld [vmem:[#allocation6 + $0x860] ss:$16 sps:$4 sm:$0xff]   ;;  %s13515_s2 = smov [#allocation24]  }
  0xfc   : > { %1841 = vmatpush1.bf16.msra.mxu0 %v11481_v18  ;;  %v11507_v36 = vld [vmem:[#allocation6 + $0x644] ss:$16 sps:$4 sm:$0xff]   ;;  %v11511_v38 = vld [vmem:[#allocation6 + $0x640] ss:$16 sps:$4 sm:$0xff]   ;;  %p13407_p0 = pnand %p13406_p6, %p14751_p13  ;;  %s13409_s7 = sshll.u32 %s13515_s2, 4  ;;  %s13410_s7 = int_to_ptr.vmem [resolvable:$false] %s13409_s7 }
  0xfd   : > { %1884 = vmatpush1.bf16.msra.mxu1 %v11482_v19  ;;  %1842 = vmatprep.subr.bf16.mxu0 %v11483_v20  ;;  %v11509_v37 = vld [vmem:[#allocation6 + $0x844] ss:$16 sps:$4 sm:$0xff]   ;;  %v11512_v39 = vld [vmem:[#allocation6 + $0x840] ss:$16 sps:$4 sm:$0xff]   ;;  %s13411_s19 = scalar_lea.vmem %s13410_s7, 2048  ;;  %p13412_p9 = scmp.lt.s32.totalorder %s14637_s6, %s13410_s7 }
  0xfe   : > { %1885 = vmatprep.subr.bf16.mxu1 %v11485_v21  ;;  %v11513_v40 = vld [vmem:[#allocation6 + $0x624] ss:$16 sps:$4 sm:$0xff]   ;;  %v11517_v42 = vld [vmem:[#allocation6 + $0x620] ss:$16 sps:$4 sm:$0xff]   ;;  %p13408_p2 = pneg %p13407_p0  ;;  %p13413_p10 = scmp.lt.s32.totalorder %s13411_s19, %s13405_s10 }
  0xff   : > { %v11515_v41 = vld [vmem:[#allocation6 + $0x824] ss:$16 sps:$4 sm:$0xff]   ;;  %v11518_v43 = vld [vmem:[#allocation6 + $0x820] ss:$16 sps:$4 sm:$0xff]   ;;  %s14635_s29 = scalar_lea.hbm %s14750_s28, %s11182_s3 }
 0x100   : > { %1843 = vmatpush1.bf16.msra.mxu0 %v11487_v22  ;;  %v11519_v44 = vld [vmem:[#allocation6 + $0x604] ss:$16 sps:$4 sm:$0xff]   ;;  %v11523_v46 = vld [vmem:[#allocation6 + $0x600] ss:$16 sps:$4 sm:$0xff]   ;;  %p13414_p11 = por %p13413_p10, %p13412_p9 }
 0x101   : > { %1886 = vmatpush1.bf16.msra.mxu1 %v11488_v23  ;;  %1844 = vmatprep.subr.bf16.mxu0 %v11489_v24  ;;  %v11521_v45 = vld [vmem:[#allocation6 + $0x804] ss:$16 sps:$4 sm:$0xff]   ;;  %v11524_v47 = vld [vmem:[#allocation6 + $0x800] ss:$16 sps:$4 sm:$0xff]  }
 0x102   : > { %1887 = vmatprep.subr.bf16.mxu1 %v11491_v25  ;;  %v727_v49 = vld [vmem:[%s13879_s18 + $0x30] sm:$0xff]  ;;  %v729_v55 = vld [vmem:[%s13879_s18 + $0x40] sm:$0xff]  ;;  %p13415_p4 = pnand %p13414_p11, %p13408_p2 }
 0x103   : > { %v11525_v52 = vld [vmem:[#allocation6 + $0x5e4] ss:$16 sps:$4 sm:$0xff]   ;;  %v13885_v53 = vpack.c.bf16 %v727_v49, %v722_v48  ;;  %v13891_v58 = vpack.c.bf16 %v729_v55, %v724_v51  ;;  %v11529_v62 = vld [vmem:[#allocation6 + $0x5e0] ss:$16 sps:$4 sm:$0xff]   ;;  %v730_v49 = vld [vmem:[%s13879_s18 + $0x48] sm:$0xff] }
 0x104   : > { %1845 = vmatpush1.bf16.msra.mxu0 %v11493_v26  ;;  %v11527_v57 = vld [vmem:[#allocation6 + $0x7e4] ss:$16 sps:$4 sm:$0xff]   ;;  %v11530_v63 = vld [vmem:[#allocation6 + $0x7e0] ss:$16 sps:$4 sm:$0xff]   ;;  %v11552_v51 = vld [vmem:[#allocation6 + $0x568] ss:$16 sps:$4 sm:$0xff]  }
 0x105   : > { %1888 = vmatpush1.bf16.msra.mxu1 %v11494_v27  ;;  %1846 = vmatprep.subr.bf16.mxu0 %v11495_v28  ;;  %v721_v60 = vld [vmem:[%s13879_s18] sm:$0xff]  ;;  %v1057_v0 = vshrl.u32 %v13885_v53, 16  ;;  %v1059_v1 = vshll.u32 %v13885_v53, 16  ;;  %v723_v3 = vld [vmem:[%s13879_s18 + $0x10] sm:$0xff]  ;;  %v1081_v6 = vshrl.u32 %v13891_v58, 16  ;;  %v1083_v7 = vshll.u32 %v13891_v58, 16 }
 0x106   : > { %1889 = vmatprep.subr.bf16.mxu1 %v11497_v29  ;;  %v11531_v5 = vld [vmem:[#allocation6 + $0x5c4] ss:$16 sps:$4 sm:$0xff]   ;;  %v731_v12 = vld [vmem:[%s13879_s18 + $0x50] sm:$0x3]  ;;  %v13906_v13 = vpack.c.bf16 %v726_v61, %v721_v60  ;;  %v733_v16 = vld [vmem:[%s13879_s18 + $0x60] sm:$0x3]  ;;  %v13909_v17 = vpack.c.bf16 %v728_v4, %v723_v3 }
 0x107   : > { %v11533_v9 = vld [vmem:[#allocation6 + $0x7c4] ss:$16 sps:$4 sm:$0xff]   ;;  %v1061_v10 = vrot.slane %v1059_v1, 1  ;;  %v1085_v14 = vrot.slane %v1083_v7, 1  ;;  %v11535_v19 = vld [vmem:[#allocation6 + $0x5c0] ss:$16 sps:$4 sm:$0xff]   ;;  %v13911_v21 = vpack.c.bf16 %v731_v12, %v731_v12  ;;  %v13917_v25 = vpack.c.bf16 %v733_v16, %v733_v16 }
 0x108   : > { %1847 = vmatpush1.bf16.msra.mxu0 %v11499_v30  ;;  %v11536_v22 = vld [vmem:[#allocation6 + $0x7c0] ss:$16 sps:$4 sm:$0xff]   ;;  %v1047_v24 = vshll.u32 %v13906_v13, 16  ;;  %v1071_v26 = vshll.u32 %v13909_v17, 16  ;;  %v11537_v27 = vld [vmem:[#allocation6 + $0x5a4] ss:$16 sps:$4 sm:$0xff]  }
 0x109   : > { %1890 = vmatpush1.bf16.msra.mxu1 %v11500_v31  ;;  %1848 = vmatprep.subr.bf16.mxu0 %v11501_v32  ;;  %v1062_v18 = vor.u32 %v1061_v10, %v1057_v0  ;;  %v1086_v20 = vor.u32 %v1085_v14, %v1081_v6  ;;  %v11539_v28 = vld [vmem:[#allocation6 + $0x7a4] ss:$16 sps:$4 sm:$0xff]   ;;  %v11541_v30 = vld [vmem:[#allocation6 + $0x5a0] ss:$16 sps:$4 sm:$0xff]   ;;  %v1045_v32 = vshrl.u32 %v13906_v13, 16 }
 0x10a   : > { %1891 = vmatprep.subr.bf16.mxu1 %v11503_v33  ;;  %v11542_v31 = vld [vmem:[#allocation6 + $0x7a0] ss:$16 sps:$4 sm:$0xff]   ;;  %v1052_v33 = vshll.u32 %v13911_v21, 16  ;;  %v11557_v56 = vld [vmem:[#allocation6 + $0x8c4] ss:$16 sps:$4 sm:$0xff]  }
 0x10b   : > { %v13914_v23 = vsel %vm1043_vm0, %v1062_v18, %v1066_v11  ;;  %v13921_v29 = vsel %vm1043_vm0, %v1086_v20, %v1090_v15  ;;  %v725_v48 = vld [vmem:[%s13879_s18 + $0x20] sm:$0xff]  ;;  %v11560_v60 = vld [vmem:[#allocation6 + $0x54c] ss:$16 sps:$4 sm:$0xff]   ;;  %v735_v61 = vld [vmem:[%s13879_s18 + $0x70] sm:$0x3]  ;;  %s9846_s18 = scalar_lea.sflag [#allocation5], %s13838_s26 }
 0x10c   : > { %1849 = vmatpush2.bf16.msra.mxu0 %v11505_v34  ;;  %1864 = vmatprep.mubr.bf16.mxu0 %v13914_v23  ;;  %v1049_v34 = vrot.slane %v1047_v24, 1  ;;  %v11549_v50 = vld [vmem:[#allocation6 + $0x8e0] ss:$16 sps:$4 sm:$0xff]   ;;  %v13942_v0 = vpack.c.bf16 %v735_v61, %v735_v61  ;;  %v11563_v2 = vld [vmem:[#allocation6 + $0x8a4] ss:$16 sps:$4 sm:$0xff]  }
 0x10d   : > { %1892 = vmatpush2.bf16.msra.mxu1 %v11506_v35  ;;  %1850 = vmatprep.subr.bf16.mxu0 %v11507_v36  ;;  %v1069_v35 = vshrl.u32 %v13909_v17, 16  ;;  %v1073_v36 = vrot.slane %v1071_v26, 1  ;;  %v11566_v3 = vld [vmem:[#allocation6 + $0x52c] ss:$16 sps:$4 sm:$0xff]   ;;  %v11561_v4 = vld [vmem:[#allocation6 + $0x8a0] ss:$16 sps:$4 sm:$0xff]  }
 0x10e   : > { %1893 = vmatprep.subr.bf16.mxu1 %v11509_v37  ;;  %1907 = vmatprep.mubr.bf16.mxu1 %v13921_v29  ;;  %v1076_v37 = vshll.u32 %v13917_v25, 16  ;;  %v11564_v6 = vld [vmem:[#allocation6 + $0x528] ss:$16 sps:$4 sm:$0xff]   ;;  %v11569_v10 = vld [vmem:[#allocation6 + $0x884] ss:$16 sps:$4 sm:$0xff]  }
 0x10f   : > { %v11572_v11 = vld [vmem:[#allocation6 + $0x50c] ss:$16 sps:$4 sm:$0xff]   ;;  %v11567_v12 = vld [vmem:[#allocation6 + $0x880] ss:$16 sps:$4 sm:$0xff]   ;;  %v11570_v14 = vld [vmem:[#allocation6 + $0x508] ss:$16 sps:$4 sm:$0xff]  }
 0x110   : > { %1851 = vmatpush2.bf16.msra.mxu0 %v11511_v38  ;;  %v11543_v38 = vld [vmem:[#allocation6 + $0x584] ss:$16 sps:$4 sm:$0xff]   ;;  %v11575_v18 = vld [vmem:[#allocation6 + $0x4ec] ss:$16 sps:$4 sm:$0xff]   ;;  %v11573_v20 = vld [vmem:[#allocation6 + $0x4e8] ss:$16 sps:$4 sm:$0xff]  }
 0x111   : > { %1894 = vmatpush2.bf16.msra.mxu1 %v11512_v39  ;;  %1852 = vmatprep.subr.bf16.mxu0 %v11513_v40  ;;  %v11545_v39 = vld [vmem:[#allocation6 + $0x784] ss:$16 sps:$4 sm:$0xff]   ;;  %v11547_v40 = vld [vmem:[#allocation6 + $0x580] ss:$16 sps:$4 sm:$0xff]   ;;  %v11581_v24 = vld [vmem:[#allocation6 + $0x4cc] ss:$16 sps:$4 sm:$0xff]  }
 0x112   : > { %1895 = vmatprep.subr.bf16.mxu1 %v11515_v41  ;;  %v11548_v41 = vld [vmem:[#allocation6 + $0x780] ss:$16 sps:$4 sm:$0xff]   ;;  %v11584_v26 = vld [vmem:[#allocation6 + $0x74c] ss:$16 sps:$4 sm:$0xff]  }
 0x113   : > { %v11626_v61 = vld [vmem:[#allocation6 + $0x86c] ss:$16 sps:$4 sm:$0xff]  }
 0x114   : > { %1853 = vmatpush2.bf16.msra.mxu0 %v11517_v42  ;;  %v11551_v42 = vld [vmem:[#allocation6 + $0x8e4] ss:$16 sps:$4 sm:$0xff]  }
 0x115   : > { %1896 = vmatpush2.bf16.msra.mxu1 %v11518_v43  ;;  %1854 = vmatprep.subr.bf16.mxu0 %v11519_v44  ;;  %v11554_v43 = vld [vmem:[#allocation6 + $0x56c] ss:$16 sps:$4 sm:$0xff]   ;;  %v1050_v44 = vor.u32 %v1049_v34, %v1045_v32  ;;  %v11585_v32 = vld [vmem:[#allocation6 + $0x4a8] ss:$16 sps:$4 sm:$0xff]  }
 0x116   : > { %1897 = vmatprep.subr.bf16.mxu1 %v11521_v45  ;;  %v1054_v45 = vrot.slane %v1052_v33, 1  ;;  %v11588_v33 = vld [vmem:[#allocation6 + $0x728] ss:$16 sps:$4 sm:$0xff]   ;;  %v11593_v34 = vld [vmem:[#allocation6 + $0x48c] ss:$16 sps:$4 sm:$0xff]  }
 0x118   : > { %1855 = vmatpush2.bf16.msra.mxu0 %v11523_v46  ;;  %v1074_v46 = vor.u32 %v1073_v36, %v1069_v35  ;;  %v11596_v35 = vld [vmem:[#allocation6 + $0x70c] ss:$16 sps:$4 sm:$0xff]   ;;  %v11591_v36 = vld [vmem:[#allocation6 + $0x488] ss:$16 sps:$4 sm:$0xff]  }
 0x119   : > { %1898 = vmatpush2.bf16.msra.mxu1 %v11524_v47  ;;  %1856 = vmatprep.subr.bf16.mxu0 %v11525_v52  ;;  %v1078_v47 = vrot.slane %v1076_v37, 1  ;;  %v13932_v52 = vsel %vm1043_vm0, %v1050_v44, %v1054_v45  ;;  %v11594_v37 = vld [vmem:[#allocation6 + $0x708] ss:$16 sps:$4 sm:$0xff]   ;;  %v11611_v45 = vld [vmem:[#allocation6 + $0x62c] ss:$16 sps:$4 sm:$0xff]  }
 0x11a   : > { %1899 = vmatprep.subr.bf16.mxu1 %v11527_v57  ;;  %v13937_v57 = vpack.c.bf16 %v730_v49, %v725_v48  ;;  %v11606_v44 = vld [vmem:[#allocation6 + $0x6c8] ss:$16 sps:$4 sm:$0xff]   ;;  %v11617_v49 = vld [vmem:[#allocation6 + $0x60c] ss:$16 sps:$4 sm:$0xff]  }
 0x11b   : > { %v13935_v55 = vsel %vm1043_vm0, %v1074_v46, %v1078_v47  ;;  %v11614_v46 = vld [vmem:[#allocation6 + $0x6ac] ss:$16 sps:$4 sm:$0xff]   ;;  %v11609_v47 = vld [vmem:[#allocation6 + $0x628] ss:$16 sps:$4 sm:$0xff]  }
 0x11c   : > { %1857 = vmatpush2.bf16.msra.mxu0 %v11529_v62  ;;  %v11555_v62 = vld [vmem:[#allocation6 + $0x8c0] ss:$16 sps:$4 sm:$0xff]   ;;  %v1095_v1 = vshll.u32 %v13937_v57, 16  ;;  %v1093_v7 = vshrl.u32 %v13937_v57, 16  ;;  %v11612_v48 = vld [vmem:[#allocation6 + $0x6a8] ss:$16 sps:$4 sm:$0xff]  }
 0x11d   : > { %1900 = vmatpush2.bf16.msra.mxu1 %v11530_v63  ;;  %1858 = vmatprep.subr.bf16.mxu0 %v11531_v5  ;;  %v11558_v63 = vld [vmem:[#allocation6 + $0x548] ss:$16 sps:$4 sm:$0xff]   ;;  %v13512_v5 = vmov 0  }
 0x11e   : > { %1901 = vmatprep.subr.bf16.mxu1 %v11533_v9  ;;  %v1097_v8 = vrot.slane %v1095_v1, 1  ;;  %v1100_v9 = vshll.u32 %v13942_v0, 16  ;;  %v11629_v1 = vld [vmem:[#allocation6 + $0x5cc] ss:$16 sps:$4 sm:$0xff]  }
 0x120   : > { %1859 = vmatpush2.bf16.msra.mxu0 %v11535_v19  ;;  %v1098_v15 = vor.u32 %v1097_v8, %v1093_v7  ;;  %v1102_v16 = vrot.slane %v1100_v9, 1  ;;  %v11578_v19 = vld [vmem:[#allocation6 + $0x76c] ss:$16 sps:$4 sm:$0xff]   ;;  %v11633_v8 = vld [vmem:[#allocation6 + $0x5a8] ss:$16 sps:$4 sm:$0xff]  }
 0x121   : > { %1902 = vmatpush2.bf16.msra.mxu1 %v11536_v22  ;;  %1860 = vmatprep.subr.bf16.mxu0 %v11537_v27  ;;  %v11579_v27 = vld [vmem:[#allocation6 + $0x4c8] ss:$16 sps:$4 sm:$0xff]   ;;  %v11638_v7 = vld [vmem:[#allocation6 + $0x82c] ss:$16 sps:$4 sm:$0xff]  }
 0x122   : > { %1903 = vmatprep.subr.bf16.mxu1 %v11539_v28  ;;  %v13950_v22 = vsel %vm1043_vm0, %v1098_v15, %v1102_v16  ;;  %v11582_v28 = vld [vmem:[#allocation6 + $0x748] ss:$16 sps:$4 sm:$0xff]   ;;  %v11647_v15 = vld [vmem:[#allocation6 + $0x7ec] ss:$16 sps:$4 sm:$0xff]  }
 0x123   : > { %v11636_v9 = vld [vmem:[#allocation6 + $0x828] ss:$16 sps:$4 sm:$0xff]   ;;  %v11650_v16 = vld [vmem:[#allocation6 + $0x8ec] ss:$16 sps:$4 sm:$0xff]  }
 0x124   : > { %1861 = vmatpush2.bf16.msra.mxu0 %v11541_v30  ;;  %v11587_v30 = vld [vmem:[#allocation6 + $0x4ac] ss:$16 sps:$4 sm:$0xff]  }
 0x125   : > { %1904 = vmatpush2.bf16.msra.mxu1 %v11542_v31  ;;  %1862 = vmatprep.subr.bf16.mxu0 %v11543_v38  ;;  %v11590_v31 = vld [vmem:[#allocation6 + $0x72c] ss:$16 sps:$4 sm:$0xff]  }
 0x126   : > { %1905 = vmatprep.subr.bf16.mxu1 %v11545_v39  ;;  %v11599_v38 = vld [vmem:[#allocation6 + $0x66c] ss:$16 sps:$4 sm:$0xff]  }
 0x127   : > { %v11602_v39 = vld [vmem:[#allocation6 + $0x6ec] ss:$16 sps:$4 sm:$0xff]  }
 0x128   : > { %1863 = vmatpush2.bf16.msra.mxu0 %v11547_v40  ;;  %v11597_v40 = vld [vmem:[#allocation6 + $0x668] ss:$16 sps:$4 sm:$0xff]  }
 0x129   : > { %1906 = vmatpush2.bf16.msra.mxu1 %v11548_v41  ;;  %1926 = vmatprep.subr.bf16.mxu0 %v11551_v42  ;;  %v11605_v41 = vld [vmem:[#allocation6 + $0x64c] ss:$16 sps:$4 sm:$0xff]  }
 0x12a   : > { %1961 = vmatprep.subr.bf16.mxu1 %v11554_v43  ;;  %v11608_v42 = vld [vmem:[#allocation6 + $0x6cc] ss:$16 sps:$4 sm:$0xff]   ;;  %v11603_v43 = vld [vmem:[#allocation6 + $0x648] ss:$16 sps:$4 sm:$0xff]  }
 0x12b   : > { %1865 = vmatmul.mubr.bf16.vlgmr.msra.gmra.mxu0 %v13932_v52 }
 0x12c   : > { %1908 = vmatmul.mubr.bf16.vlgmr.msra.gmra.mxu1 %v13935_v55  ;;  %1927 = vmatpush1.bf16.msra.mxu0 %v11549_v50  ;;  %v11620_v50 = vld [vmem:[#allocation6 + $0x68c] ss:$16 sps:$4 sm:$0xff]  }
 0x12d   : > { %1962 = vmatpush1.bf16.msra.mxu1 %v11552_v51  ;;  %1928 = vmatprep.subr.bf16.mxu0 %v11557_v56  ;;  %v11615_v51 = vld [vmem:[#allocation6 + $0x608] ss:$16 sps:$4 sm:$0xff]  }
 0x12e   : > { %1963 = vmatprep.subr.bf16.mxu1 %v11560_v60  ;;  %1950 = vmatprep.mubr.bf16.mxu0 %v13512_v5  ;;  %v11618_v56 = vld [vmem:[#allocation6 + $0x688] ss:$16 sps:$4 sm:$0xff]   ;;  %v11623_v60 = vld [vmem:[#allocation6 + $0x5ec] ss:$16 sps:$4 sm:$0xff]  }
 0x12f   : > { %1993 = vmatprep.mubr.bf16.mxu1 %v13914_v23  ;;  %v11576_v23 = vld [vmem:[#allocation6 + $0x768] ss:$16 sps:$4 sm:$0xff]  }
 0x130   : > { %1929 = vmatpush1.bf16.msra.mxu0 %v11555_v62  ;;  %v11621_v62 = vld [vmem:[#allocation6 + $0x5e8] ss:$16 sps:$4 sm:$0xff]  }
 0x131   : > { %1964 = vmatpush1.bf16.msra.mxu1 %v11558_v63  ;;  %1930 = vmatprep.subr.bf16.mxu0 %v11563_v2  ;;  %v11624_v63 = vld [vmem:[#allocation6 + $0x868] ss:$16 sps:$4 sm:$0xff]   ;;  %v11632_v2 = vld [vmem:[#allocation6 + $0x84c] ss:$16 sps:$4 sm:$0xff]  }
 0x132   : > { %1965 = vmatprep.subr.bf16.mxu1 %v11566_v3  ;;  %v11627_v3 = vld [vmem:[#allocation6 + $0x5c8] ss:$16 sps:$4 sm:$0xff]  }
 0x134   : > { %1931 = vmatpush1.bf16.msra.mxu0 %v11561_v4  ;;  %v11630_v4 = vld [vmem:[#allocation6 + $0x848] ss:$16 sps:$4 sm:$0xff]  }
 0x135   : > { %1966 = vmatpush1.bf16.msra.mxu1 %v11564_v6  ;;  %1932 = vmatprep.subr.bf16.mxu0 %v11569_v10  ;;  %v11635_v6 = vld [vmem:[#allocation6 + $0x5ac] ss:$16 sps:$4 sm:$0xff]  }
 0x136   : > { %1967 = vmatprep.subr.bf16.mxu1 %v11572_v11  ;;  %v11641_v10 = vld [vmem:[#allocation6 + $0x58c] ss:$16 sps:$4 sm:$0xff]  }
 0x137   : > { %v11644_v11 = vld [vmem:[#allocation6 + $0x80c] ss:$16 sps:$4 sm:$0xff]  }
 0x138   : > { %1933 = vmatpush1.bf16.msra.mxu0 %v11567_v12  ;;  %v11639_v12 = vld [vmem:[#allocation6 + $0x588] ss:$16 sps:$4 sm:$0xff]  }
 0x139   : > { %1968 = vmatpush1.bf16.msra.mxu1 %v11570_v14  ;;  %2004 = vmatprep.subr.bf16.mxu0 %v11578_v19  ;;  %v11642_v14 = vld [vmem:[#allocation6 + $0x808] ss:$16 sps:$4 sm:$0xff]  }
 0x13a   : > { %1969 = vmatprep.subr.bf16.mxu1 %v11575_v18  ;;  %v11645_v18 = vld [vmem:[#allocation6 + $0x7e8] ss:$16 sps:$4 sm:$0xff]  }
 0x13b   : > { %10236 = vmatmul.mubr.msk.bf16.vlgmr.msra.gmra.mxu0 %vm1828_vm1, %v13950_v22  ;;  %v11648_v19 = vld [vmem:[#allocation6 + $0x8e8] ss:$16 sps:$4 sm:$0xff]  }
 0x13c   : > { %2005 = vmatpush1.bf16.msra.mxu0 %v11576_v23  ;;  %2036 = vmatprep.mubr.bf16.mxu0 %v13921_v29  ;;  %v11600_v29 = vld [vmem:[#allocation6 + $0x6e8] ss:$16 sps:$4 sm:$0xff]   ;;  %v11656_v23 = vld [vmem:[#allocation6 + $0x8cc] ss:$16 sps:$4 sm:$0xff]  }
 0x13d   : > { %1970 = vmatpush1.bf16.msra.mxu1 %v11573_v20  ;;  %2006 = vmatprep.subr.bf16.mxu0 %v11584_v26  ;;  %v11653_v20 = vld [vmem:[#allocation6 + $0x7cc] ss:$16 sps:$4 sm:$0xff]   ;;  %v11654_v26 = vld [vmem:[#allocation6 + $0x8c8] ss:$16 sps:$4 sm:$0xff]  }
 0x13e   : > { %1971 = vmatprep.subr.bf16.mxu1 %v11581_v24  ;;  %v11651_v24 = vld [vmem:[#allocation6 + $0x7c8] ss:$16 sps:$4 sm:$0xff]  }
 0x140   : > { %2007 = vmatpush1.bf16.msra.mxu0 %v11582_v28  ;;  %v11662_v28 = vld [vmem:[#allocation6 + $0x8ac] ss:$16 sps:$4 sm:$0xff]  }
 0x141   : > { %1972 = vmatpush1.bf16.msra.mxu1 %v11579_v27  ;;  %2008 = vmatprep.subr.bf16.mxu0 %v11590_v31  ;;  %v11659_v27 = vld [vmem:[#allocation6 + $0x7ac] ss:$16 sps:$4 sm:$0xff]   ;;  %v11660_v31 = vld [vmem:[#allocation6 + $0x8a8] ss:$16 sps:$4 sm:$0xff]  }
 0x142   : > { %1973 = vmatprep.subr.bf16.mxu1 %v11587_v30  ;;  %v11657_v30 = vld [vmem:[#allocation6 + $0x7a8] ss:$16 sps:$4 sm:$0xff]  }
 0x144   : > { %2009 = vmatpush1.bf16.msra.mxu0 %v11588_v33  ;;  %v11668_v33 = vld [vmem:[#allocation6 + $0x88c] ss:$16 sps:$4 sm:$0xff]  }
 0x145   : > { %1974 = vmatpush1.bf16.msra.mxu1 %v11585_v32  ;;  %2010 = vmatprep.subr.bf16.mxu0 %v11596_v35  ;;  %v11665_v32 = vld [vmem:[#allocation6 + $0x78c] ss:$16 sps:$4 sm:$0xff]   ;;  %v11671_v35 = vld [vmem:[#allocation6 + $0xe4] ss:$16 sps:$4 sm:$0xff]  }
 0x146   : > { %1975 = vmatprep.subr.bf16.mxu1 %v11593_v34  ;;  %v11663_v34 = vld [vmem:[#allocation6 + $0x788] ss:$16 sps:$4 sm:$0xff]  }
 0x148   : > { %2011 = vmatpush1.bf16.msra.mxu0 %v11594_v37  ;;  %v11669_v37 = vld [vmem:[#allocation6 + $0xe0] ss:$16 sps:$4 sm:$0xff]  }
 0x149   : > { %1976 = vmatpush1.bf16.msra.mxu1 %v11591_v36  ;;  %2012 = vmatprep.subr.bf16.mxu0 %v11602_v39  ;;  %v11674_v36 = vld [vmem:[#allocation6 + $0x2e4] ss:$16 sps:$4 sm:$0xff]  }
 0x14a   : > { %1977 = vmatprep.subr.bf16.mxu1 %v11599_v38  ;;  %v11672_v38 = vld [vmem:[#allocation6 + $0x2e0] ss:$16 sps:$4 sm:$0xff]   ;;  %v11677_v39 = vld [vmem:[#allocation6 + $0xc4] ss:$16 sps:$4 sm:$0xff]  }
 0x14c   : > { %2013 = vmatpush1.bf16.msra.mxu0 %v11600_v29  ;;  %v11675_v29 = vld [vmem:[#allocation6 + $0xc0] ss:$16 sps:$4 sm:$0xff]  }
 0x14d   : > { %1978 = vmatpush2.bf16.msra.mxu1 %v11597_v40  ;;  %2014 = vmatprep.subr.bf16.mxu0 %v11608_v42  ;;  %v11680_v40 = vld [vmem:[#allocation6 + $0x2c4] ss:$16 sps:$4 sm:$0xff]  }
 0x14e   : > { %1979 = vmatprep.subr.bf16.mxu1 %v11605_v41  ;;  %v11678_v41 = vld [vmem:[#allocation6 + $0x2c0] ss:$16 sps:$4 sm:$0xff]   ;;  %v11683_v42 = vld [vmem:[#allocation6 + $0xa4] ss:$16 sps:$4 sm:$0xff]  }
 0x150   : > { %2015 = vmatpush1.bf16.msra.mxu0 %v11606_v44  ;;  %v11681_v44 = vld [vmem:[#allocation6 + $0xa0] ss:$16 sps:$4 sm:$0xff]  }
 0x151   : > { %1980 = vmatpush2.bf16.msra.mxu1 %v11603_v43  ;;  %2016 = vmatprep.subr.bf16.mxu0 %v11614_v46  ;;  %v11686_v43 = vld [vmem:[#allocation6 + $0x2a4] ss:$16 sps:$4 sm:$0xff]   ;;  %v11687_v46 = vld [vmem:[#allocation6 + $0x80] ss:$16 sps:$4 sm:$0xff]  }
 0x152   : > { %1981 = vmatprep.subr.bf16.mxu1 %v11611_v45  ;;  %v11684_v45 = vld [vmem:[#allocation6 + $0x2a0] ss:$16 sps:$4 sm:$0xff]  }
 0x154   : > { %2017 = vmatpush1.bf16.msra.mxu0 %v11612_v48  ;;  %v11695_v48 = vld [vmem:[#allocation6 + $0x64] ss:$16 sps:$4 sm:$0xff]  }
 0x155   : > { %1982 = vmatpush2.bf16.msra.mxu1 %v11609_v47  ;;  %2018 = vmatprep.subr.bf16.mxu0 %v11620_v50  ;;  %v11690_v47 = vld [vmem:[#allocation6 + $0x280] ss:$16 sps:$4 sm:$0xff]  }
 0x156   : > { %1983 = vmatprep.subr.bf16.mxu1 %v11617_v49  ;;  %v11698_v49 = vld [vmem:[#allocation6 + $0x264] ss:$16 sps:$4 sm:$0xff]   ;;  %v11693_v50 = vld [vmem:[#allocation6 + $0x60] ss:$16 sps:$4 sm:$0xff]  }
 0x158   : > { %2019 = vmatpush1.bf16.msra.mxu0 %v11618_v56  ;;  %v11701_v56 = vld [vmem:[#allocation6 + $0x44] ss:$16 sps:$4 sm:$0xff]  }
 0x159   : > { %1984 = vmatpush2.bf16.msra.mxu1 %v11615_v51  ;;  %2020 = vmatprep.subr.bf16.mxu0 %v11626_v61  ;;  %v11696_v51 = vld [vmem:[#allocation6 + $0x260] ss:$16 sps:$4 sm:$0xff]  }
 0x15a   : > { %1985 = vmatprep.subr.bf16.mxu1 %v11623_v60  ;;  %v11704_v60 = vld [vmem:[#allocation6 + $0x244] ss:$16 sps:$4 sm:$0xff]   ;;  %v11699_v61 = vld [vmem:[#allocation6 + $0x40] ss:$16 sps:$4 sm:$0xff]  }
 0x15c   : > { %2021 = vmatpush2.bf16.msra.mxu0 %v11624_v63  ;;  %v11707_v63 = vld [vmem:[#allocation6 + $0x24] ss:$16 sps:$4 sm:$0xff]  }
 0x15d   : > { %1986 = vmatpush2.bf16.msra.mxu1 %v11621_v62  ;;  %2022 = vmatprep.subr.bf16.mxu0 %v11632_v2  ;;  %v11702_v62 = vld [vmem:[#allocation6 + $0x240] ss:$16 sps:$4 sm:$0xff]  }
 0x15e   : > { %1987 = vmatprep.subr.bf16.mxu1 %v11629_v1  ;;  %v11710_v1 = vld [vmem:[#allocation6 + $0x224] ss:$16 sps:$4 sm:$0xff]   ;;  %v11705_v2 = vld [vmem:[#allocation6 + $0x20] ss:$16 sps:$4 sm:$0xff]  }
 0x160   : > { %2023 = vmatpush2.bf16.msra.mxu0 %v11630_v4  ;;  %v11713_v4 = vld [vmem:[#allocation6 + $0x4] ss:$16 sps:$4 sm:$0xff]  }
 0x161   : > { %1988 = vmatpush2.bf16.msra.mxu1 %v11627_v3  ;;  %2024 = vmatprep.subr.bf16.mxu0 %v11638_v7  ;;  %v11708_v3 = vld [vmem:[#allocation6 + $0x220] ss:$16 sps:$4 sm:$0xff]  }
 0x162   : > { %1989 = vmatprep.subr.bf16.mxu1 %v11635_v6  ;;  %v11716_v6 = vld [vmem:[#allocation6 + $0x204] ss:$16 sps:$4 sm:$0xff]   ;;  %v11711_v7 = vld [vmem:[#allocation6] ss:$16 sps:$4 sm:$0xff]  }
 0x164   : > { %2025 = vmatpush2.bf16.msra.mxu0 %v11636_v9  ;;  %v11719_v9 = vld [vmem:[#allocation6 + $0x1e4] ss:$16 sps:$4 sm:$0xff]  }
 0x165   : > { %1990 = vmatpush2.bf16.msra.mxu1 %v11633_v8  ;;  %2026 = vmatprep.subr.bf16.mxu0 %v11644_v11  ;;  %v11714_v8 = vld [vmem:[#allocation6 + $0x200] ss:$16 sps:$4 sm:$0xff]  }
 0x166   : > { %1991 = vmatprep.subr.bf16.mxu1 %v11641_v10  ;;  %v11722_v10 = vld [vmem:[#allocation6 + $0x3e4] ss:$16 sps:$4 sm:$0xff]   ;;  %v11717_v11 = vld [vmem:[#allocation6 + $0x1e0] ss:$16 sps:$4 sm:$0xff]  }
 0x168   : > { %2027 = vmatpush2.bf16.msra.mxu0 %v11642_v14  ;;  %v11725_v14 = vld [vmem:[#allocation6 + $0x1c4] ss:$16 sps:$4 sm:$0xff]  }
 0x169   : > { %1992 = vmatpush2.bf16.msra.mxu1 %v11639_v12  ;;  %2028 = vmatprep.subr.bf16.mxu0 %v11647_v15  ;;  %v11720_v12 = vld [vmem:[#allocation6 + $0x3e0] ss:$16 sps:$4 sm:$0xff]   ;;  %v11728_v15 = vld [vmem:[#allocation6 + $0x3c4] ss:$16 sps:$4 sm:$0xff]  }
 0x16a   : > { %2055 = vmatprep.subr.bf16.mxu1 %v11650_v16  ;;  %v11723_v16 = vld [vmem:[#allocation6 + $0x1c0] ss:$16 sps:$4 sm:$0xff]  }
 0x16c   : > { %1994 = vmatmul.mubr.bf16.vlgmr.msra.gmra.mxu1 %v13932_v52  ;;  %2029 = vmatpush2.bf16.msra.mxu0 %v11645_v18  ;;  %v11666_v52 = vld [vmem:[#allocation6 + $0x888] ss:$16 sps:$4 sm:$0xff]   ;;  %v11726_v18 = vld [vmem:[#allocation6 + $0x3c0] ss:$16 sps:$4 sm:$0xff]  }
 0x16d   : > { %2056 = vmatpush1.bf16.msra.mxu1 %v11648_v19  ;;  %2030 = vmatprep.subr.bf16.mxu0 %v11653_v20  ;;  %v11731_v19 = vld [vmem:[#allocation6 + $0x1a4] ss:$16 sps:$4 sm:$0xff]  }
 0x16e   : > { %2057 = vmatprep.subr.bf16.mxu1 %v11656_v23  ;;  %2079 = vmatprep.mubr.bf16.mxu1 %v13512_v5  ;;  %v11734_v20 = vld [vmem:[#allocation6 + $0x3a4] ss:$16 sps:$4 sm:$0xff]   ;;  %v11729_v23 = vld [vmem:[#allocation6 + $0x1a0] ss:$16 sps:$4 sm:$0xff]  }
 0x170   : > { %2031 = vmatpush2.bf16.msra.mxu0 %v11651_v24  ;;  %v11732_v24 = vld [vmem:[#allocation6 + $0x3a0] ss:$16 sps:$4 sm:$0xff]  }
 0x171   : > { %2058 = vmatpush1.bf16.msra.mxu1 %v11654_v26  ;;  %2032 = vmatprep.subr.bf16.mxu0 %v11659_v27  ;;  %v11737_v26 = vld [vmem:[#allocation6 + $0x184] ss:$16 sps:$4 sm:$0xff]  }
 0x172   : > { %2059 = vmatprep.subr.bf16.mxu1 %v11662_v28  ;;  %v11740_v27 = vld [vmem:[#allocation6 + $0x384] ss:$16 sps:$4 sm:$0xff]   ;;  %v11735_v28 = vld [vmem:[#allocation6 + $0x180] ss:$16 sps:$4 sm:$0xff]  }
 0x174   : > { %2033 = vmatpush2.bf16.msra.mxu0 %v11657_v30  ;;  %v11738_v30 = vld [vmem:[#allocation6 + $0x380] ss:$16 sps:$4 sm:$0xff]  }
 0x175   : > { %2060 = vmatpush1.bf16.msra.mxu1 %v11660_v31  ;;  %2034 = vmatprep.subr.bf16.mxu0 %v11665_v32  ;;  %v11743_v31 = vld [vmem:[#allocation6 + $0x164] ss:$16 sps:$4 sm:$0xff]  }
 0x176   : > { %2061 = vmatprep.subr.bf16.mxu1 %v11668_v33  ;;  %v11746_v32 = vld [vmem:[#allocation6 + $0x364] ss:$16 sps:$4 sm:$0xff]   ;;  %v11741_v33 = vld [vmem:[#allocation6 + $0x160] ss:$16 sps:$4 sm:$0xff]  }
 0x178   : > { %2035 = vmatpush2.bf16.msra.mxu0 %v11663_v34  ;;  %v11744_v34 = vld [vmem:[#allocation6 + $0x360] ss:$16 sps:$4 sm:$0xff]  }
 0x179   : > { %2062 = vmatpush1.bf16.msra.mxu1 %v11666_v52  ;;  %2812 = vmatprep.subr.bf16.mxu0 %v11671_v35  ;;  %v11749_v52 = vld [vmem:[#allocation6 + $0x144] ss:$16 sps:$4 sm:$0xff]  }
 0x17a   : > { %2855 = vmatprep.subr.bf16.mxu1 %v11674_v36  ;;  %v11752_v35 = vld [vmem:[#allocation6 + $0x344] ss:$16 sps:$4 sm:$0xff]   ;;  %v11747_v36 = vld [vmem:[#allocation6 + $0x140] ss:$16 sps:$4 sm:$0xff]  }
 0x17b   : > { %2037 = vmatmul.mubr.bf16.vlgmr.msra.gmra.mxu0 %v13935_v55  ;;  %v11689_v55 = vld [vmem:[#allocation6 + $0x84] ss:$16 sps:$4 sm:$0xff]  }
 0x17c   : > { %10237 = vmatmul.mubr.msk.bf16.vlgmr.msra.gmra.mxu1 %vm1828_vm1, %v13950_v22  ;;  %2813 = vmatpush1.bf16.msra.mxu0 %v11669_v37  ;;  %v11692_v22 = vld [vmem:[#allocation6 + $0x284] ss:$16 sps:$4 sm:$0xff]   ;;  %v11750_v37 = vld [vmem:[#allocation6 + $0x340] ss:$16 sps:$4 sm:$0xff]  }
 0x17d   : > { %2856 = vmatpush1.bf16.msra.mxu1 %v11672_v38  ;;  %2814 = vmatprep.subr.bf16.mxu0 %v11677_v39  ;;  %v11755_v38 = vld [vmem:[#allocation6 + $0x124] ss:$16 sps:$4 sm:$0xff]  }
 0x17e   : > { %2857 = vmatprep.subr.bf16.mxu1 %v11680_v40  ;;  %2844 = vmatprep.mubr.bf16.mxu0 %v13885_v53  ;;  %v11758_v39 = vld [vmem:[#allocation6 + $0x324] ss:$16 sps:$4 sm:$0xff]   ;;  %v11753_v40 = vld [vmem:[#allocation6 + $0x120] ss:$16 sps:$4 sm:$0xff]  }
 0x17f   : > { %2887 = vmatprep.mubr.bf16.mxu1 %v13891_v58 }
 0x180   : > { %2815 = vmatpush1.bf16.msra.mxu0 %v11675_v29  ;;  %v11756_v29 = vld [vmem:[#allocation6 + $0x320] ss:$16 sps:$4 sm:$0xff]  }
 0x181   : > { %2858 = vmatpush1.bf16.msra.mxu1 %v11678_v41  ;;  %2816 = vmatprep.subr.bf16.mxu0 %v11683_v42  ;;  %v11761_v41 = vld [vmem:[#allocation6 + $0x104] ss:$16 sps:$4 sm:$0xff]  }
 0x182   : > { %2859 = vmatprep.subr.bf16.mxu1 %v11686_v43  ;;  %v11764_v42 = vld [vmem:[#allocation6 + $0x304] ss:$16 sps:$4 sm:$0xff]   ;;  %v11759_v43 = vld [vmem:[#allocation6 + $0x100] ss:$16 sps:$4 sm:$0xff]  }
 0x184   : > { %2817 = vmatpush1.bf16.msra.mxu0 %v11681_v44  ;;  %v11762_v44 = vld [vmem:[#allocation6 + $0x300] ss:$16 sps:$4 sm:$0xff]  }
 0x185   : > { %2860 = vmatpush1.bf16.msra.mxu1 %v11684_v45  ;;  %2818 = vmatprep.subr.bf16.mxu0 %v11689_v55  ;;  %v11767_v45 = vld [vmem:[#allocation6 + $0x464] ss:$16 sps:$4 sm:$0xff]   ;;  %v11770_v55 = vld [vmem:[#allocation6 + $0xec] ss:$16 sps:$4 sm:$0xff]  }
 0x186   : > { %2861 = vmatprep.subr.bf16.mxu1 %v11692_v22  ;;  %v11765_v22 = vld [vmem:[#allocation6 + $0x460] ss:$16 sps:$4 sm:$0xff]  }
 0x188   : > { %2819 = vmatpush1.bf16.msra.mxu0 %v11687_v46  ;;  %v11768_v46 = vld [vmem:[#allocation6 + $0xe8] ss:$16 sps:$4 sm:$0xff]  }
 0x189   : > { %2862 = vmatpush1.bf16.msra.mxu1 %v11690_v47  ;;  %2820 = vmatprep.subr.bf16.mxu0 %v11695_v48  ;;  %v11773_v47 = vld [vmem:[#allocation6 + $0x444] ss:$16 sps:$4 sm:$0xff]   ;;  %v11776_v48 = vld [vmem:[#allocation6 + $0xcc] ss:$16 sps:$4 sm:$0xff]  }
 0x18a   : > { %2863 = vmatprep.subr.bf16.mxu1 %v11698_v49  ;;  %v11771_v49 = vld [vmem:[#allocation6 + $0x440] ss:$16 sps:$4 sm:$0xff]  }
 0x18c   : > { %2821 = vmatpush1.bf16.msra.mxu0 %v11693_v50  ;;  %v11774_v50 = vld [vmem:[#allocation6 + $0xc8] ss:$16 sps:$4 sm:$0xff]  }
 0x18d   : > { %2864 = vmatpush1.bf16.msra.mxu1 %v11696_v51  ;;  %2822 = vmatprep.subr.bf16.mxu0 %v11701_v56  ;;  %v11779_v51 = vld [vmem:[#allocation6 + $0x424] ss:$16 sps:$4 sm:$0xff]   ;;  %v11782_v56 = vld [vmem:[#allocation6 + $0xac] ss:$16 sps:$4 sm:$0xff]  }
 0x18e   : > { %2865 = vmatprep.subr.bf16.mxu1 %v11704_v60  ;;  %v11777_v60 = vld [vmem:[#allocation6 + $0x420] ss:$16 sps:$4 sm:$0xff]  }
 0x190   : > { %2823 = vmatpush1.bf16.msra.mxu0 %v11699_v61  ;;  %v11780_v61 = vld [vmem:[#allocation6 + $0xa8] ss:$16 sps:$4 sm:$0xff]  }
 0x191   : > { %2866 = vmatpush1.bf16.msra.mxu1 %v11702_v62  ;;  %2824 = vmatprep.subr.bf16.mxu0 %v11707_v63  ;;  %v11785_v62 = vld [vmem:[#allocation6 + $0x404] ss:$16 sps:$4 sm:$0xff]   ;;  %v11788_v63 = vld [vmem:[#allocation6 + $0x8c] ss:$16 sps:$4 sm:$0xff]  }
 0x192   : > { %2867 = vmatprep.subr.bf16.mxu1 %v11710_v1  ;;  %v11783_v1 = vld [vmem:[#allocation6 + $0x400] ss:$16 sps:$4 sm:$0xff]  }
 0x194   : > { %2825 = vmatpush1.bf16.msra.mxu0 %v11705_v2  ;;  %v11786_v2 = vld [vmem:[#allocation6 + $0x88] ss:$16 sps:$4 sm:$0xff]  }
 0x195   : > { %2868 = vmatpush1.bf16.msra.mxu1 %v11708_v3  ;;  %2826 = vmatprep.subr.bf16.mxu0 %v11713_v4  ;;  %v11791_v3 = vld [vmem:[#allocation6 + $0x6c] ss:$16 sps:$4 sm:$0xff]  }
 0x196   : > { %2869 = vmatprep.subr.bf16.mxu1 %v11716_v6  ;;  %v11794_v4 = vld [vmem:[#allocation6 + $0x2ec] ss:$16 sps:$4 sm:$0xff]   ;;  %v11789_v6 = vld [vmem:[#allocation6 + $0x68] ss:$16 sps:$4 sm:$0xff]  }
 0x198   : > { %2827 = vmatpush1.bf16.msra.mxu0 %v11711_v7  ;;  %v11792_v7 = vld [vmem:[#allocation6 + $0x2e8] ss:$16 sps:$4 sm:$0xff]  }
 0x199   : > { %2870 = vmatpush1.bf16.msra.mxu1 %v11714_v8  ;;  %2828 = vmatprep.subr.bf16.mxu0 %v11719_v9  ;;  %v11797_v8 = vld [vmem:[#allocation6 + $0x4c] ss:$16 sps:$4 sm:$0xff]  }
 0x19a   : > { %2871 = vmatprep.subr.bf16.mxu1 %v11722_v10  ;;  %v11800_v9 = vld [vmem:[#allocation6 + $0x2cc] ss:$16 sps:$4 sm:$0xff]   ;;  %v11795_v10 = vld [vmem:[#allocation6 + $0x48] ss:$16 sps:$4 sm:$0xff]  }
 0x19c   : > { %2829 = vmatpush2.bf16.msra.mxu0 %v11717_v11  ;;  %v11798_v11 = vld [vmem:[#allocation6 + $0x2c8] ss:$16 sps:$4 sm:$0xff]  }
 0x19d   : > { %2872 = vmatpush2.bf16.msra.mxu1 %v11720_v12  ;;  %2830 = vmatprep.subr.bf16.mxu0 %v11725_v14  ;;  %v11803_v12 = vld [vmem:[#allocation6 + $0x2c] ss:$16 sps:$4 sm:$0xff]  }
 0x19e   : > { %2873 = vmatprep.subr.bf16.mxu1 %v11728_v15  ;;  %v11806_v14 = vld [vmem:[#allocation6 + $0x2ac] ss:$16 sps:$4 sm:$0xff]   ;;  %v11801_v15 = vld [vmem:[#allocation6 + $0x28] ss:$16 sps:$4 sm:$0xff]  }
 0x1a0   : > { %2831 = vmatpush2.bf16.msra.mxu0 %v11723_v16  ;;  %v11804_v16 = vld [vmem:[#allocation6 + $0x2a8] ss:$16 sps:$4 sm:$0xff]  }
 0x1a1   : > { %2874 = vmatpush2.bf16.msra.mxu1 %v11726_v18  ;;  %2832 = vmatprep.subr.bf16.mxu0 %v11731_v19  ;;  %v11809_v18 = vld [vmem:[#allocation6 + $0xc] ss:$16 sps:$4 sm:$0xff]  }
 0x1a2   : > { %2875 = vmatprep.subr.bf16.mxu1 %v11734_v20  ;;  %v11812_v19 = vld [vmem:[#allocation6 + $0x28c] ss:$16 sps:$4 sm:$0xff]   ;;  %v11807_v20 = vld [vmem:[#allocation6 + $0x8] ss:$16 sps:$4 sm:$0xff]  }
 0x1a4   : > { %2833 = vmatpush2.bf16.msra.mxu0 %v11729_v23  ;;  %v11810_v23 = vld [vmem:[#allocation6 + $0x288] ss:$16 sps:$4 sm:$0xff]  }
 0x1a5   : > { %2876 = vmatpush2.bf16.msra.mxu1 %v11732_v24  ;;  %2834 = vmatprep.subr.bf16.mxu0 %v11737_v26  ;;  %v11815_v24 = vld [vmem:[#allocation6 + $0x1ec] ss:$16 sps:$4 sm:$0xff]  }
 0x1a6   : > { %2877 = vmatprep.subr.bf16.mxu1 %v11740_v27  ;;  %v11818_v26 = vld [vmem:[#allocation6 + $0x26c] ss:$16 sps:$4 sm:$0xff]   ;;  %v11813_v27 = vld [vmem:[#allocation6 + $0x1e8] ss:$16 sps:$4 sm:$0xff]  }
 0x1a8   : > { %2835 = vmatpush2.bf16.msra.mxu0 %v11735_v28  ;;  %v11816_v28 = vld [vmem:[#allocation6 + $0x268] ss:$16 sps:$4 sm:$0xff]  }
 0x1a9   : > { %2878 = vmatpush2.bf16.msra.mxu1 %v11738_v30  ;;  %2836 = vmatprep.subr.bf16.mxu0 %v11743_v31  ;;  %v11821_v30 = vld [vmem:[#allocation6 + $0x1cc] ss:$16 sps:$4 sm:$0xff]  }
 0x1aa   : > { %2879 = vmatprep.subr.bf16.mxu1 %v11746_v32  ;;  %v11824_v31 = vld [vmem:[#allocation6 + $0x24c] ss:$16 sps:$4 sm:$0xff]   ;;  %v11819_v32 = vld [vmem:[#allocation6 + $0x1c8] ss:$16 sps:$4 sm:$0xff]  }
 0x1ac   : > { %2837 = vmatpush2.bf16.msra.mxu0 %v11741_v33  ;;  %v11822_v33 = vld [vmem:[#allocation6 + $0x248] ss:$16 sps:$4 sm:$0xff]  }
 0x1ad   : > { %2880 = vmatpush2.bf16.msra.mxu1 %v11744_v34  ;;  %2838 = vmatprep.subr.bf16.mxu0 %v11749_v52  ;;  %v11827_v34 = vld [vmem:[#allocation6 + $0x1ac] ss:$16 sps:$4 sm:$0xff]  }
 0x1ae   : > { %2881 = vmatprep.subr.bf16.mxu1 %v11752_v35  ;;  %v11830_v52 = vld [vmem:[#allocation6 + $0x22c] ss:$16 sps:$4 sm:$0xff]   ;;  %v11825_v35 = vld [vmem:[#allocation6 + $0x1a8] ss:$16 sps:$4 sm:$0xff]  }
 0x1b0   : > { %2839 = vmatpush2.bf16.msra.mxu0 %v11747_v36  ;;  %v11828_v36 = vld [vmem:[#allocation6 + $0x228] ss:$16 sps:$4 sm:$0xff]  }
 0x1b1   : > { %2882 = vmatpush2.bf16.msra.mxu1 %v11750_v37  ;;  %2840 = vmatprep.subr.bf16.mxu0 %v11755_v38  ;;  %v11833_v37 = vld [vmem:[#allocation6 + $0x18c] ss:$16 sps:$4 sm:$0xff]  }
 0x1b2   : > { %2883 = vmatprep.subr.bf16.mxu1 %v11758_v39  ;;  %v11836_v38 = vld [vmem:[#allocation6 + $0x20c] ss:$16 sps:$4 sm:$0xff]   ;;  %v11831_v39 = vld [vmem:[#allocation6 + $0x188] ss:$16 sps:$4 sm:$0xff]  }
 0x1b4   : > { %2841 = vmatpush2.bf16.msra.mxu0 %v11753_v40  ;;  %v11834_v40 = vld [vmem:[#allocation6 + $0x208] ss:$16 sps:$4 sm:$0xff]  }
 0x1b5   : > { %2884 = vmatpush2.bf16.msra.mxu1 %v11756_v29  ;;  %2842 = vmatprep.subr.bf16.mxu0 %v11761_v41  ;;  %v11839_v29 = vld [vmem:[#allocation6 + $0x16c] ss:$16 sps:$4 sm:$0xff]  }
 0x1b6   : > { %2885 = vmatprep.subr.bf16.mxu1 %v11764_v42  ;;  %v11842_v41 = vld [vmem:[#allocation6 + $0x3ec] ss:$16 sps:$4 sm:$0xff]   ;;  %v11837_v42 = vld [vmem:[#allocation6 + $0x168] ss:$16 sps:$4 sm:$0xff]  }
 0x1b8   : > { %2843 = vmatpush2.bf16.msra.mxu0 %v11759_v43  ;;  %v11840_v43 = vld [vmem:[#allocation6 + $0x3e8] ss:$16 sps:$4 sm:$0xff]  }
 0x1b9   : > { %2886 = vmatpush2.bf16.msra.mxu1 %v11762_v44  ;;  %2906 = vmatprep.subr.bf16.mxu0 %v11767_v45  ;;  %v11845_v44 = vld [vmem:[#allocation6 + $0x14c] ss:$16 sps:$4 sm:$0xff]  }
 0x1ba   : > { %2941 = vmatprep.subr.bf16.mxu1 %v11770_v55  ;;  %v11848_v45 = vld [vmem:[#allocation6 + $0x3cc] ss:$16 sps:$4 sm:$0xff]   ;;  %v11843_v55 = vld [vmem:[#allocation6 + $0x148] ss:$16 sps:$4 sm:$0xff]  }
 0x1bb   : > { %2845 = vmatmul.mubr.bf16.vlgmr.msra.gmra.mxu0 %v13906_v13 }
 0x1bc   : > { %2888 = vmatmul.mubr.bf16.vlgmr.msra.gmra.mxu1 %v13909_v17  ;;  %2907 = vmatpush1.bf16.msra.mxu0 %v11765_v22  ;;  %v11846_v22 = vld [vmem:[#allocation6 + $0x3c8] ss:$16 sps:$4 sm:$0xff]  }
 0x1bd   : > { %2942 = vmatpush1.bf16.msra.mxu1 %v11768_v46  ;;  %2908 = vmatprep.subr.bf16.mxu0 %v11773_v47  ;;  %v11851_v46 = vld [vmem:[#allocation6 + $0x12c] ss:$16 sps:$4 sm:$0xff]  }
 0x1be   : > { %2943 = vmatprep.subr.bf16.mxu1 %v11776_v48  ;;  %2930 = vmatprep.mubr.bf16.mxu0 %v13512_v5  ;;  %v11854_v47 = vld [vmem:[#allocation6 + $0x3ac] ss:$16 sps:$4 sm:$0xff]   ;;  %v11849_v48 = vld [vmem:[#allocation6 + $0x128] ss:$16 sps:$4 sm:$0xff]  }
 0x1bf   : > { %2973 = vmatprep.mubr.bf16.mxu1 %v13885_v53 }
 0x1c0   : > { %2909 = vmatpush1.bf16.msra.mxu0 %v11771_v49  ;;  %v11852_v49 = vld [vmem:[#allocation6 + $0x3a8] ss:$16 sps:$4 sm:$0xff]  }
 0x1c1   : > { %2944 = vmatpush1.bf16.msra.mxu1 %v11774_v50  ;;  %2910 = vmatprep.subr.bf16.mxu0 %v11779_v51  ;;  %v11857_v50 = vld [vmem:[#allocation6 + $0x10c] ss:$16 sps:$4 sm:$0xff]  }
 0x1c2   : > { %2945 = vmatprep.subr.bf16.mxu1 %v11782_v56  ;;  %v11860_v51 = vld [vmem:[#allocation6 + $0x38c] ss:$16 sps:$4 sm:$0xff]   ;;  %v11855_v56 = vld [vmem:[#allocation6 + $0x108] ss:$16 sps:$4 sm:$0xff]  }
 0x1c4   : > { %2911 = vmatpush1.bf16.msra.mxu0 %v11777_v60  ;;  %v11858_v60 = vld [vmem:[#allocation6 + $0x388] ss:$16 sps:$4 sm:$0xff]  }
 0x1c5   : > { %2946 = vmatpush1.bf16.msra.mxu1 %v11780_v61  ;;  %2912 = vmatprep.subr.bf16.mxu0 %v11785_v62  ;;  %v11863_v61 = vld [vmem:[#allocation6 + $0x36c] ss:$16 sps:$4 sm:$0xff]  }
 0x1c6   : > { %2947 = vmatprep.subr.bf16.mxu1 %v11788_v63  ;;  %v11866_v62 = vld [vmem:[#allocation6 + $0x46c] ss:$16 sps:$4 sm:$0xff]   ;;  %v11861_v63 = vld [vmem:[#allocation6 + $0x368] ss:$16 sps:$4 sm:$0xff]  }
 0x1c8   : > { %2913 = vmatpush1.bf16.msra.mxu0 %v11783_v1  ;;  %v11864_v1 = vld [vmem:[#allocation6 + $0x468] ss:$16 sps:$4 sm:$0xff]  }
 0x1c9   : > { %2948 = vmatpush1.bf16.msra.mxu1 %v11786_v2  ;;  %2984 = vmatprep.subr.bf16.mxu0 %v11794_v4  ;;  %v11869_v2 = vld [vmem:[#allocation6 + $0x34c] ss:$16 sps:$4 sm:$0xff]   ;;  %v11867_v4 = vld [vmem:[#allocation6 + $0x348] ss:$16 sps:$4 sm:$0xff]  }
 0x1ca   : > { %2949 = vmatprep.subr.bf16.mxu1 %v11791_v3  ;;  %v11872_v3 = vld [vmem:[#allocation6 + $0x44c] ss:$16 sps:$4 sm:$0xff]  }
 0x1cb   : > { %10382 = vmatmul.mubr.msk.bf16.vlgmr.msra.gmra.mxu0 %vm1828_vm1, %v13937_v57 }
 0x1cc   : > { %2985 = vmatpush1.bf16.msra.mxu0 %v11792_v7  ;;  %3016 = vmatprep.mubr.bf16.mxu0 %v13891_v58  ;;  %v11875_v7 = vld [vmem:[#allocation6 + $0x32c] ss:$16 sps:$4 sm:$0xff]  }
 0x1cd   : > { %2950 = vmatpush1.bf16.msra.mxu1 %v11789_v6  ;;  %2986 = vmatprep.subr.bf16.mxu0 %v11800_v9  ;;  %v11870_v6 = vld [vmem:[#allocation6 + $0x448] ss:$16 sps:$4 sm:$0xff]  }
 0x1ce   : > { %2951 = vmatprep.subr.bf16.mxu1 %v11797_v8  ;;  %v11878_v8 = vld [vmem:[#allocation6 + $0x42c] ss:$16 sps:$4 sm:$0xff]   ;;  %v11873_v9 = vld [vmem:[#allocation6 + $0x328] ss:$16 sps:$4 sm:$0xff]  }
 0x1d0   : > { %2987 = vmatpush1.bf16.msra.mxu0 %v11798_v11  ;;  %v11881_v11 = vld [vmem:[#allocation6 + $0x30c] ss:$16 sps:$4 sm:$0xff]  }
 0x1d1   : > { %2952 = vmatpush1.bf16.msra.mxu1 %v11795_v10  ;;  %2988 = vmatprep.subr.bf16.mxu0 %v11806_v14  ;;  %v11876_v10 = vld [vmem:[#allocation6 + $0x428] ss:$16 sps:$4 sm:$0xff]  }
 0x1d2   : > { %2953 = vmatprep.subr.bf16.mxu1 %v11803_v12  ;;  %v11884_v12 = vld [vmem:[#allocation6 + $0x40c] ss:$16 sps:$4 sm:$0xff]   ;;  %v11879_v14 = vld [vmem:[#allocation6 + $0x308] ss:$16 sps:$4 sm:$0xff]  }
 0x1d4   : > { %2989 = vmatpush1.bf16.msra.mxu0 %v11804_v16  ;;  %v11887_v16 = vld [vmem:[#allocation6 + $0x9e4] ss:$16 sps:$4 sm:$0xff]  }
 0x1d5   : > { %2954 = vmatpush1.bf16.msra.mxu1 %v11801_v15  ;;  %2990 = vmatprep.subr.bf16.mxu0 %v11812_v19  ;;  %v11882_v15 = vld [vmem:[#allocation6 + $0x408] ss:$16 sps:$4 sm:$0xff]   ;;  %v11885_v19 = vld [vmem:[#allocation6 + $0x9e0] ss:$16 sps:$4 sm:$0xff]  }
 0x1d6   : > { %2955 = vmatprep.subr.bf16.mxu1 %v11809_v18  ;;  %v11890_v18 = vld [vmem:[#allocation6 + $0xbe4] ss:$16 sps:$4 sm:$0xff]  }
 0x1d8   : > { %2991 = vmatpush1.bf16.msra.mxu0 %v11810_v23  ;;  %v3229_v23 = vrot.slane %v13885_v53, 1 }
 0x1d9   : > { %2956 = vmatpush1.bf16.msra.mxu1 %v11807_v20  ;;  %2992 = vmatprep.subr.bf16.mxu0 %v11818_v26  ;;  %v11888_v20 = vld [vmem:[#allocation6 + $0xbe0] ss:$16 sps:$4 sm:$0xff]   ;;  %v3235_v26 = vrot.slane %v13891_v58, 1  ;;  %v11899_v58 = vld [vmem:[#allocation6 + $0x9a4] ss:$16 sps:$4 sm:$0xff]  }
 0x1da   : > { %2957 = vmatprep.subr.bf16.mxu1 %v11815_v24  ;;  %v3230_v24 = vrot.slane %v13887_v54, 1 }
 0x1dc   : > { %2993 = vmatpush1.bf16.msra.mxu0 %v11816_v28  ;;  %v11893_v28 = vld [vmem:[#allocation6 + $0x9c4] ss:$16 sps:$4 sm:$0xff]   ;;  %v13979_v53 = vsel %vm3225_vm2, %v3229_v23, %v3230_v24 }
 0x1dd   : > { %2958 = vmatpush2.bf16.msra.mxu1 %v11813_v27  ;;  %2994 = vmatprep.subr.bf16.mxu0 %v11824_v31  ;;  %v3236_v27 = vrot.slane %v13893_v59, 1  ;;  %v11891_v31 = vld [vmem:[#allocation6 + $0x9c0] ss:$16 sps:$4 sm:$0xff]   ;;  %v11902_v59 = vld [vmem:[#allocation6 + $0xba4] ss:$16 sps:$4 sm:$0xff]  }
 0x1de   : > { %2959 = vmatprep.subr.bf16.mxu1 %v11821_v30  ;;  %v11896_v30 = vld [vmem:[#allocation6 + $0xbc4] ss:$16 sps:$4 sm:$0xff]  }
 0x1df   : > { %v13982_v54 = vsel %vm3225_vm2, %v3235_v26, %v3236_v27  ;;  %v11956_v23 = vld [vmem:[#allocation6 + $0xc84] ss:$16 sps:$4 sm:$0xff]   ;;  %v11951_v27 = vld [vmem:[#allocation6 + $0xa80] ss:$16 sps:$4 sm:$0xff]  }
 0x1e0   : > { %2995 = vmatpush1.bf16.msra.mxu0 %v11822_v33  ;;  %v11897_v33 = vld [vmem:[#allocation6 + $0x9a0] ss:$16 sps:$4 sm:$0xff]  }
 0x1e1   : > { %2960 = vmatpush2.bf16.msra.mxu1 %v11819_v32  ;;  %2996 = vmatprep.subr.bf16.mxu0 %v11830_v52  ;;  %v11894_v32 = vld [vmem:[#allocation6 + $0xbc0] ss:$16 sps:$4 sm:$0xff]   ;;  %v11905_v52 = vld [vmem:[#allocation6 + $0x984] ss:$16 sps:$4 sm:$0xff]  }
 0x1e2   : > { %2961 = vmatprep.subr.bf16.mxu1 %v11827_v34  ;;  %v11900_v34 = vld [vmem:[#allocation6 + $0xba0] ss:$16 sps:$4 sm:$0xff]  }
 0x1e4   : > { %2997 = vmatpush1.bf16.msra.mxu0 %v11828_v36  ;;  %v11903_v36 = vld [vmem:[#allocation6 + $0x980] ss:$16 sps:$4 sm:$0xff]  }
 0x1e5   : > { %2962 = vmatpush2.bf16.msra.mxu1 %v11825_v35  ;;  %2998 = vmatprep.subr.bf16.mxu0 %v11836_v38  ;;  %v11908_v35 = vld [vmem:[#allocation6 + $0xb84] ss:$16 sps:$4 sm:$0xff]  }
 0x1e6   : > { %2963 = vmatprep.subr.bf16.mxu1 %v11833_v37  ;;  %v11906_v37 = vld [vmem:[#allocation6 + $0xb80] ss:$16 sps:$4 sm:$0xff]   ;;  %v11911_v38 = vld [vmem:[#allocation6 + $0x964] ss:$16 sps:$4 sm:$0xff]  }
 0x1e8   : > { %2999 = vmatpush1.bf16.msra.mxu0 %v11834_v40  ;;  %v11909_v40 = vld [vmem:[#allocation6 + $0x960] ss:$16 sps:$4 sm:$0xff]  }
 0x1e9   : > { %2964 = vmatpush2.bf16.msra.mxu1 %v11831_v39  ;;  %3000 = vmatprep.subr.bf16.mxu0 %v11842_v41  ;;  %v11914_v39 = vld [vmem:[#allocation6 + $0xb64] ss:$16 sps:$4 sm:$0xff]  }
 0x1ea   : > { %2965 = vmatprep.subr.bf16.mxu1 %v11839_v29  ;;  %v11912_v29 = vld [vmem:[#allocation6 + $0xb60] ss:$16 sps:$4 sm:$0xff]   ;;  %v11917_v41 = vld [vmem:[#allocation6 + $0x944] ss:$16 sps:$4 sm:$0xff]  }
 0x1ec   : > { %3001 = vmatpush2.bf16.msra.mxu0 %v11840_v43  ;;  %v11915_v43 = vld [vmem:[#allocation6 + $0x940] ss:$16 sps:$4 sm:$0xff]  }
 0x1ed   : > { %2966 = vmatpush2.bf16.msra.mxu1 %v11837_v42  ;;  %3002 = vmatprep.subr.bf16.mxu0 %v11848_v45  ;;  %v11920_v42 = vld [vmem:[#allocation6 + $0xb44] ss:$16 sps:$4 sm:$0xff]  }
 0x1ee   : > { %2967 = vmatprep.subr.bf16.mxu1 %v11845_v44  ;;  %v11918_v44 = vld [vmem:[#allocation6 + $0xb40] ss:$16 sps:$4 sm:$0xff]   ;;  %v11923_v45 = vld [vmem:[#allocation6 + $0x924] ss:$16 sps:$4 sm:$0xff]  }
 0x1f0   : > { %3003 = vmatpush2.bf16.msra.mxu0 %v11846_v22  ;;  %v11921_v22 = vld [vmem:[#allocation6 + $0x920] ss:$16 sps:$4 sm:$0xff]  }
 0x1f1   : > { %2968 = vmatpush2.bf16.msra.mxu1 %v11843_v55  ;;  %3004 = vmatprep.subr.bf16.mxu0 %v11854_v47  ;;  %v11926_v55 = vld [vmem:[#allocation6 + $0xb24] ss:$16 sps:$4 sm:$0xff]   ;;  %v13986_v47 = vpop.f32.mrf.mxu0 }
 0x1f2   : > { %2969 = vmatprep.subr.bf16.mxu1 %v11851_v46  ;;  %v11924_v46 = vld [vmem:[#allocation6 + $0xb20] ss:$16 sps:$4 sm:$0xff]  }
 0x1f4   : > { %3005 = vmatpush2.bf16.msra.mxu0 %v11852_v49  ;;  %v11929_v49 = vld [vmem:[#allocation6 + $0x904] ss:$16 sps:$4 sm:$0xff]  }
 0x1f5   : > { %2970 = vmatpush2.bf16.msra.mxu1 %v11849_v48  ;;  %3006 = vmatprep.subr.bf16.mxu0 %v11860_v51  ;;  %v13988_v48 = vpop.f32.mrf.mxu1  ;;  %v11927_v51 = vld [vmem:[#allocation6 + $0x900] ss:$16 sps:$4 sm:$0xff]  }
 0x1f6   : > { %2971 = vmatprep.subr.bf16.mxu1 %v11857_v50  ;;  %v11932_v50 = vld [vmem:[#allocation6 + $0xb04] ss:$16 sps:$4 sm:$0xff]  }
 0x1f8   : > { %3007 = vmatpush2.bf16.msra.mxu0 %v11858_v60  ;;  %v13990_v60 = vpop.f32.mrf.mxu0 }
 0x1f9   : > { %2972 = vmatpush2.bf16.msra.mxu1 %v11855_v56  ;;  %3008 = vmatprep.subr.bf16.mxu0 %v11863_v61  ;;  %v11930_v56 = vld [vmem:[#allocation6 + $0xb00] ss:$16 sps:$4 sm:$0xff]   ;;  %v13992_v61 = vpop.f32.mrf.mxu1 }
 0x1fa   : > { %3035 = vmatprep.subr.bf16.mxu1 %v11866_v62  ;;  %v11935_v62 = vld [vmem:[#allocation6 + $0xae4] ss:$16 sps:$4 sm:$0xff]  }
 0x1fc   : > { %2974 = vmatmul.mubr.bf16.vlgmr.msra.gmra.mxu1 %v13906_v13  ;;  %3009 = vmatpush2.bf16.msra.mxu0 %v11861_v63  ;;  %v11938_v63 = vld [vmem:[#allocation6 + $0xce4] ss:$16 sps:$4 sm:$0xff]  }
 0x1fd   : > { %3036 = vmatpush1.bf16.msra.mxu1 %v11864_v1  ;;  %3010 = vmatprep.subr.bf16.mxu0 %v11869_v2  ;;  %v11933_v1 = vld [vmem:[#allocation6 + $0xae0] ss:$16 sps:$4 sm:$0xff]  }
 0x1fe   : > { %3037 = vmatprep.subr.bf16.mxu1 %v11872_v3  ;;  %3059 = vmatprep.mubr.bf16.mxu1 %v13512_v5  ;;  %v11936_v2 = vld [vmem:[#allocation6 + $0xce0] ss:$16 sps:$4 sm:$0xff]   ;;  %v13994_v3 = vpop.f32.mrf.mxu0 }
 0x200   : > { %3011 = vmatpush2.bf16.msra.mxu0 %v11867_v4  ;;  %v13996_v4 = vpop.f32.mrf.mxu1 }
 0x201   : > { %3038 = vmatpush1.bf16.msra.mxu1 %v11870_v6  ;;  %3012 = vmatprep.subr.bf16.mxu0 %v11875_v7  ;;  %v11941_v6 = vld [vmem:[#allocation6 + $0xac4] ss:$16 sps:$4 sm:$0xff]  }
 0x202   : > { %3039 = vmatprep.subr.bf16.mxu1 %v11878_v8  ;;  %v11944_v7 = vld [vmem:[#allocation6 + $0xcc4] ss:$16 sps:$4 sm:$0xff]   ;;  %v11939_v8 = vld [vmem:[#allocation6 + $0xac0] ss:$16 sps:$4 sm:$0xff]  }
 0x204   : > { %3013 = vmatpush2.bf16.msra.mxu0 %v11873_v9  ;;  %v11942_v9 = vld [vmem:[#allocation6 + $0xcc0] ss:$16 sps:$4 sm:$0xff]  }
 0x205   : > { %3040 = vmatpush1.bf16.msra.mxu1 %v11876_v10  ;;  %3014 = vmatprep.subr.bf16.mxu0 %v11881_v11  ;;  %v13998_v10 = vpop.f32.mrf.mxu0  ;;  %v14000_v11 = vpop.f32.mrf.mxu1 }
 0x206   : > { %3041 = vmatprep.subr.bf16.mxu1 %v11884_v12  ;;  %v11947_v12 = vld [vmem:[#allocation6 + $0xaa4] ss:$16 sps:$4 sm:$0xff]  }
 0x208   : > { %3015 = vmatpush2.bf16.msra.mxu0 %v11879_v14  ;;  %v11950_v14 = vld [vmem:[#allocation6 + $0xca4] ss:$16 sps:$4 sm:$0xff]  }
 0x209   : > { %3042 = vmatpush1.bf16.msra.mxu1 %v11882_v15  ;;  %3968 = vmatprep.subr.bf16.mxu0 %v11887_v16  ;;  %v14002_v15 = vpop.f32.mrf.mxu0 }
 0x20a   : > { %4011 = vmatprep.subr.bf16.mxu1 %v11890_v18  ;;  %v11945_v18 = vld [vmem:[#allocation6 + $0xaa0] ss:$16 sps:$4 sm:$0xff]  }
 0x20b   : > { %3017 = vmatmul.mubr.bf16.vlgmr.msra.gmra.mxu0 %v13909_v17  ;;  %v14004_v24 = vpop.f32.mrf.mxu0 }
 0x20c   : > { %10383 = vmatmul.mubr.msk.bf16.vlgmr.msra.gmra.mxu1 %vm1828_vm1, %v13937_v57  ;;  %3969 = vmatpush1.bf16.msra.mxu0 %v11885_v19  ;;  %v11948_v19 = vld [vmem:[#allocation6 + $0xca0] ss:$16 sps:$4 sm:$0xff]  }
 0x20d   : > { %4012 = vmatpush1.bf16.msra.mxu1 %v11888_v20  ;;  %3970 = vmatprep.subr.bf16.mxu0 %v11893_v28  ;;  %v11953_v20 = vld [vmem:[#allocation6 + $0xa84] ss:$16 sps:$4 sm:$0xff]   ;;  %v11954_v28 = vld [vmem:[#allocation6 + $0xc80] ss:$16 sps:$4 sm:$0xff]  }
 0x20e   : > { %4013 = vmatprep.subr.bf16.mxu1 %v11896_v30  ;;  %4000 = vmatprep.mubr.bf16.mxu0 %v13979_v53  ;;  %v11959_v30 = vld [vmem:[#allocation6 + $0xa64] ss:$16 sps:$4 sm:$0xff]  }
 0x20f   : > { %4043 = vmatprep.mubr.bf16.mxu1 %v13982_v54 }
 0x210   : > { %3971 = vmatpush1.bf16.msra.mxu0 %v11891_v31  ;;  %v11962_v31 = vld [vmem:[#allocation6 + $0xc64] ss:$16 sps:$4 sm:$0xff]  }
 0x211   : > { %4014 = vmatpush1.bf16.msra.mxu1 %v11894_v32  ;;  %3972 = vmatprep.subr.bf16.mxu0 %v11899_v58  ;;  %v14006_v32 = vpop.f32.mrf.mxu0 }
 0x212   : > { %4015 = vmatprep.subr.bf16.mxu1 %v11902_v59  ;;  %v11957_v59 = vld [vmem:[#allocation6 + $0xa60] ss:$16 sps:$4 sm:$0xff]  }
 0x214   : > { %3973 = vmatpush1.bf16.msra.mxu0 %v11897_v33  ;;  %v11960_v33 = vld [vmem:[#allocation6 + $0xc60] ss:$16 sps:$4 sm:$0xff]  }
 0x215   : > { %4016 = vmatpush1.bf16.msra.mxu1 %v11900_v34  ;;  %3974 = vmatprep.subr.bf16.mxu0 %v11905_v52  ;;  %v11965_v34 = vld [vmem:[#allocation6 + $0xa44] ss:$16 sps:$4 sm:$0xff]  }
 0x216   : > { %4017 = vmatprep.subr.bf16.mxu1 %v11908_v35  ;;  %v11968_v52 = vld [vmem:[#allocation6 + $0xc44] ss:$16 sps:$4 sm:$0xff]   ;;  %v14008_v35 = vpop.f32.mrf.mxu0 }
 0x218   : > { %3975 = vmatpush1.bf16.msra.mxu0 %v11903_v36 }
 0x219   : > { %4018 = vmatpush1.bf16.msra.mxu1 %v11906_v37  ;;  %3976 = vmatprep.subr.bf16.mxu0 %v11911_v38  ;;  %v11963_v37 = vld [vmem:[#allocation6 + $0xa40] ss:$16 sps:$4 sm:$0xff]  }
 0x21a   : > { %4019 = vmatprep.subr.bf16.mxu1 %v11914_v39  ;;  %v11966_v38 = vld [vmem:[#allocation6 + $0xc40] ss:$16 sps:$4 sm:$0xff]  }
 0x21c   : > { %3977 = vmatpush1.bf16.msra.mxu0 %v11909_v40 }
 0x21d   : > { %4020 = vmatpush1.bf16.msra.mxu1 %v11912_v29  ;;  %3978 = vmatprep.subr.bf16.mxu0 %v11917_v41  ;;  %v11971_v29 = vld [vmem:[#allocation6 + $0xa24] ss:$16 sps:$4 sm:$0xff]  }
 0x21e   : > { %4021 = vmatprep.subr.bf16.mxu1 %v11920_v42  ;;  %v11974_v41 = vld [vmem:[#allocation6 + $0xc24] ss:$16 sps:$4 sm:$0xff]  }
 0x220   : > { %3979 = vmatpush1.bf16.msra.mxu0 %v11915_v43 }
 0x221   : > { %4022 = vmatpush1.bf16.msra.mxu1 %v11918_v44  ;;  %3980 = vmatprep.subr.bf16.mxu0 %v11923_v45 }
 0x222   : > { %4023 = vmatprep.subr.bf16.mxu1 %v11926_v55 }
 0x224   : > { %3981 = vmatpush1.bf16.msra.mxu0 %v11921_v22  ;;  %v11969_v22 = vld [vmem:[#allocation6 + $0xa20] ss:$16 sps:$4 sm:$0xff]  }
 0x225   : > { %4024 = vmatpush1.bf16.msra.mxu1 %v11924_v46  ;;  %3982 = vmatprep.subr.bf16.mxu0 %v11929_v49  ;;  %v11972_v46 = vld [vmem:[#allocation6 + $0xc20] ss:$16 sps:$4 sm:$0xff]  }
 0x226   : > { %4025 = vmatprep.subr.bf16.mxu1 %v11932_v50 }
 0x228   : > { %3983 = vmatpush1.bf16.msra.mxu0 %v11927_v51  ;;  %v11977_v51 = vld [vmem:[#allocation6 + $0xa04] ss:$16 sps:$4 sm:$0xff]  }
 0x229   : > { %4026 = vmatpush1.bf16.msra.mxu1 %v11930_v56  ;;  %3984 = vmatprep.subr.bf16.mxu0 %v11935_v62  ;;  %v11980_v56 = vld [vmem:[#allocation6 + $0xc04] ss:$16 sps:$4 sm:$0xff]  }
 0x22a   : > { %4027 = vmatprep.subr.bf16.mxu1 %v11938_v63 }
 0x22c   : > { %3985 = vmatpush2.bf16.msra.mxu0 %v11933_v1  ;;  %v1995_v16 = vpop.f32.mrf.mxu1 }
 0x22d   : > { %4028 = vmatpush2.bf16.msra.mxu1 %v11936_v2  ;;  %3986 = vmatprep.subr.bf16.mxu0 %v11941_v6 }
 0x22e   : > { %4029 = vmatprep.subr.bf16.mxu1 %v11944_v7  ;;  %v1997_v26 = vpop.f32.mrf.mxu1  ;;  %v11975_v7 = vld [vmem:[#allocation6 + $0xa00] ss:$16 sps:$4 sm:$0xff]  }
 0x230   : > { %3987 = vmatpush2.bf16.msra.mxu0 %v11939_v8  ;;  %v1999_v58 = vpop.f32.mrf.mxu1  ;;  %v11978_v8 = vld [vmem:[#allocation6 + $0xc00] ss:$16 sps:$4 sm:$0xff]  }
 0x231   : > { %4030 = vmatpush2.bf16.msra.mxu1 %v11942_v9  ;;  %3988 = vmatprep.subr.bf16.mxu0 %v11947_v12  ;;  %v3226_v12 = vrot.slane %v13906_v13, 1 }
 0x232   : > { %4031 = vmatprep.subr.bf16.mxu1 %v11950_v14  ;;  %v2001_v36 = vpop.f32.mrf.mxu1  ;;  %v11983_v14 = vld [vmem:[#allocation6 + $0xd64] ss:$16 sps:$4 sm:$0xff]  }
 0x234   : > { %3989 = vmatpush2.bf16.msra.mxu0 %v11945_v18 }
 0x235   : > { %4032 = vmatpush2.bf16.msra.mxu1 %v11948_v19  ;;  %3990 = vmatprep.subr.bf16.mxu0 %v11953_v20  ;;  %v3227_v19 = vrot.slane %v13911_v21, 1  ;;  %v3232_v20 = vrot.slane %v13909_v17, 1  ;;  %v11987_v21 = vld [vmem:[#allocation6 + $0xd40] ss:$16 sps:$4 sm:$0xff]   ;;  %v11990_v17 = vld [vmem:[#allocation6 + $0x9c8] ss:$16 sps:$4 sm:$0xff]  }
 0x236   : > { %4033 = vmatprep.subr.bf16.mxu1 %v11956_v23  ;;  %v3233_v23 = vrot.slane %v13917_v25, 1  ;;  %v11995_v25 = vld [vmem:[#allocation6 + $0xd24] ss:$16 sps:$4 sm:$0xff]  }
 0x237   : > { %v14023_v13 = vsel %vm3225_vm2, %v3226_v12, %v3227_v19  ;;  %v12040_v12 = vld [vmem:[#allocation6 + $0xb4c] ss:$16 sps:$4 sm:$0xff]  }
 0x238   : > { %3991 = vmatpush2.bf16.msra.mxu0 %v11951_v27  ;;  %v11984_v27 = vld [vmem:[#allocation6 + $0x9e8] ss:$16 sps:$4 sm:$0xff]   ;;  %v12046_v19 = vld [vmem:[#allocation6 + $0xb2c] ss:$16 sps:$4 sm:$0xff]  }
 0x239   : > { %4034 = vmatpush2.bf16.msra.mxu1 %v11954_v28  ;;  %3992 = vmatprep.subr.bf16.mxu0 %v11959_v30  ;;  %v11989_v28 = vld [vmem:[#allocation6 + $0xd44] ss:$16 sps:$4 sm:$0xff]   ;;  %v11992_v30 = vld [vmem:[#allocation6 + $0x9cc] ss:$16 sps:$4 sm:$0xff]  }
 0x23a   : > { %4035 = vmatprep.subr.bf16.mxu1 %v11962_v31  ;;  %v14026_v31 = vsel %vm3225_vm2, %v3232_v20, %v3233_v23  ;;  %v12041_v20 = vld [vmem:[#allocation6 + $0xaa8] ss:$16 sps:$4 sm:$0xff]  }
 0x23b   : > { %v2038_v39 = vpop.f32.mrf.mxu0  ;;  %v12044_v23 = vld [vmem:[#allocation6 + $0xb28] ss:$16 sps:$4 sm:$0xff]  }
 0x23c   : > { %v2081_v40 = vpop.f32.mrf.mxu1  ;;  %v2039_v42 = vadd.f32 %v2038_v39, %v1995_v16  ;;  %3993 = vmatpush2.bf16.msra.mxu0 %v11957_v59  ;;  %v11986_v16 = vld [vmem:[#allocation6 + $0x9ec] ss:$16 sps:$4 sm:$0xff]   ;;  %v11993_v59 = vld [vmem:[#allocation6 + $0xd20] ss:$16 sps:$4 sm:$0xff]   ;;  %v3239_v39 = vrot.slane %v13942_v0, 1 }
 0x23d   : > { %4036 = vmatpush2.bf16.msra.mxu1 %v11960_v33  ;;  %v2040_v43 = vpop.f32.mrf.mxu0  ;;  %3994 = vmatprep.subr.bf16.mxu0 %v11965_v34  ;;  %v11996_v33 = vld [vmem:[#allocation6 + $0x9a8] ss:$16 sps:$4 sm:$0xff]   ;;  %v12001_v34 = vld [vmem:[#allocation6 + $0xd04] ss:$16 sps:$4 sm:$0xff]   ;;  %v12022_v0 = vld [vmem:[#allocation6 + $0xbac] ss:$16 sps:$4 sm:$0xff]  }
 0x23e   : > { %v2083_v44 = vpop.f32.mrf.mxu1  ;;  %4037 = vmatprep.subr.bf16.mxu1 %v11968_v52  ;;  %v14010_v45 = vadd.f32 %v2081_v40, %v2039_v42  ;;  %v2041_v55 = vadd.f32 %v2040_v43, %v1997_v26  ;;  %v11981_v26 = vld [vmem:[#allocation6 + $0xd60] ss:$16 sps:$4 sm:$0xff]   ;;  %v12004_v52 = vld [vmem:[#allocation6 + $0x98c] ss:$16 sps:$4 sm:$0xff]  }
 0x23f   : > { %v2042_v49 = vpop.f32.mrf.mxu0  ;;  %v12007_v40 = vld [vmem:[#allocation6 + $0x96c] ss:$16 sps:$4 sm:$0xff]  }
 0x240   : > { %v2085_v50 = vpop.f32.mrf.mxu1  ;;  %v14012_v62 = vadd.f32 %v2083_v44, %v2041_v55  ;;  %v2043_v63 = vadd.f32 %v2042_v49, %v1999_v58  ;;  %3995 = vmatpush2.bf16.msra.mxu0 %v11963_v37  ;;  %v11998_v58 = vld [vmem:[#allocation6 + $0x9ac] ss:$16 sps:$4 sm:$0xff]   ;;  %v12002_v37 = vld [vmem:[#allocation6 + $0x988] ss:$16 sps:$4 sm:$0xff]  }
 0x241   : > { %4038 = vmatpush2.bf16.msra.mxu1 %v11966_v38  ;;  %v2044_v1 = vpop.f32.mrf.mxu0  ;;  %3996 = vmatprep.subr.bf16.mxu0 %v11971_v29  ;;  %v3238_v38 = vrot.slane %v13937_v57, 1  ;;  %v12010_v29 = vld [vmem:[#allocation6 + $0xbec] ss:$16 sps:$4 sm:$0xff]   ;;  %v12011_v55 = vld [vmem:[#allocation6 + $0x948] ss:$16 sps:$4 sm:$0xff]  }
 0x242   : > { %4039 = vmatprep.subr.bf16.mxu1 %v11974_v41  ;;  %v14014_v2 = vadd.f32 %v2085_v50, %v2043_v63  ;;  %v2045_v6 = vadd.f32 %v2044_v1, %v2001_v36  ;;  %v2087_v9 = vpop.f32.mrf.mxu1  ;;  %v11999_v36 = vld [vmem:[#allocation6 + $0xd00] ss:$16 sps:$4 sm:$0xff]   ;;  %v12005_v41 = vld [vmem:[#allocation6 + $0x968] ss:$16 sps:$4 sm:$0xff]   ;;  %v12013_v42 = vld [vmem:[#allocation6 + $0x94c] ss:$16 sps:$4 sm:$0xff]  }
 0x243   : > { %v12016_v43 = vld [vmem:[#allocation6 + $0xbcc] ss:$16 sps:$4 sm:$0xff]   ;;  %v14035_v44 = vsel %vm3225_vm2, %v3238_v38, %v3239_v39  ;;  %v12020_v49 = vld [vmem:[#allocation6 + $0xba8] ss:$16 sps:$4 sm:$0xff]  }
 0x244   : > { %v14017_v18 = vadd.f32 %v2087_v9, %v2045_v6  ;;  %3997 = vmatpush2.bf16.msra.mxu0 %v11969_v22  ;;  %v12014_v22 = vld [vmem:[#allocation6 + $0xbc8] ss:$16 sps:$4 sm:$0xff]   ;;  %v12019_v57 = vld [vmem:[#allocation6 + $0x92c] ss:$16 sps:$4 sm:$0xff]  }
 0x245   : > { %4040 = vmatpush2.bf16.msra.mxu1 %v11972_v46  ;;  %3998 = vmatprep.subr.bf16.mxu0 %v11977_v51  ;;  %v12017_v46 = vld [vmem:[#allocation6 + $0x928] ss:$16 sps:$4 sm:$0xff]   ;;  %v12025_v50 = vld [vmem:[#allocation6 + $0x90c] ss:$16 sps:$4 sm:$0xff]  }
 0x246   : > { %4041 = vmatprep.subr.bf16.mxu1 %v11980_v56  ;;  %v12028_v51 = vld [vmem:[#allocation6 + $0xb8c] ss:$16 sps:$4 sm:$0xff]   ;;  %v12023_v56 = vld [vmem:[#allocation6 + $0x908] ss:$16 sps:$4 sm:$0xff]  }
 0x247   : > { %v12026_v63 = vld [vmem:[#allocation6 + $0xb88] ss:$16 sps:$4 sm:$0xff]   ;;  %v12031_v1 = vld [vmem:[#allocation6 + $0xaec] ss:$16 sps:$4 sm:$0xff]  }
 0x248   : > { %3999 = vmatpush2.bf16.msra.mxu0 %v11975_v7  ;;  %v12034_v6 = vld [vmem:[#allocation6 + $0xb6c] ss:$16 sps:$4 sm:$0xff]   ;;  %v12029_v7 = vld [vmem:[#allocation6 + $0xae8] ss:$16 sps:$4 sm:$0xff]  }
 0x249   : > { %4042 = vmatpush2.bf16.msra.mxu1 %v11978_v8  ;;  %4062 = vmatprep.subr.bf16.mxu0 %v11983_v14  ;;  %v12032_v8 = vld [vmem:[#allocation6 + $0xb68] ss:$16 sps:$4 sm:$0xff]   ;;  %v12037_v9 = vld [vmem:[#allocation6 + $0xacc] ss:$16 sps:$4 sm:$0xff]  }
 0x24a   : > { %4097 = vmatprep.subr.bf16.mxu1 %v11986_v16  ;;  %v12038_v14 = vld [vmem:[#allocation6 + $0xb48] ss:$16 sps:$4 sm:$0xff]   ;;  %v12043_v16 = vld [vmem:[#allocation6 + $0xaac] ss:$16 sps:$4 sm:$0xff]  }
 0x24b   : > { %4001 = vmatmul.mubr.bf16.vlgmr.msra.gmra.mxu0 %v14023_v13  ;;  %v12065_v38 = vld [vmem:[#allocation6 + $0xa28] ss:$16 sps:$4 sm:$0xff]  }
 0x24c   : > { %4044 = vmatmul.mubr.bf16.vlgmr.msra.gmra.mxu1 %v14026_v31  ;;  %4063 = vmatpush1.bf16.msra.mxu0 %v11981_v26  ;;  %v12049_v26 = vld [vmem:[#allocation6 + $0xa8c] ss:$16 sps:$4 sm:$0xff]   ;;  %v12068_v39 = vld [vmem:[#allocation6 + $0xca8] ss:$16 sps:$4 sm:$0xff]  }
 0x24d   : > { %4098 = vmatpush1.bf16.msra.mxu1 %v11984_v27  ;;  %4064 = vmatprep.subr.bf16.mxu0 %v11989_v28  ;;  %v12052_v27 = vld [vmem:[#allocation6 + $0xb0c] ss:$16 sps:$4 sm:$0xff]   ;;  %v12047_v28 = vld [vmem:[#allocation6 + $0xa88] ss:$16 sps:$4 sm:$0xff]  }
 0x24e   : > { %4099 = vmatprep.subr.bf16.mxu1 %v11992_v30  ;;  %4086 = vmatprep.mubr.bf16.mxu0 %v13512_v5  ;;  %v12050_v30 = vld [vmem:[#allocation6 + $0xb08] ss:$16 sps:$4 sm:$0xff]  }
 0x24f   : > { %4129 = vmatprep.mubr.bf16.mxu1 %v13979_v53  ;;  %v12008_v53 = vld [vmem:[#allocation6 + $0xbe8] ss:$16 sps:$4 sm:$0xff]  }
 0x250   : > { %4065 = vmatpush1.bf16.msra.mxu0 %v11987_v21  ;;  %v12055_v21 = vld [vmem:[#allocation6 + $0xa6c] ss:$16 sps:$4 sm:$0xff]  }
 0x251   : > { %4100 = vmatpush1.bf16.msra.mxu1 %v11990_v17  ;;  %4066 = vmatprep.subr.bf16.mxu0 %v11995_v25  ;;  %v12058_v17 = vld [vmem:[#allocation6 + $0xcec] ss:$16 sps:$4 sm:$0xff]   ;;  %v12053_v25 = vld [vmem:[#allocation6 + $0xa68] ss:$16 sps:$4 sm:$0xff]  }
 0x252   : > { %4101 = vmatprep.subr.bf16.mxu1 %v11998_v58  ;;  %v12056_v58 = vld [vmem:[#allocation6 + $0xce8] ss:$16 sps:$4 sm:$0xff]  }
 0x254   : > { %4067 = vmatpush1.bf16.msra.mxu0 %v11993_v59  ;;  %v12061_v59 = vld [vmem:[#allocation6 + $0xa4c] ss:$16 sps:$4 sm:$0xff]  }
 0x255   : > { %4102 = vmatpush1.bf16.msra.mxu1 %v11996_v33  ;;  %4068 = vmatprep.subr.bf16.mxu0 %v12001_v34  ;;  %v12064_v33 = vld [vmem:[#allocation6 + $0xccc] ss:$16 sps:$4 sm:$0xff]   ;;  %v12059_v34 = vld [vmem:[#allocation6 + $0xa48] ss:$16 sps:$4 sm:$0xff]  }
 0x256   : > { %4103 = vmatprep.subr.bf16.mxu1 %v12004_v52  ;;  %v12062_v52 = vld [vmem:[#allocation6 + $0xcc8] ss:$16 sps:$4 sm:$0xff]  }
 0x258   : > { %4069 = vmatpush1.bf16.msra.mxu0 %v11999_v36  ;;  %v12067_v36 = vld [vmem:[#allocation6 + $0xa2c] ss:$16 sps:$4 sm:$0xff]  }
 0x259   : > { %4104 = vmatpush1.bf16.msra.mxu1 %v12002_v37  ;;  %4140 = vmatprep.subr.bf16.mxu0 %v12010_v29  ;;  %v12070_v37 = vld [vmem:[#allocation6 + $0xcac] ss:$16 sps:$4 sm:$0xff]  }
 0x25a   : > { %4105 = vmatprep.subr.bf16.mxu1 %v12007_v40  ;;  %v12073_v40 = vld [vmem:[#allocation6 + $0xa0c] ss:$16 sps:$4 sm:$0xff]  }
 0x25b   : > { %10528 = vmatmul.mubr.msk.bf16.vlgmr.msra.gmra.mxu0 %vm1828_vm1, %v14035_v44  ;;  %v12076_v29 = vld [vmem:[#allocation6 + $0xc8c] ss:$16 sps:$4 sm:$0xff]  }
 0x25c   : > { %4141 = vmatpush1.bf16.msra.mxu0 %v12008_v53  ;;  %4172 = vmatprep.mubr.bf16.mxu0 %v13982_v54  ;;  %v12035_v54 = vld [vmem:[#allocation6 + $0xac8] ss:$16 sps:$4 sm:$0xff]  }
 0x25d   : > { %4106 = vmatpush1.bf16.msra.mxu1 %v12005_v41  ;;  %4142 = vmatprep.subr.bf16.mxu0 %v12016_v43  ;;  %v12071_v41 = vld [vmem:[#allocation6 + $0xa08] ss:$16 sps:$4 sm:$0xff]   ;;  %v12082_v43 = vld [vmem:[#allocation6 + $0xd6c] ss:$16 sps:$4 sm:$0xff]  }
 0x25e   : > { %4107 = vmatprep.subr.bf16.mxu1 %v12013_v42  ;;  %v12074_v53 = vld [vmem:[#allocation6 + $0xc88] ss:$16 sps:$4 sm:$0xff]   ;;  %v12079_v42 = vld [vmem:[#allocation6 + $0xc6c] ss:$16 sps:$4 sm:$0xff]  }
 0x260   : > { %4143 = vmatpush1.bf16.msra.mxu0 %v12014_v22  ;;  %v12080_v22 = vld [vmem:[#allocation6 + $0xd68] ss:$16 sps:$4 sm:$0xff]  }
 0x261   : > { %4108 = vmatpush1.bf16.msra.mxu1 %v12011_v55  ;;  %4144 = vmatprep.subr.bf16.mxu0 %v12022_v0  ;;  %v12077_v55 = vld [vmem:[#allocation6 + $0xc68] ss:$16 sps:$4 sm:$0xff]   ;;  %v12088_v0 = vld [vmem:[#allocation6 + $0xd4c] ss:$16 sps:$4 sm:$0xff]  }
 0x262   : > { %4109 = vmatprep.subr.bf16.mxu1 %v12019_v57  ;;  %v12085_v57 = vld [vmem:[#allocation6 + $0xc4c] ss:$16 sps:$4 sm:$0xff]  }
 0x264   : > { %4145 = vmatpush1.bf16.msra.mxu0 %v12020_v49  ;;  %v12086_v49 = vld [vmem:[#allocation6 + $0xd48] ss:$16 sps:$4 sm:$0xff]  }
 0x265   : > { %4110 = vmatpush1.bf16.msra.mxu1 %v12017_v46  ;;  %4146 = vmatprep.subr.bf16.mxu0 %v12028_v51  ;;  %v12083_v46 = vld [vmem:[#allocation6 + $0xc48] ss:$16 sps:$4 sm:$0xff]   ;;  %v12094_v51 = vld [vmem:[#allocation6 + $0xd2c] ss:$16 sps:$4 sm:$0xff]  }
 0x266   : > { %4111 = vmatprep.subr.bf16.mxu1 %v12025_v50  ;;  %v12091_v50 = vld [vmem:[#allocation6 + $0xc2c] ss:$16 sps:$4 sm:$0xff]  }
 0x268   : > { %4147 = vmatpush1.bf16.msra.mxu0 %v12026_v63  ;;  %v12092_v63 = vld [vmem:[#allocation6 + $0xd28] ss:$16 sps:$4 sm:$0xff]  }
 0x269   : > { %4112 = vmatpush1.bf16.msra.mxu1 %v12023_v56  ;;  %4148 = vmatprep.subr.bf16.mxu0 %v12034_v6  ;;  %v12089_v56 = vld [vmem:[#allocation6 + $0xc28] ss:$16 sps:$4 sm:$0xff]   ;;  %v12100_v6 = vld [vmem:[#allocation6 + $0xd0c] ss:$16 sps:$4 sm:$0xff]  }
 0x26a   : > { %4113 = vmatprep.subr.bf16.mxu1 %v12031_v1  ;;  %v12097_v1 = vld [vmem:[#allocation6 + $0xc0c] ss:$16 sps:$4 sm:$0xff]  }
 0x26c   : > { %4149 = vmatpush1.bf16.msra.mxu0 %v12032_v8  ;;  %v12098_v8 = vld [vmem:[#allocation6 + $0xd08] ss:$16 sps:$4 sm:$0xff]  }
 0x26d   : > { %4114 = vmatpush2.bf16.msra.mxu1 %v12029_v7  ;;  %4150 = vmatprep.subr.bf16.mxu0 %v12040_v12  ;;  %v12095_v7 = vld [vmem:[#allocation6 + $0xc08] ss:$16 sps:$4 sm:$0xff]  }
 0x26e   : > { %4115 = vmatprep.subr.bf16.mxu1 %v12037_v9  ;;  %v12103_v9 = vld [vmem:[#allocation9 + $0x4e4] ss:$16 sps:$4 sm:$0xff]  }
 0x26f   : > { %v12106_v12 = vld [vmem:[#allocation9 + $0x4c4] ss:$16 sps:$4 sm:$0xff]  }
 0x270   : > { %4151 = vmatpush1.bf16.msra.mxu0 %v12038_v14  ;;  %v12107_v14 = vld [vmem:[#allocation9 + $0x4a0] ss:$16 sps:$4 sm:$0xff]  }
 0x271   : > { %4116 = vmatpush2.bf16.msra.mxu1 %v12035_v54  ;;  %4152 = vmatprep.subr.bf16.mxu0 %v12046_v19  ;;  %v12104_v54 = vld [vmem:[#allocation9 + $0x4c0] ss:$16 sps:$4 sm:$0xff]  }
 0x272   : > { %4117 = vmatprep.subr.bf16.mxu1 %v12043_v16  ;;  %v12112_v16 = vld [vmem:[#allocation9 + $0x484] ss:$16 sps:$4 sm:$0xff]   ;;  %v12110_v19 = vld [vmem:[#allocation9 + $0x480] ss:$16 sps:$4 sm:$0xff]  }
 0x274   : > { %4153 = vmatpush1.bf16.msra.mxu0 %v12044_v23  ;;  %v12115_v23 = vld [vmem:[#allocation9 + $0x464] ss:$16 sps:$4 sm:$0xff]  }
 0x275   : > { %4118 = vmatpush2.bf16.msra.mxu1 %v12041_v20  ;;  %4154 = vmatprep.subr.bf16.mxu0 %v12052_v27  ;;  %v4236_v20 = vlaneseq  ;;  %v13513_v27 = vmov 0.0  }
 0x276   : > { %4119 = vmatprep.subr.bf16.mxu1 %v12049_v26  ;;  %v12113_v26 = vld [vmem:[#allocation9 + $0x460] ss:$16 sps:$4 sm:$0xff]  }
 0x277   : > { %vm4274_vm3 = vcmp.lt.s32.totalorder %v4236_v20, 512 }
 0x278   : > { %4155 = vmatpush1.bf16.msra.mxu0 %v12050_v30  ;;  %4276 = vst.msk [vmem:[#allocation2] ss:$8 sm:$0xf] %vm4274_vm3, %v13513_v27  ;;  %4279 = vst.msk [vmem:[#allocation2 + $0x41] ss:$8 sm:$0xf] %vm4274_vm3, %v13513_v27 }
 0x279   : > { %4120 = vmatpush2.bf16.msra.mxu1 %v12047_v28  ;;  %4156 = vmatprep.subr.bf16.mxu0 %v12058_v17  ;;  %v12121_v30 = vld [vmem:[#allocation9 + $0x424] ss:$16 sps:$4 sm:$0xff]  }
 0x27a   : > { %4121 = vmatprep.subr.bf16.mxu1 %v12055_v21  ;;  %v12119_v21 = vld [vmem:[#allocation9 + $0x420] ss:$16 sps:$4 sm:$0xff]  }
 0x27b   : > { %v14050_v17 = vpop.f32.mrf.mxu0 }
 0x27c   : > { %4157 = vmatpush2.bf16.msra.mxu0 %v12056_v58  ;;  %v14048_v28 = vpop.f32.mrf.mxu1 }
 0x27d   : > { %4122 = vmatpush2.bf16.msra.mxu1 %v12053_v25  ;;  %4158 = vmatprep.subr.bf16.mxu0 %v12064_v33  ;;  %v12124_v25 = vld [vmem:[#allocation9 + $0x404] ss:$16 sps:$4 sm:$0xff]   ;;  %v14054_v33 = vpop.f32.mrf.mxu0 }
 0x27e   : > { %4123 = vmatprep.subr.bf16.mxu1 %v12061_v59  ;;  %v14052_v58 = vpop.f32.mrf.mxu1  ;;  %v12122_v59 = vld [vmem:[#allocation9 + $0x400] ss:$16 sps:$4 sm:$0xff]  }
 0x280   : > { %4159 = vmatpush2.bf16.msra.mxu0 %v12062_v52  ;;  %v14056_v52 = vpop.f32.mrf.mxu1 }
 0x281   : > { %4124 = vmatpush2.bf16.msra.mxu1 %v12059_v34  ;;  %4160 = vmatprep.subr.bf16.mxu0 %v12070_v37  ;;  %v12127_v34 = vld [vmem:[#allocation9 + $0x5e4] ss:$16 sps:$4 sm:$0xff]   ;;  %v14058_v37 = vpop.f32.mrf.mxu0 }
 0x282   : > { %4125 = vmatprep.subr.bf16.mxu1 %v12067_v36  ;;  %v12125_v36 = vld [vmem:[#allocation9 + $0x5e0] ss:$16 sps:$4 sm:$0xff]  }
 0x284   : > { %4161 = vmatpush2.bf16.msra.mxu0 %v12068_v39  ;;  %v12130_v39 = vld [vmem:[#allocation9 + $0x5c4] ss:$16 sps:$4 sm:$0xff]  }
 0x285   : > { %4126 = vmatpush2.bf16.msra.mxu1 %v12065_v38  ;;  %4162 = vmatprep.subr.bf16.mxu0 %v12076_v29  ;;  %v14060_v38 = vpop.f32.mrf.mxu1  ;;  %v14062_v29 = vpop.f32.mrf.mxu0 }
 0x286   : > { %4127 = vmatprep.subr.bf16.mxu1 %v12073_v40  ;;  %v12128_v40 = vld [vmem:[#allocation9 + $0x5c0] ss:$16 sps:$4 sm:$0xff]  }
 0x288   : > { %4163 = vmatpush2.bf16.msra.mxu0 %v12074_v53 }
 0x289   : > { %4128 = vmatpush2.bf16.msra.mxu1 %v12071_v41  ;;  %4164 = vmatprep.subr.bf16.mxu0 %v12079_v42  ;;  %v12154_v42 = vld [vmem:[#allocation9 + $0x6e4] ss:$16 sps:$4 sm:$0xff]  }
 0x28a   : > { %4191 = vmatprep.subr.bf16.mxu1 %v12082_v43 }
 0x28b   : > { %v14065_v43 = vpop.f32.mrf.mxu0 }
 0x28c   : > { %4130 = vmatmul.mubr.bf16.vlgmr.msra.gmra.mxu1 %v14023_v13  ;;  %4165 = vmatpush2.bf16.msra.mxu0 %v12077_v55  ;;  %v12101_v13 = vld [vmem:[#allocation9 + $0x4e0] ss:$16 sps:$4 sm:$0xff]  }
 0x28d   : > { %4192 = vmatpush1.bf16.msra.mxu1 %v12080_v22  ;;  %4166 = vmatprep.subr.bf16.mxu0 %v12085_v57  ;;  %v12133_v22 = vld [vmem:[#allocation9 + $0x5a4] ss:$16 sps:$4 sm:$0xff]   ;;  %v12152_v57 = vld [vmem:[#allocation9 + $0x6e0] ss:$16 sps:$4 sm:$0xff]  }
 0x28e   : > { %4193 = vmatprep.subr.bf16.mxu1 %v12088_v0  ;;  %4215 = vmatprep.mubr.bf16.mxu1 %v13512_v5  ;;  %v12109_v5 = vld [vmem:[#allocation9 + $0x4a4] ss:$16 sps:$4 sm:$0xff]  }
 0x290   : > { %4167 = vmatpush2.bf16.msra.mxu0 %v12083_v46  ;;  %v12131_v46 = vld [vmem:[#allocation9 + $0x5a0] ss:$16 sps:$4 sm:$0xff]  }
 0x291   : > { %4194 = vmatpush1.bf16.msra.mxu1 %v12086_v49  ;;  %4168 = vmatprep.subr.bf16.mxu0 %v12091_v50 }
 0x292   : > { %4195 = vmatprep.subr.bf16.mxu1 %v12094_v51  ;;  %v12160_v51 = vld [vmem:[#allocation9 + $0x6c4] ss:$16 sps:$4 sm:$0xff]  }
 0x294   : > { %4169 = vmatpush2.bf16.msra.mxu0 %v12089_v56  ;;  %v14069_v56 = vpop.f32.mrf.mxu0 }
 0x295   : > { %4196 = vmatpush1.bf16.msra.mxu1 %v12092_v63  ;;  %4170 = vmatprep.subr.bf16.mxu0 %v12097_v1  ;;  %v12136_v63 = vld [vmem:[#allocation9 + $0x584] ss:$16 sps:$4 sm:$0xff]   ;;  %v12158_v1 = vld [vmem:[#allocation9 + $0x6c0] ss:$16 sps:$4 sm:$0xff]  }
 0x296   : > { %4197 = vmatprep.subr.bf16.mxu1 %v12100_v6 }
 0x298   : > { %4171 = vmatpush2.bf16.msra.mxu0 %v12095_v7  ;;  %v12134_v7 = vld [vmem:[#allocation9 + $0x580] ss:$16 sps:$4 sm:$0xff]  }
 0x299   : > { %4198 = vmatpush1.bf16.msra.mxu1 %v12098_v8  ;;  %5295 = vmatprep.subr.bf16.mxu0 %v12103_v9  ;;  %v14072_v8 = vpop.f32.mrf.mxu0  ;;  %v12139_v9 = vld [vmem:[#allocation9 + $0x564] ss:$16 sps:$4 sm:$0xff]  }
 0x29a   : > { %5338 = vmatprep.subr.bf16.mxu1 %v12154_v42  ;;  %v12184_v42 = vld [vmem:[#allocation9 + $0x644] ss:$16 sps:$4 sm:$0xff]  }
 0x29b   : > { %4173 = vmatmul.mubr.bf16.vlgmr.msra.gmra.mxu0 %v14026_v31  ;;  %v12118_v31 = vld [vmem:[#allocation9 + $0x444] ss:$16 sps:$4 sm:$0xff]  }
 0x29c   : > { %10529 = vmatmul.mubr.msk.bf16.vlgmr.msra.gmra.mxu1 %vm1828_vm1, %v14035_v44  ;;  %5296 = vmatpush1.bf16.msra.mxu0 %v12101_v13  ;;  %v12116_v44 = vld [vmem:[#allocation9 + $0x440] ss:$16 sps:$4 sm:$0xff]  }
 0x29d   : > { %5297 = vmatprep.subr.bf16.mxu0 %v12106_v12  ;;  %5339 = vmatpush1.bf16.msra.mxu1 %v12152_v57  ;;  %v12137_v13 = vld [vmem:[#allocation9 + $0x560] ss:$16 sps:$4 sm:$0xff]   ;;  %v12142_v12 = vld [vmem:[#allocation9 + $0x544] ss:$16 sps:$4 sm:$0xff]  }
 0x29e   : > { %5340 = vmatprep.subr.bf16.mxu1 %v12160_v51 }
 0x2a0   : > { %5298 = vmatpush1.bf16.msra.mxu0 %v12104_v54  ;;  %v12172_v54 = vld [vmem:[#allocation9 + $0x684] ss:$16 sps:$4 sm:$0xff]  }
 0x2a1   : > { %5299 = vmatprep.subr.bf16.mxu0 %v12109_v5  ;;  %5341 = vmatpush1.bf16.msra.mxu1 %v12158_v1  ;;  %v14074_v5 = vpop.f32.mrf.mxu0  ;;  %v12196_v1 = vld [vmem:[#allocation9 + $0x604] ss:$16 sps:$4 sm:$0xff]  }
 0x2a4   : > { %5300 = vmatpush1.bf16.msra.mxu0 %v12107_v14  ;;  %v12140_v14 = vld [vmem:[#allocation9 + $0x540] ss:$16 sps:$4 sm:$0xff]  }
 0x2a5   : > { %5301 = vmatprep.subr.bf16.mxu0 %v12112_v16 }
 0x2a8   : > { %5302 = vmatpush1.bf16.msra.mxu0 %v12110_v19 }
 0x2a9   : > { %5303 = vmatprep.subr.bf16.mxu0 %v12115_v23  ;;  %v12145_v23 = vld [vmem:[#allocation9 + $0x524] ss:$16 sps:$4 sm:$0xff]  }
 0x2ac   : > { %5304 = vmatpush1.bf16.msra.mxu0 %v12113_v26 }
 0x2ad   : > { %5305 = vmatprep.subr.bf16.mxu0 %v12118_v31  ;;  %v12178_v31 = vld [vmem:[#allocation9 + $0x664] ss:$16 sps:$4 sm:$0xff]  }
 0x2b0   : > { %5306 = vmatpush1.bf16.msra.mxu0 %v12116_v44 }
 0x2b1   : > { %5307 = vmatprep.subr.bf16.mxu0 %v12121_v30 }
 0x2b4   : > { %5308 = vmatpush1.bf16.msra.mxu0 %v12119_v21  ;;  %v12176_v21 = vld [vmem:[#allocation9 + $0x660] ss:$16 sps:$4 sm:$0xff]  }
 0x2b5   : > { %5309 = vmatprep.subr.bf16.mxu0 %v12124_v25 }
 0x2b8   : > { %5310 = vmatpush1.bf16.msra.mxu0 %v12122_v59 }
 0x2b9   : > { %5311 = vmatprep.subr.bf16.mxu0 %v12127_v34 }
 0x2bc   : > { %v2975_v41 = vpop.f32.mrf.mxu1  ;;  %5312 = vmatpush2.bf16.msra.mxu0 %v12125_v36 }
 0x2bd   : > { %v2976_v53 = vadd.f32 %v2975_v41, %v14010_v45  ;;  %5313 = vmatprep.subr.bf16.mxu0 %v12130_v39  ;;  %v12143_v39 = vld [vmem:[#allocation9 + $0x520] ss:$16 sps:$4 sm:$0xff]  }
 0x2be   : > { %v2977_v55 = vpop.f32.mrf.mxu1 }
 0x2bf   : > { %v2978_v0 = vadd.f32 %v2977_v55, %v14012_v62  ;;  %v12166_v62 = vld [vmem:[#allocation9 + $0x6a4] ss:$16 sps:$4 sm:$0xff]  }
 0x2c0   : > { %v2979_v49 = vpop.f32.mrf.mxu1  ;;  %5314 = vmatpush2.bf16.msra.mxu0 %v12128_v40  ;;  %5342 = vmatprep.subr.bf16.mxu1 %v12166_v62  ;;  %v12148_v55 = vld [vmem:[#allocation9 + $0x504] ss:$16 sps:$4 sm:$0xff]   ;;  %v12200_v62 = vld [vmem:[#allocation9 + $0x7e0] ss:$16 sps:$4 sm:$0xff]  }
 0x2c1   : > { %v2980_v50 = vadd.f32 %v2979_v49, %v14014_v2  ;;  %5315 = vmatprep.subr.bf16.mxu0 %v12133_v22  ;;  %v12164_v2 = vld [vmem:[#allocation9 + $0x6a0] ss:$16 sps:$4 sm:$0xff]  }
 0x2c2   : > { %v2981_v45 = vpop.f32.mrf.mxu1  ;;  %5343 = vmatpush1.bf16.msra.mxu1 %v12164_v2  ;;  %v12182_v22 = vld [vmem:[#allocation9 + $0x640] ss:$16 sps:$4 sm:$0xff]  }
 0x2c3   : > { %v2982_v6 = vadd.f32 %v2981_v45, %v14017_v18  ;;  %v12170_v18 = vld [vmem:[#allocation9 + $0x680] ss:$16 sps:$4 sm:$0xff]   ;;  %5344 = vmatprep.subr.bf16.mxu1 %v12172_v54  ;;  %v12190_v45 = vld [vmem:[#allocation9 + $0x624] ss:$16 sps:$4 sm:$0xff]  }
 0x2c4   : > { %5316 = vmatpush2.bf16.msra.mxu0 %v12131_v46  ;;  %v12146_v49 = vld [vmem:[#allocation9 + $0x500] ss:$16 sps:$4 sm:$0xff]   ;;  %v12220_v54 = vld [vmem:[#allocation9 + $0x784] ss:$16 sps:$4 sm:$0xff]  }
 0x2c5   : > { %5317 = vmatprep.subr.bf16.mxu0 %v12136_v63  ;;  %v12151_v63 = vld [vmem:[#allocation9 + $0x4ec] ss:$16 sps:$4 sm:$0xff]   ;;  %v12206_v2 = vld [vmem:[#allocation9 + $0x7c0] ss:$16 sps:$4 sm:$0xff]  }
 0x2c6   : > { %5345 = vmatpush1.bf16.msra.mxu1 %v12170_v18  ;;  %v12218_v18 = vld [vmem:[#allocation9 + $0x780] ss:$16 sps:$4 sm:$0xff]  }
 0x2c7   : > { %5346 = vmatprep.subr.bf16.mxu1 %v12178_v31  ;;  %v12236_v31 = vld [vmem:[#allocation9 + $0x720] ss:$16 sps:$4 sm:$0xff]  }
 0x2c8   : > { %5318 = vmatpush2.bf16.msra.mxu0 %v12134_v7  ;;  %v12194_v7 = vld [vmem:[#allocation9 + $0x600] ss:$16 sps:$4 sm:$0xff]  }
 0x2c9   : > { %5319 = vmatprep.subr.bf16.mxu0 %v12139_v9  ;;  %v12208_v9 = vld [vmem:[#allocation9 + $0x7c4] ss:$16 sps:$4 sm:$0xff]  }
 0x2ca   : > { %5347 = vmatpush1.bf16.msra.mxu1 %v12176_v21  ;;  %v12250_v21 = vld [vmem:[#allocation9 + $0x6ec] ss:$16 sps:$4 sm:$0xff]  }
 0x2cb   : > { %v3018_v16 = vpop.f32.mrf.mxu0  ;;  %5348 = vmatprep.subr.bf16.mxu1 %v12184_v42 }
 0x2cc   : > { %v3061_v19 = vpop.f32.mrf.mxu1  ;;  %v3019_v26 = vadd.f32 %v3018_v16, %v2976_v53  ;;  %5320 = vmatpush2.bf16.msra.mxu0 %v12137_v13  ;;  %v12214_v13 = vld [vmem:[#allocation9 + $0x7a4] ss:$16 sps:$4 sm:$0xff]   ;;  %v12224_v16 = vld [vmem:[#allocation9 + $0x760] ss:$16 sps:$4 sm:$0xff]  }
 0x2cd   : > { %v3020_v44 = vpop.f32.mrf.mxu0  ;;  %5321 = vmatprep.subr.bf16.mxu0 %v12142_v12  ;;  %v12212_v12 = vld [vmem:[#allocation9 + $0x7a0] ss:$16 sps:$4 sm:$0xff]  }
 0x2ce   : > { %v3063_v30 = vpop.f32.mrf.mxu1  ;;  %v14076_v25 = vadd.f32 %v3061_v19, %v3019_v26  ;;  %v3021_v59 = vadd.f32 %v3020_v44, %v2978_v0  ;;  %5349 = vmatpush1.bf16.msra.mxu1 %v12182_v22  ;;  %v12232_v19 = vld [vmem:[#allocation9 + $0x744] ss:$16 sps:$4 sm:$0xff]  }
 0x2cf   : > { %v3022_v34 = vpop.f32.mrf.mxu0  ;;  %5350 = vmatprep.subr.bf16.mxu1 %v12190_v45  ;;  %v12238_v26 = vld [vmem:[#allocation9 + $0x724] ss:$16 sps:$4 sm:$0xff]  }
 0x2d0   : > { %v3065_v36 = vpop.f32.mrf.mxu1  ;;  %v14078_v40 = vadd.f32 %v3063_v30, %v3021_v59  ;;  %v3023_v41 = vadd.f32 %v3022_v34, %v2980_v50  ;;  %5322 = vmatpush2.bf16.msra.mxu0 %v12140_v14  ;;  %v12188_v50 = vld [vmem:[#allocation9 + $0x620] ss:$16 sps:$4 sm:$0xff]   ;;  %v12226_v14 = vld [vmem:[#allocation9 + $0x764] ss:$16 sps:$4 sm:$0xff]  }
 0x2d1   : > { %v3024_v53 = vpop.f32.mrf.mxu0  ;;  %5323 = vmatprep.subr.bf16.mxu0 %v12145_v23  ;;  %v12230_v23 = vld [vmem:[#allocation9 + $0x740] ss:$16 sps:$4 sm:$0xff]   ;;  %v12244_v44 = vld [vmem:[#allocation9 + $0x704] ss:$16 sps:$4 sm:$0xff]  }
 0x2d2   : > { %v14080_v57 = vadd.f32 %v3065_v36, %v3023_v41  ;;  %v3025_v46 = vadd.f32 %v3024_v53, %v2982_v6  ;;  %v3067_v0 = vpop.f32.mrf.mxu1  ;;  %5351 = vmatpush1.bf16.msra.mxu1 %v12188_v50  ;;  %v12202_v6 = vld [vmem:[#allocation9 + $0x7e4] ss:$16 sps:$4 sm:$0xff]   ;;  %v12242_v30 = vld [vmem:[#allocation9 + $0x700] ss:$16 sps:$4 sm:$0xff]   ;;  %v1912_v41 = vadd.f32 %v13992_v61, %v13990_v60  ;;  %v14090_v53 = vshrl.u32 %v4236_v20, 7 }
 0x2d3   : > { %5352 = vmatprep.subr.bf16.mxu1 %v12196_v1  ;;  %v14105_v20 = vld [vmem:[#allocation8] sm:$0xf] }
 0x2d4   : > { %v14082_v51 = vadd.f32 %v3067_v0, %v3025_v46  ;;  %5324 = vmatpush2.bf16.msra.mxu0 %v12143_v39  ;;  %v1910_v39 = vadd.f32 %v13988_v48, %v13986_v47  ;;  %v1955_v22 = vadd.f32 %v14004_v24, %v1912_v41  ;;  %v1916_v47 = vadd.f32 %v14000_v11, %v13998_v10 }
 0x2d5   : > { %5325 = vmatprep.subr.bf16.mxu0 %v12148_v55  ;;  %v1914_v55 = vadd.f32 %v13996_v4, %v13994_v3  ;;  %v14101_v61 = vsub.s32 0, %v14090_v53  ;;  %v14109_v10 = vsub.s32 1, %v14090_v53 }
 0x2d6   : > { %5353 = vmatpush1.bf16.msra.mxu1 %v12194_v7  ;;  %v1953_v42 = vadd.f32 %v14002_v15, %v1910_v39  ;;  %v2849_v60 = vadd.f32 %v14054_v33, %v1955_v22  ;;  %v1959_v15 = vadd.f32 %v14008_v35, %v1916_v47 }
 0x2d7   : > { %5354 = vmatprep.subr.bf16.mxu1 %v12202_v6  ;;  %v1957_v48 = vadd.f32 %v14006_v32, %v1914_v55 }
 0x2d8   : > { %5326 = vmatpush2.bf16.msra.mxu0 %v12146_v49  ;;  %v2847_v0 = vadd.f32 %v14050_v17, %v1953_v42  ;;  %v2892_v11 = vadd.f32 %v14052_v58, %v2849_v60  ;;  %v2853_v32 = vadd.f32 %v14062_v29, %v1959_v15  ;;  %v4243_v58 = vrot.slane %v14105_v20, %v14109_v10 }
 0x2d9   : > { %5381 = vmatprep.subr.bf16.mxu0 %v12151_v63  ;;  %v2851_v3 = vadd.f32 %v14058_v37, %v1957_v48  ;;  %v4239_v37 = vrot.slane %v14105_v20, %v14101_v61 }
 0x2da   : > { %5355 = vmatpush2.bf16.msra.mxu1 %v12200_v62  ;;  %v2890_v17 = vadd.f32 %v14048_v28, %v2847_v0  ;;  %v2935_v28 = vadd.f32 %v14069_v56, %v2892_v11  ;;  %v2896_v29 = vadd.f32 %v14060_v38, %v2853_v32 }
 0x2db   : > { %5356 = vmatprep.subr.bf16.mxu1 %v12208_v9  ;;  %v2894_v1 = vadd.f32 %v14056_v52, %v2851_v3 }
 0x2dc   : > { %v2933_v63 = vadd.f32 %v14065_v43, %v2890_v17  ;;  %v2939_v52 = vadd.f32 %v14074_v5, %v2896_v29  ;;  %v12173_v29 = vld [vmem:[#allocation9 + $0x468] ss:$16 sps:$4 sm:$0xff]  }
 0x2dd   : > { %v2937_v43 = vadd.f32 %v14072_v8, %v2894_v1  ;;  %v12157_v1 = vld [vmem:[#allocation9 + $0x4cc] ss:$16 sps:$4 sm:$0xff]  }
 0x2de   : > { %5357 = vmatpush2.bf16.msra.mxu1 %v12206_v2 }
 0x2df   : > { %5358 = vmatprep.subr.bf16.mxu1 %v12214_v13 }
 0x2e2   : > { %5359 = vmatpush2.bf16.msra.mxu1 %v12212_v12 }
 0x2e3   : > { %5360 = vmatprep.subr.bf16.mxu1 %v12220_v54 }
 0x2e6   : > { %5361 = vmatpush2.bf16.msra.mxu1 %v12218_v18 }
 0x2e7   : > { %5362 = vmatprep.subr.bf16.mxu1 %v12226_v14 }
 0x2ea   : > { %5363 = vmatpush2.bf16.msra.mxu1 %v12224_v16 }
 0x2eb   : > { %5364 = vmatprep.subr.bf16.mxu1 %v12232_v19 }
 0x2ee   : > { %5365 = vmatpush2.bf16.msra.mxu1 %v12230_v23 }
 0x2ef   : > { %5366 = vmatprep.subr.bf16.mxu1 %v12238_v26 }
 0x2f2   : > { %5367 = vmatpush2.bf16.msra.mxu1 %v12236_v31 }
 0x2f3   : > { %5368 = vmatprep.subr.bf16.mxu1 %v12244_v44 }
 0x2f6   : > { %5369 = vmatpush2.bf16.msra.mxu1 %v12242_v30 }
 0x2f7   : > { %5424 = vmatprep.subr.bf16.mxu1 %v12250_v21 }
 0x30b   : > { %v4002_v59 = vpop.f32.mrf.mxu0 }
 0x30c   : > { %v4045_v34 = vpop.f32.mrf.mxu1 }
 0x30d   : > { %v4004_v36 = vpop.f32.mrf.mxu0  ;;  %v4046_v45 = vadd.f32 %v4045_v34, %v4002_v59 }
 0x30e   : > { %v4047_v46 = vpop.f32.mrf.mxu1 }
 0x30f   : > { %v4006_v49 = vpop.f32.mrf.mxu0  ;;  %v4048_v35 = vadd.f32 %v4047_v46, %v4004_v36 }
 0x310   : > { %v4049_v4 = vpop.f32.mrf.mxu1 }
 0x311   : > { %v4008_v24 = vpop.f32.mrf.mxu0  ;;  %v4050_v62 = vadd.f32 %v4049_v4, %v4006_v49 }
 0x312   : > { %v4051_v7 = vpop.f32.mrf.mxu1 }
 0x313   : > { %v4052_v12 = vadd.f32 %v4051_v7, %v4008_v24  ;;  %v12155_v7 = vld [vmem:[#allocation9 + $0x4c8] ss:$16 sps:$4 sm:$0xff]  }
 0x31b   : > { %v4088_v33 = vpop.f32.mrf.mxu0 }
 0x31c   : > { %v4089_v50 = vadd.f32 %v4088_v33, %v4046_v45 }
 0x31d   : > { %v4090_v6 = vpop.f32.mrf.mxu0 }
 0x31e   : > { %v4226_v9 = vadd.f32 %v4089_v50, %v2933_v63  ;;  %v4091_v2 = vadd.f32 %v4090_v6, %v4048_v35  ;;  %v12149_v35 = vld [vmem:[#allocation9 + $0x4e8] ss:$16 sps:$4 sm:$0xff]   ;;  %v12163_v6 = vld [vmem:[#allocation9 + $0x4ac] ss:$16 sps:$4 sm:$0xff]  }
 0x31f   : > { %v4092_v13 = vpop.f32.mrf.mxu0 }
 0x320   : > { %v4256_v54 = vadd.f32 %v4239_v37, %v4226_v9  ;;  %v4227_v18 = vadd.f32 %v4091_v2, %v2935_v28  ;;  %v4093_v14 = vadd.f32 %v4092_v13, %v4050_v62  ;;  %v12161_v62 = vld [vmem:[#allocation9 + $0x4a8] ss:$16 sps:$4 sm:$0xff]   ;;  %v12169_v9 = vld [vmem:[#allocation9 + $0x48c] ss:$16 sps:$4 sm:$0xff]  }
 0x321   : > { %v4094_v56 = vpop.f32.mrf.mxu0  ;;  %v12167_v2 = vld [vmem:[#allocation9 + $0x488] ss:$16 sps:$4 sm:$0xff]  }
 0x322   : > { %v4264_v16 = vmax.f32 %v4256_v54, 0.0  ;;  %v4257_v19 = vadd.f32 %v4243_v58, %v4227_v18  ;;  %v4230_v23 = vadd.f32 %v4093_v14, %v2937_v43  ;;  %v4095_v26 = vadd.f32 %v4094_v56, %v4052_v12  ;;  %v12181_v43 = vld [vmem:[#allocation9 + $0x44c] ss:$16 sps:$4 sm:$0xff]   ;;  %v12179_v12 = vld [vmem:[#allocation9 + $0x448] ss:$16 sps:$4 sm:$0xff]  }
 0x323   : > { %v12187_v54 = vld [vmem:[#allocation9 + $0x42c] ss:$16 sps:$4 sm:$0xff]   ;;  %v12185_v14 = vld [vmem:[#allocation9 + $0x428] ss:$16 sps:$4 sm:$0xff]  }
 0x324   : > { %v4290_v31 = vrot.slane %v4264_v16, 7  ;;  %v4265_v44 = vmax.f32 %v4257_v19, 0.0  ;;  %v4260_v30 = vadd.f32 %v4239_v37, %v4230_v23  ;;  %v4231_v21 = vadd.f32 %v4095_v26, %v2939_v52  ;;  %v12193_v52 = vld [vmem:[#allocation9 + $0x40c] ss:$16 sps:$4 sm:$0xff]   ;;  %v12191_v16 = vld [vmem:[#allocation9 + $0x408] ss:$16 sps:$4 sm:$0xff]  }
 0x325   : > { %v12199_v19 = vld [vmem:[#allocation9 + $0x5ec] ss:$16 sps:$4 sm:$0xff]   ;;  %v12197_v26 = vld [vmem:[#allocation9 + $0x5e8] ss:$16 sps:$4 sm:$0xff]  }
 0x326   : > { %4314 = vst [vmem:[#allocation2] sm:$0xfe] %v4290_v31  ;;  %v4291_v38 = vrot.slane %v4265_v44, 7  ;;  %v4268_v59 = vmax.f32 %v4260_v30, 0.0  ;;  %v4261_v8 = vadd.f32 %v4243_v58, %v4231_v21  ;;  %v12175_v58 = vld [vmem:[#allocation9 + $0x46c] ss:$16 sps:$4 sm:$0xff]  }
 0x327   : > { %v12205_v44 = vld [vmem:[#allocation9 + $0x5cc] ss:$16 sps:$4 sm:$0xff]  }
 0x328   : > { %4315 = vst [vmem:[#allocation2 + $0x8] sm:$0xfe] %v4291_v38  ;;  %v4294_v34 = vrot.slane %v4268_v59, 7  ;;  %v4269_v36 = vmax.f32 %v4261_v8, 0.0  ;;  %v14148_v59 = vsub.s32 3, %v14090_v53 }
 0x32a   : > { %v4295_v39 = vsel %vm4289_vm4, %v4290_v31, %v4294_v34  ;;  %4322 = vst [vmem:[#allocation2 + $0x40] sm:$0x1] %v4294_v34  ;;  %v4296_v5 = vrot.slane %v4269_v36, 7  ;;  %v14145_v31 = vsub.s32 2, %v14090_v53  ;;  %v12203_v36 = vld [vmem:[#allocation9 + $0x5c8] ss:$16 sps:$4 sm:$0xff]   ;;  %v4251_v53 = vrot.slane %v14105_v20, %v14148_v59 }
 0x32c   : > { %v4297_v41 = vsel %vm4289_vm4, %v4291_v38, %v4296_v5  ;;  %4323 = vst [vmem:[#allocation2 + $0x48] sm:$0x1] %v4296_v5  ;;  %v4247_v5 = vrot.slane %v14105_v20, %v14145_v31 }
 0x32d   : > { %v4326_v42 = vld [vmem:[#allocation2] sm:$0xff] }
 0x32e   : > { %v14125_v55 = vpack.c.bf16 %v4295_v39, %v4326_v42  ;;  %v12211_v42 = vld [vmem:[#allocation9 + $0x5ac] ss:$16 sps:$4 sm:$0xff]  }
 0x32f   : > { %v4327_v22 = vld [vmem:[#allocation2 + $0x8] sm:$0xff] }
 0x330   : > { %v14127_v46 = vpack.c.bf16 %v4297_v41, %v4327_v22  ;;  %v4606_v0 = vshll.u32 %v14125_v55, 16  ;;  %v4604_v11 = vshrl.u32 %v14125_v55, 16 }
 0x331   : > { %v4334_v49 = vld [vmem:[#allocation2 + $0x40] sm:$0x3] }
 0x332   : > { %v4618_v47 = vshll.u32 %v14127_v46, 16  ;;  %v14131_v48 = vpack.c.bf16 %v4334_v49, %v4334_v49  ;;  %v4608_v24 = vrot.slane %v4606_v0, 1  ;;  %v4616_v17 = vshrl.u32 %v14127_v46, 16 }
 0x333   : > { %v4335_v60 = vld [vmem:[#allocation2 + $0x48] sm:$0x3] }
 0x334   : > { %v14133_v15 = vpack.c.bf16 %v4335_v60, %v4335_v60  ;;  %v4620_v3 = vrot.slane %v4618_v47, 1  ;;  %v4611_v4 = vshll.u32 %v14131_v48, 16  ;;  %v4609_v50 = vor.u32 %v4608_v24, %v4604_v11 }
 0x336   : > { %v4623_v45 = vshll.u32 %v14133_v15, 16  ;;  %v4613_v32 = vrot.slane %v4611_v4, 1  ;;  %v4621_v33 = vor.u32 %v4620_v3, %v4616_v17  ;;  %v12209_v4 = vld [vmem:[#allocation9 + $0x5a8] ss:$16 sps:$4 sm:$0xff]  }
 0x338   : > { %v4625_v63 = vrot.slane %v4623_v45, 1  ;;  %v14141_v28 = vsel %vm1043_vm0, %v4609_v50, %v4613_v32  ;;  %v12217_v32 = vld [vmem:[#allocation9 + $0x58c] ss:$16 sps:$4 sm:$0xff]  }
 0x33a   : > { %v4626_v37 = vsel %vm1043_vm0, %v4621_v33, %v4625_v63 }
 0x33b   : > { %5327 = vmatprep.mubr.bf16.mxu0 %v4626_v37 }
 0x33c   : > { %5328 = vmatmul.mubr.bf16.vlgmr.msra.gmra.mxu0 %v14141_v28 }
 0x33d   : > { %5382 = vmatpush1.bf16.msra.mxu0 %v12149_v35  ;;  %5413 = vmatprep.mubr.bf16.mxu0 %v4626_v37  ;;  %v12215_v37 = vld [vmem:[#allocation9 + $0x588] ss:$16 sps:$4 sm:$0xff]  }
 0x33e   : > { %5383 = vmatprep.subr.bf16.mxu0 %v12157_v1 }
 0x341   : > { %5384 = vmatpush1.bf16.msra.mxu0 %v12155_v7 }
 0x342   : > { %5385 = vmatprep.subr.bf16.mxu0 %v12163_v6 }
 0x345   : > { %5386 = vmatpush1.bf16.msra.mxu0 %v12161_v62  ;;  %v12223_v62 = vld [vmem:[#allocation9 + $0x56c] ss:$16 sps:$4 sm:$0xff]  }
 0x346   : > { %5387 = vmatprep.subr.bf16.mxu0 %v12169_v9 }
 0x349   : > { %5388 = vmatpush1.bf16.msra.mxu0 %v12167_v2 }
 0x34a   : > { %5389 = vmatprep.subr.bf16.mxu0 %v12175_v58  ;;  %v12221_v58 = vld [vmem:[#allocation9 + $0x568] ss:$16 sps:$4 sm:$0xff]  }
 0x34c   : > { %v4131_v13 = vpop.f32.mrf.mxu1 }
 0x34d   : > { %5390 = vmatpush1.bf16.msra.mxu0 %v12173_v29 }
 0x34e   : > { %5391 = vmatprep.subr.bf16.mxu0 %v12181_v43  ;;  %v4133_v18 = vpop.f32.mrf.mxu1 }
 0x350   : > { %v4135_v56 = vpop.f32.mrf.mxu1 }
 0x351   : > { %5392 = vmatpush1.bf16.msra.mxu0 %v12179_v12 }
 0x352   : > { %5393 = vmatprep.subr.bf16.mxu0 %v12187_v54  ;;  %v4137_v23 = vpop.f32.mrf.mxu1  ;;  %v12227_v54 = vld [vmem:[#allocation9 + $0x548] ss:$16 sps:$4 sm:$0xff]  }
 0x355   : > { %5394 = vmatpush1.bf16.msra.mxu0 %v12185_v14 }
 0x356   : > { %5395 = vmatprep.subr.bf16.mxu0 %v12193_v52 }
 0x359   : > { %5396 = vmatpush1.bf16.msra.mxu0 %v12191_v16 }
 0x35a   : > { %5397 = vmatprep.subr.bf16.mxu0 %v12199_v19  ;;  %v12241_v19 = vld [vmem:[#allocation9 + $0x50c] ss:$16 sps:$4 sm:$0xff]  }
 0x35b   : > { %v4174_v30 = vpop.f32.mrf.mxu0 }
 0x35c   : > { %v4217_v21 = vpop.f32.mrf.mxu1  ;;  %v4175_v38 = vadd.f32 %v4174_v30, %v4131_v13 }
 0x35d   : > { %v4176_v8 = vpop.f32.mrf.mxu0  ;;  %5398 = vmatpush2.bf16.msra.mxu0 %v12197_v26 }
 0x35e   : > { %v4219_v34 = vpop.f32.mrf.mxu1  ;;  %v4218_v39 = vadd.f32 %v4217_v21, %v4175_v38  ;;  %v4177_v41 = vadd.f32 %v4176_v8, %v4133_v18  ;;  %5399 = vmatprep.subr.bf16.mxu0 %v12205_v44  ;;  %v12235_v18 = vld [vmem:[#allocation9 + $0x52c] ss:$16 sps:$4 sm:$0xff]   ;;  %v12239_v38 = vld [vmem:[#allocation9 + $0x508] ss:$16 sps:$4 sm:$0xff]  }
 0x35f   : > { %v4178_v22 = vpop.f32.mrf.mxu0 }
 0x360   : > { %v4221_v49 = vpop.f32.mrf.mxu1  ;;  %v4228_v0 = vadd.f32 %v4218_v39, %v14076_v25  ;;  %v4220_v47 = vadd.f32 %v4219_v34, %v4177_v41  ;;  %v4179_v60 = vadd.f32 %v4178_v22, %v4135_v56  ;;  %v12233_v56 = vld [vmem:[#allocation9 + $0x528] ss:$16 sps:$4 sm:$0xff]   ;;  %v12247_v34 = vld [vmem:[#allocation9 + $0xe4] ss:$16 sps:$4 sm:$0xff]  }
 0x361   : > { %v4180_v3 = vpop.f32.mrf.mxu0  ;;  %5400 = vmatpush2.bf16.msra.mxu0 %v12203_v36 }
 0x362   : > { %v4258_v24 = vadd.f32 %v4247_v5, %v4228_v0  ;;  %v4229_v17 = vadd.f32 %v4220_v47, %v14078_v40  ;;  %v4222_v45 = vadd.f32 %v4221_v49, %v4179_v60  ;;  %v4181_v11 = vadd.f32 %v4180_v3, %v4137_v23  ;;  %5401 = vmatprep.subr.bf16.mxu0 %v12211_v42  ;;  %v4223_v33 = vpop.f32.mrf.mxu1  ;;  %v12245_v49 = vld [vmem:[#allocation9 + $0xe0] ss:$16 sps:$4 sm:$0xff]   ;;  %v12253_v3 = vld [vmem:[#allocation9 + $0xc4] ss:$16 sps:$4 sm:$0xff]  }
 0x364   : > { %v4266_v63 = vmax.f32 %v4258_v24, 0.0  ;;  %v4259_v35 = vadd.f32 %v4251_v53, %v4229_v17  ;;  %v4232_v25 = vadd.f32 %v4222_v45, %v14080_v57  ;;  %v4224_v50 = vadd.f32 %v4223_v33, %v4181_v11  ;;  %v12229_v57 = vld [vmem:[#allocation9 + $0x54c] ss:$16 sps:$4 sm:$0xff]   ;;  %v12248_v24 = vld [vmem:[#allocation9 + $0x6e8] ss:$16 sps:$4 sm:$0xff]  }
 0x365   : > { %5402 = vmatpush2.bf16.msra.mxu0 %v12209_v4  ;;  %v12251_v45 = vld [vmem:[#allocation9 + $0xc0] ss:$16 sps:$4 sm:$0xff]   ;;  %v12256_v11 = vld [vmem:[#allocation9 + $0x6cc] ss:$16 sps:$4 sm:$0xff]   ;;  %v12259_v33 = vld [vmem:[#allocation9 + $0xa4] ss:$16 sps:$4 sm:$0xff]  }
 0x366   : > { %v4292_v20 = vrot.slane %v4266_v63, 7  ;;  %v4267_v1 = vmax.f32 %v4259_v35, 0.0  ;;  %v4262_v7 = vadd.f32 %v4247_v5, %v4232_v25  ;;  %v4233_v6 = vadd.f32 %v4224_v50, %v14082_v51  ;;  %5403 = vmatprep.subr.bf16.mxu0 %v12217_v32  ;;  %v12257_v63 = vld [vmem:[#allocation9 + $0xa0] ss:$16 sps:$4 sm:$0xff]   ;;  %v12262_v35 = vld [vmem:[#allocation9 + $0x6ac] ss:$16 sps:$4 sm:$0xff]  }
 0x367   : > { %v12265_v25 = vld [vmem:[#allocation9 + $0x84] ss:$16 sps:$4 sm:$0xff]   ;;  %v12260_v50 = vld [vmem:[#allocation9 + $0x6a8] ss:$16 sps:$4 sm:$0xff]  }
 0x368   : > { %4316 = vst [vmem:[#allocation2 + $0x10] sm:$0xfe] %v4292_v20  ;;  %v4293_v40 = vrot.slane %v4267_v1, 7  ;;  %v4270_v9 = vmax.f32 %v4262_v7, 0.0  ;;  %v4263_v2 = vadd.f32 %v4251_v53, %v4233_v6  ;;  %v12271_v1 = vld [vmem:[#allocation9 + $0x64] ss:$16 sps:$4 sm:$0xff]  }
 0x369   : > { %5404 = vmatpush2.bf16.msra.mxu0 %v12215_v37  ;;  %v12263_v37 = vld [vmem:[#allocation9 + $0x80] ss:$16 sps:$4 sm:$0xff]   ;;  %v12266_v7 = vld [vmem:[#allocation9 + $0x688] ss:$16 sps:$4 sm:$0xff]  }
 0x36a   : > { %4317 = vst [vmem:[#allocation2 + $0x18] sm:$0xfe] %v4293_v40  ;;  %v4298_v29 = vrot.slane %v4270_v9, 7  ;;  %v4271_v43 = vmax.f32 %v4263_v2, 0.0  ;;  %5405 = vmatprep.subr.bf16.mxu0 %v12223_v62  ;;  %v12269_v6 = vld [vmem:[#allocation9 + $0x60] ss:$16 sps:$4 sm:$0xff]  }
 0x36b   : > { %v12274_v62 = vld [vmem:[#allocation9 + $0x66c] ss:$16 sps:$4 sm:$0xff]   ;;  %v12272_v9 = vld [vmem:[#allocation9 + $0x668] ss:$16 sps:$4 sm:$0xff]   ;;  %v12275_v2 = vld [vmem:[#allocation9 + $0x40] ss:$16 sps:$4 sm:$0xff]  }
 0x36c   : > { %v4299_v13 = vsel %vm4289_vm4, %v4292_v20, %v4298_v29  ;;  %4324 = vst [vmem:[#allocation2 + $0x50] sm:$0x1] %v4298_v29  ;;  %v4300_v12 = vrot.slane %v4271_v43, 7  ;;  %v12268_v20 = vld [vmem:[#allocation9 + $0x68c] ss:$16 sps:$4 sm:$0xff]  }
 0x36d   : > { %5406 = vmatpush2.bf16.msra.mxu0 %v12221_v58  ;;  %v12280_v58 = vld [vmem:[#allocation9 + $0x64c] ss:$16 sps:$4 sm:$0xff]   ;;  %v12283_v29 = vld [vmem:[#allocation9 + $0x24] ss:$16 sps:$4 sm:$0xff]   ;;  %v12278_v43 = vld [vmem:[#allocation9 + $0x648] ss:$16 sps:$4 sm:$0xff]  }
 0x36e   : > { %v4301_v51 = vsel %vm4289_vm4, %v4293_v40, %v4300_v12  ;;  %4325 = vst [vmem:[#allocation2 + $0x58] sm:$0x1] %v4300_v12  ;;  %5407 = vmatprep.subr.bf16.mxu0 %v12229_v57  ;;  %v12277_v40 = vld [vmem:[#allocation9 + $0x44] ss:$16 sps:$4 sm:$0xff]   ;;  %v12281_v57 = vld [vmem:[#allocation9 + $0x20] ss:$16 sps:$4 sm:$0xff]  }
 0x36f   : > { %v4328_v14 = vld [vmem:[#allocation2 + $0x10] sm:$0xff]  ;;  %v12289_v12 = vld [vmem:[#allocation9 + $0x4] ss:$16 sps:$4 sm:$0xff]  }
 0x370   : > { %v14160_v52 = vpack.c.bf16 %v4299_v13, %v4328_v14  ;;  %v12286_v13 = vld [vmem:[#allocation9 + $0x62c] ss:$16 sps:$4 sm:$0xff]   ;;  %v12295_v14 = vld [vmem:[#allocation9 + $0x1e4] ss:$16 sps:$4 sm:$0xff]  }
 0x371   : > { %5408 = vmatpush2.bf16.msra.mxu0 %v12227_v54  ;;  %v4329_v16 = vld [vmem:[#allocation2 + $0x18] sm:$0xff] }
 0x372   : > { %5409 = vmatprep.subr.bf16.mxu0 %v12235_v18  ;;  %v14162_v23 = vpack.c.bf16 %v4301_v51, %v4329_v16  ;;  %v4630_v21 = vshll.u32 %v14160_v52, 16  ;;  %v4628_v53 = vshrl.u32 %v14160_v52, 16  ;;  %v12284_v54 = vld [vmem:[#allocation9 + $0x628] ss:$16 sps:$4 sm:$0xff]   ;;  %v12287_v51 = vld [vmem:[#allocation9] ss:$16 sps:$4 sm:$0xff]  }
 0x373   : > { %v4336_v26 = vld [vmem:[#allocation2 + $0x50] sm:$0x3]  ;;  %v12293_v16 = vld [vmem:[#allocation9 + $0x1e0] ss:$16 sps:$4 sm:$0xff]  }
 0x374   : > { %v4642_v44 = vshll.u32 %v14162_v23, 16  ;;  %v14165_v30 = vpack.c.bf16 %v4336_v26, %v4336_v26  ;;  %v4640_v41 = vshrl.u32 %v14162_v23, 16  ;;  %v4632_v22 = vrot.slane %v4630_v21, 1  ;;  %v12292_v18 = vld [vmem:[#allocation9 + $0x60c] ss:$16 sps:$4 sm:$0xff]  }
 0x375   : > { %5410 = vmatpush2.bf16.msra.mxu0 %v12233_v56  ;;  %v4337_v8 = vld [vmem:[#allocation2 + $0x58] sm:$0x3]  ;;  %v12290_v56 = vld [vmem:[#allocation9 + $0x608] ss:$16 sps:$4 sm:$0xff]   ;;  %v12299_v21 = vld [vmem:[#allocation9 + $0x1c0] ss:$16 sps:$4 sm:$0xff]  }
 0x376   : > { %5411 = vmatprep.subr.bf16.mxu0 %v12241_v19  ;;  %v14168_v36 = vpack.c.bf16 %v4337_v8, %v4337_v8  ;;  %v4644_v39 = vrot.slane %v4642_v44, 1  ;;  %v4635_v5 = vshll.u32 %v14165_v30, 16  ;;  %v4633_v17 = vor.u32 %v4632_v22, %v4628_v53  ;;  %v12298_v19 = vld [vmem:[#allocation9 + $0x7ec] ss:$16 sps:$4 sm:$0xff]   ;;  %v12301_v26 = vld [vmem:[#allocation9 + $0x1c4] ss:$16 sps:$4 sm:$0xff]  }
 0x377   : > { %v12296_v44 = vld [vmem:[#allocation9 + $0x7e8] ss:$16 sps:$4 sm:$0xff]   ;;  %v12307_v8 = vld [vmem:[#allocation9 + $0x1a4] ss:$16 sps:$4 sm:$0xff]   ;;  %v12311_v22 = vld [vmem:[#allocation9 + $0x180] ss:$16 sps:$4 sm:$0xff]  }
 0x378   : > { %v4647_v42 = vshll.u32 %v14168_v36, 16  ;;  %v4645_v0 = vor.u32 %v4644_v39, %v4640_v41  ;;  %v4637_v60 = vrot.slane %v4635_v5, 1  ;;  %v12305_v39 = vld [vmem:[#allocation9 + $0x1a0] ss:$16 sps:$4 sm:$0xff]   ;;  %v12310_v5 = vld [vmem:[#allocation9 + $0x7ac] ss:$16 sps:$4 sm:$0xff]  }
 0x379   : > { %5412 = vmatpush2.bf16.msra.mxu0 %v12239_v38  ;;  %v12304_v38 = vld [vmem:[#allocation9 + $0x7cc] ss:$16 sps:$4 sm:$0xff]   ;;  %v12313_v41 = vld [vmem:[#allocation9 + $0x184] ss:$16 sps:$4 sm:$0xff]   ;;  %v12317_v53 = vld [vmem:[#allocation9 + $0x160] ss:$16 sps:$4 sm:$0xff]  }
 0x37a   : > { %6107 = vmatprep.subr.bf16.mxu0 %v12247_v34  ;;  %v4649_v47 = vrot.slane %v4647_v42, 1  ;;  %v14178_v32 = vsel %vm1043_vm0, %v4633_v17, %v4637_v60  ;;  %v12302_v34 = vld [vmem:[#allocation9 + $0x7c8] ss:$16 sps:$4 sm:$0xff]   ;;  %v12322_v60 = vld [vmem:[#allocation9 + $0x76c] ss:$16 sps:$4 sm:$0xff]  }
 0x37b   : > { %v12308_v42 = vld [vmem:[#allocation9 + $0x7a8] ss:$16 sps:$4 sm:$0xff]   ;;  %v12328_v17 = vld [vmem:[#allocation9 + $0x74c] ss:$16 sps:$4 sm:$0xff]  }
 0x37c   : > { %5414 = vmatmul.mubr.bf16.vlgmr.msra.gmra.mxu0 %v14141_v28  ;;  %v4650_v4 = vsel %vm1043_vm0, %v4645_v0, %v4649_v47  ;;  %v12254_v28 = vld [vmem:[#allocation9 + $0x6c8] ss:$16 sps:$4 sm:$0xff]   ;;  %v12319_v0 = vld [vmem:[#allocation9 + $0x164] ss:$16 sps:$4 sm:$0xff]  }
 0x37d   : > { %6108 = vmatpush1.bf16.msra.mxu0 %v12245_v49  ;;  %6139 = vmatprep.mubr.bf16.mxu0 %v14127_v46  ;;  %v12316_v49 = vld [vmem:[#allocation9 + $0x78c] ss:$16 sps:$4 sm:$0xff]   ;;  %v12314_v47 = vld [vmem:[#allocation9 + $0x788] ss:$16 sps:$4 sm:$0xff]  }
 0x37e   : > { %5370 = vmatprep.mubr.bf16.mxu1 %v4650_v4  ;;  %6109 = vmatprep.subr.bf16.mxu0 %v12253_v3  ;;  %v12325_v3 = vld [vmem:[#allocation9 + $0x144] ss:$16 sps:$4 sm:$0xff]  }
 0x37f   : > { %5371 = vmatmul.mubr.bf16.vlgmr.msra.gmra.mxu1 %v14178_v32 }
 0x380   : > { %5425 = vmatpush1.bf16.msra.mxu1 %v12248_v24  ;;  %5456 = vmatprep.mubr.bf16.mxu1 %v4650_v4  ;;  %v12320_v4 = vld [vmem:[#allocation9 + $0x768] ss:$16 sps:$4 sm:$0xff]   ;;  %v12323_v24 = vld [vmem:[#allocation9 + $0x140] ss:$16 sps:$4 sm:$0xff]  }
 0x381   : > { %6110 = vmatpush1.bf16.msra.mxu0 %v12251_v45  ;;  %5426 = vmatprep.subr.bf16.mxu1 %v12256_v11  ;;  %v12331_v45 = vld [vmem:[#allocation9 + $0x124] ss:$16 sps:$4 sm:$0xff]   ;;  %v12326_v11 = vld [vmem:[#allocation9 + $0x748] ss:$16 sps:$4 sm:$0xff]  }
 0x382   : > { %6111 = vmatprep.subr.bf16.mxu0 %v12259_v33  ;;  %v12329_v33 = vld [vmem:[#allocation9 + $0x120] ss:$16 sps:$4 sm:$0xff]  }
 0x384   : > { %5427 = vmatpush1.bf16.msra.mxu1 %v12254_v28  ;;  %v12334_v28 = vld [vmem:[#allocation9 + $0x72c] ss:$16 sps:$4 sm:$0xff]  }
 0x385   : > { %6112 = vmatpush1.bf16.msra.mxu0 %v12257_v63  ;;  %5428 = vmatprep.subr.bf16.mxu1 %v12262_v35  ;;  %v12337_v63 = vld [vmem:[#allocation9 + $0x104] ss:$16 sps:$4 sm:$0xff]   ;;  %v12332_v35 = vld [vmem:[#allocation9 + $0x728] ss:$16 sps:$4 sm:$0xff]  }
 0x386   : > { %6113 = vmatprep.subr.bf16.mxu0 %v12265_v25  ;;  %v12335_v25 = vld [vmem:[#allocation9 + $0x100] ss:$16 sps:$4 sm:$0xff]  }
 0x388   : > { %5429 = vmatpush1.bf16.msra.mxu1 %v12260_v50  ;;  %v12340_v50 = vld [vmem:[#allocation9 + $0x70c] ss:$16 sps:$4 sm:$0xff]  }
 0x389   : > { %6114 = vmatpush1.bf16.msra.mxu0 %v12263_v37  ;;  %5430 = vmatprep.subr.bf16.mxu1 %v12268_v20  ;;  %v12343_v37 = vld [vmem:[#allocation9 + $0xec] ss:$16 sps:$4 sm:$0xff]   ;;  %v12338_v20 = vld [vmem:[#allocation9 + $0x708] ss:$16 sps:$4 sm:$0xff]  }
 0x38a   : > { %6115 = vmatprep.subr.bf16.mxu0 %v12271_v1  ;;  %v12341_v1 = vld [vmem:[#allocation9 + $0xe8] ss:$16 sps:$4 sm:$0xff]  }
 0x38c   : > { %5431 = vmatpush1.bf16.msra.mxu1 %v12266_v7  ;;  %v12346_v7 = vld [vmem:[#allocation9 + $0x2e4] ss:$16 sps:$4 sm:$0xff]  }
 0x38d   : > { %6116 = vmatpush1.bf16.msra.mxu0 %v12269_v6  ;;  %5432 = vmatprep.subr.bf16.mxu1 %v12274_v62  ;;  %v12349_v6 = vld [vmem:[#allocation9 + $0xcc] ss:$16 sps:$4 sm:$0xff]   ;;  %v12344_v62 = vld [vmem:[#allocation9 + $0x2e0] ss:$16 sps:$4 sm:$0xff]  }
 0x38e   : > { %6117 = vmatprep.subr.bf16.mxu0 %v12277_v40  ;;  %v12347_v40 = vld [vmem:[#allocation9 + $0xc8] ss:$16 sps:$4 sm:$0xff]  }
 0x390   : > { %5433 = vmatpush1.bf16.msra.mxu1 %v12272_v9  ;;  %v12352_v9 = vld [vmem:[#allocation9 + $0x2c4] ss:$16 sps:$4 sm:$0xff]  }
 0x391   : > { %6118 = vmatpush1.bf16.msra.mxu0 %v12275_v2  ;;  %5434 = vmatprep.subr.bf16.mxu1 %v12280_v58  ;;  %v12355_v2 = vld [vmem:[#allocation9 + $0xac] ss:$16 sps:$4 sm:$0xff]   ;;  %v12350_v58 = vld [vmem:[#allocation9 + $0x2c0] ss:$16 sps:$4 sm:$0xff]  }
 0x392   : > { %6119 = vmatprep.subr.bf16.mxu0 %v12283_v29  ;;  %v12353_v29 = vld [vmem:[#allocation9 + $0xa8] ss:$16 sps:$4 sm:$0xff]  }
 0x394   : > { %5435 = vmatpush1.bf16.msra.mxu1 %v12278_v43  ;;  %v12358_v43 = vld [vmem:[#allocation9 + $0x2a4] ss:$16 sps:$4 sm:$0xff]  }
 0x395   : > { %6120 = vmatpush1.bf16.msra.mxu0 %v12281_v57  ;;  %5436 = vmatprep.subr.bf16.mxu1 %v12286_v13  ;;  %v12361_v57 = vld [vmem:[#allocation9 + $0x8c] ss:$16 sps:$4 sm:$0xff]   ;;  %v12356_v13 = vld [vmem:[#allocation9 + $0x2a0] ss:$16 sps:$4 sm:$0xff]  }
 0x396   : > { %6121 = vmatprep.subr.bf16.mxu0 %v12289_v12  ;;  %v12359_v12 = vld [vmem:[#allocation9 + $0x88] ss:$16 sps:$4 sm:$0xff]  }
 0x398   : > { %5437 = vmatpush1.bf16.msra.mxu1 %v12284_v54  ;;  %v12364_v54 = vld [vmem:[#allocation9 + $0x284] ss:$16 sps:$4 sm:$0xff]  }
 0x399   : > { %6122 = vmatpush1.bf16.msra.mxu0 %v12287_v51  ;;  %5438 = vmatprep.subr.bf16.mxu1 %v12292_v18  ;;  %v12367_v51 = vld [vmem:[#allocation9 + $0x6c] ss:$16 sps:$4 sm:$0xff]   ;;  %v12365_v18 = vld [vmem:[#allocation9 + $0x68] ss:$16 sps:$4 sm:$0xff]  }
 0x39a   : > { %6123 = vmatprep.subr.bf16.mxu0 %v12295_v14  ;;  %v12370_v14 = vld [vmem:[#allocation9 + $0x264] ss:$16 sps:$4 sm:$0xff]  }
 0x39c   : > { %5439 = vmatpush1.bf16.msra.mxu1 %v12290_v56  ;;  %v12373_v56 = vld [vmem:[#allocation9 + $0x4c] ss:$16 sps:$4 sm:$0xff]  }
 0x39d   : > { %6124 = vmatpush2.bf16.msra.mxu0 %v12293_v16  ;;  %5440 = vmatprep.subr.bf16.mxu1 %v12298_v19  ;;  %v12368_v16 = vld [vmem:[#allocation9 + $0x260] ss:$16 sps:$4 sm:$0xff]   ;;  %v12371_v19 = vld [vmem:[#allocation9 + $0x48] ss:$16 sps:$4 sm:$0xff]  }
 0x39e   : > { %6125 = vmatprep.subr.bf16.mxu0 %v12301_v26  ;;  %v12376_v26 = vld [vmem:[#allocation9 + $0x244] ss:$16 sps:$4 sm:$0xff]  }
 0x3a0   : > { %5441 = vmatpush2.bf16.msra.mxu1 %v12296_v44  ;;  %v12379_v44 = vld [vmem:[#allocation9 + $0x2c] ss:$16 sps:$4 sm:$0xff]  }
 0x3a1   : > { %6126 = vmatpush2.bf16.msra.mxu0 %v12299_v21  ;;  %5442 = vmatprep.subr.bf16.mxu1 %v12304_v38  ;;  %v12374_v21 = vld [vmem:[#allocation9 + $0x240] ss:$16 sps:$4 sm:$0xff]   ;;  %v12377_v38 = vld [vmem:[#allocation9 + $0x28] ss:$16 sps:$4 sm:$0xff]  }
 0x3a2   : > { %6127 = vmatprep.subr.bf16.mxu0 %v12307_v8  ;;  %v12382_v8 = vld [vmem:[#allocation9 + $0x224] ss:$16 sps:$4 sm:$0xff]  }
 0x3a4   : > { %5443 = vmatpush2.bf16.msra.mxu1 %v12302_v34  ;;  %v12385_v34 = vld [vmem:[#allocation9 + $0xc] ss:$16 sps:$4 sm:$0xff]  }
 0x3a5   : > { %6128 = vmatpush2.bf16.msra.mxu0 %v12305_v39  ;;  %5444 = vmatprep.subr.bf16.mxu1 %v12310_v5  ;;  %v12380_v39 = vld [vmem:[#allocation9 + $0x220] ss:$16 sps:$4 sm:$0xff]   ;;  %v12383_v5 = vld [vmem:[#allocation9 + $0x8] ss:$16 sps:$4 sm:$0xff]  }
 0x3a6   : > { %6129 = vmatprep.subr.bf16.mxu0 %v12313_v41  ;;  %v12388_v41 = vld [vmem:[#allocation9 + $0x204] ss:$16 sps:$4 sm:$0xff]  }
 0x3a8   : > { %5445 = vmatpush2.bf16.msra.mxu1 %v12308_v42  ;;  %v12391_v42 = vld [vmem:[#allocation9 + $0x1ec] ss:$16 sps:$4 sm:$0xff]  }
 0x3a9   : > { %6130 = vmatpush2.bf16.msra.mxu0 %v12311_v22  ;;  %5446 = vmatprep.subr.bf16.mxu1 %v12316_v49  ;;  %v12386_v22 = vld [vmem:[#allocation9 + $0x200] ss:$16 sps:$4 sm:$0xff]   ;;  %v12389_v49 = vld [vmem:[#allocation9 + $0x1e8] ss:$16 sps:$4 sm:$0xff]  }
 0x3aa   : > { %6131 = vmatprep.subr.bf16.mxu0 %v12319_v0  ;;  %v12394_v0 = vld [vmem:[#allocation9 + $0x3e4] ss:$16 sps:$4 sm:$0xff]  }
 0x3ac   : > { %5447 = vmatpush2.bf16.msra.mxu1 %v12314_v47  ;;  %v12397_v47 = vld [vmem:[#allocation9 + $0x1cc] ss:$16 sps:$4 sm:$0xff]  }
 0x3ad   : > { %6132 = vmatpush2.bf16.msra.mxu0 %v12317_v53  ;;  %5448 = vmatprep.subr.bf16.mxu1 %v12322_v60  ;;  %v12392_v53 = vld [vmem:[#allocation9 + $0x3e0] ss:$16 sps:$4 sm:$0xff]   ;;  %v12395_v60 = vld [vmem:[#allocation9 + $0x1c8] ss:$16 sps:$4 sm:$0xff]  }
 0x3ae   : > { %6133 = vmatprep.subr.bf16.mxu0 %v12325_v3  ;;  %v12400_v3 = vld [vmem:[#allocation9 + $0x3c4] ss:$16 sps:$4 sm:$0xff]  }
 0x3b0   : > { %5449 = vmatpush2.bf16.msra.mxu1 %v12320_v4  ;;  %v12403_v4 = vld [vmem:[#allocation9 + $0x1ac] ss:$16 sps:$4 sm:$0xff]  }
 0x3b1   : > { %6134 = vmatpush2.bf16.msra.mxu0 %v12323_v24  ;;  %5450 = vmatprep.subr.bf16.mxu1 %v12328_v17  ;;  %v12398_v24 = vld [vmem:[#allocation9 + $0x3c0] ss:$16 sps:$4 sm:$0xff]   ;;  %v12401_v17 = vld [vmem:[#allocation9 + $0x1a8] ss:$16 sps:$4 sm:$0xff]  }
 0x3b2   : > { %6135 = vmatprep.subr.bf16.mxu0 %v12331_v45  ;;  %v12406_v45 = vld [vmem:[#allocation9 + $0x3a4] ss:$16 sps:$4 sm:$0xff]  }
 0x3b4   : > { %5451 = vmatpush2.bf16.msra.mxu1 %v12326_v11  ;;  %v12409_v11 = vld [vmem:[#allocation9 + $0x18c] ss:$16 sps:$4 sm:$0xff]  }
 0x3b5   : > { %6136 = vmatpush2.bf16.msra.mxu0 %v12329_v33  ;;  %5452 = vmatprep.subr.bf16.mxu1 %v12334_v28  ;;  %v12404_v33 = vld [vmem:[#allocation9 + $0x3a0] ss:$16 sps:$4 sm:$0xff]   ;;  %v12407_v28 = vld [vmem:[#allocation9 + $0x188] ss:$16 sps:$4 sm:$0xff]  }
 0x3b6   : > { %6137 = vmatprep.subr.bf16.mxu0 %v12337_v63  ;;  %v12412_v63 = vld [vmem:[#allocation9 + $0x384] ss:$16 sps:$4 sm:$0xff]  }
 0x3b8   : > { %5453 = vmatpush2.bf16.msra.mxu1 %v12332_v35  ;;  %v12415_v35 = vld [vmem:[#allocation9 + $0x16c] ss:$16 sps:$4 sm:$0xff]  }
 0x3b9   : > { %6138 = vmatpush2.bf16.msra.mxu0 %v12335_v25  ;;  %5454 = vmatprep.subr.bf16.mxu1 %v12340_v50  ;;  %v12410_v25 = vld [vmem:[#allocation9 + $0x380] ss:$16 sps:$4 sm:$0xff]   ;;  %v12413_v50 = vld [vmem:[#allocation9 + $0x168] ss:$16 sps:$4 sm:$0xff]  }
 0x3ba   : > { %6193 = vmatprep.subr.bf16.mxu0 %v12343_v37  ;;  %v12418_v37 = vld [vmem:[#allocation9 + $0x364] ss:$16 sps:$4 sm:$0xff]  }
 0x3bc   : > { %5455 = vmatpush2.bf16.msra.mxu1 %v12338_v20  ;;  %6140 = vmatmul.mubr.bf16.vlgmr.msra.gmra.mxu0 %v14125_v55  ;;  %v12421_v20 = vld [vmem:[#allocation9 + $0x14c] ss:$16 sps:$4 sm:$0xff]  }
 0x3bd   : > { %6194 = vmatpush1.bf16.msra.mxu0 %v12341_v1  ;;  %6225 = vmatprep.mubr.bf16.mxu0 %v14127_v46  ;;  %v12416_v1 = vld [vmem:[#allocation9 + $0x360] ss:$16 sps:$4 sm:$0xff]  }
 0x3be   : > { %6150 = vmatprep.subr.bf16.mxu1 %v12346_v7  ;;  %6195 = vmatprep.subr.bf16.mxu0 %v12349_v6  ;;  %v12419_v7 = vld [vmem:[#allocation9 + $0x148] ss:$16 sps:$4 sm:$0xff]   ;;  %v12424_v6 = vld [vmem:[#allocation9 + $0x344] ss:$16 sps:$4 sm:$0xff]  }
 0x3bf   : > { %5457 = vmatmul.mubr.bf16.vlgmr.msra.gmra.mxu1 %v14178_v32  ;;  %v12362_v32 = vld [vmem:[#allocation9 + $0x280] ss:$16 sps:$4 sm:$0xff]  }
 0x3c0   : > { %6151 = vmatpush1.bf16.msra.mxu1 %v12344_v62  ;;  %6182 = vmatprep.mubr.bf16.mxu1 %v14162_v23  ;;  %v12427_v62 = vld [vmem:[#allocation9 + $0x12c] ss:$16 sps:$4 sm:$0xff]  }
 0x3c1   : > { %6196 = vmatpush1.bf16.msra.mxu0 %v12347_v40  ;;  %6152 = vmatprep.subr.bf16.mxu1 %v12352_v9  ;;  %v12422_v40 = vld [vmem:[#allocation9 + $0x340] ss:$16 sps:$4 sm:$0xff]   ;;  %v12425_v9 = vld [vmem:[#allocation9 + $0x128] ss:$16 sps:$4 sm:$0xff]  }
 0x3c2   : > { %6197 = vmatprep.subr.bf16.mxu0 %v12355_v2  ;;  %v12430_v2 = vld [vmem:[#allocation9 + $0x324] ss:$16 sps:$4 sm:$0xff]  }
 0x3c4   : > { %6153 = vmatpush1.bf16.msra.mxu1 %v12350_v58  ;;  %v12433_v58 = vld [vmem:[#allocation9 + $0x10c] ss:$16 sps:$4 sm:$0xff]  }
 0x3c5   : > { %6198 = vmatpush1.bf16.msra.mxu0 %v12353_v29  ;;  %6154 = vmatprep.subr.bf16.mxu1 %v12358_v43  ;;  %v12428_v29 = vld [vmem:[#allocation9 + $0x320] ss:$16 sps:$4 sm:$0xff]   ;;  %v12431_v43 = vld [vmem:[#allocation9 + $0x108] ss:$16 sps:$4 sm:$0xff]  }
 0x3c6   : > { %6199 = vmatprep.subr.bf16.mxu0 %v12361_v57  ;;  %v12436_v57 = vld [vmem:[#allocation9 + $0x304] ss:$16 sps:$4 sm:$0xff]  }
 0x3c8   : > { %6155 = vmatpush1.bf16.msra.mxu1 %v12356_v13  ;;  %v12439_v13 = vld [vmem:[#allocation9 + $0x8e4] ss:$16 sps:$4 sm:$0xff]  }
 0x3c9   : > { %6200 = vmatpush1.bf16.msra.mxu0 %v12359_v12  ;;  %6156 = vmatprep.subr.bf16.mxu1 %v12364_v54  ;;  %v12434_v12 = vld [vmem:[#allocation9 + $0x300] ss:$16 sps:$4 sm:$0xff]   ;;  %v6420_v54 = vrot.slane %v14133_v15, 1  ;;  %v12448_v15 = vld [vmem:[#allocation9 + $0x2cc] ss:$16 sps:$4 sm:$0xff]  }
 0x3ca   : > { %6201 = vmatprep.subr.bf16.mxu0 %v12367_v51  ;;  %v12437_v51 = vld [vmem:[#allocation9 + $0x8e0] ss:$16 sps:$4 sm:$0xff]  }
 0x3cc   : > { %6157 = vmatpush1.bf16.msra.mxu1 %v12362_v32  ;;  %v6419_v32 = vrot.slane %v14127_v46, 1  ;;  %v12446_v46 = vld [vmem:[#allocation9 + $0x2c8] ss:$16 sps:$4 sm:$0xff]  }
 0x3cd   : > { %6202 = vmatpush1.bf16.msra.mxu0 %v12365_v18  ;;  %6158 = vmatprep.subr.bf16.mxu1 %v12370_v14  ;;  %v12442_v18 = vld [vmem:[#allocation9 + $0x2ec] ss:$16 sps:$4 sm:$0xff]   ;;  %v12445_v14 = vld [vmem:[#allocation9 + $0x8c4] ss:$16 sps:$4 sm:$0xff]  }
 0x3ce   : > { %6203 = vmatprep.subr.bf16.mxu0 %v12373_v56  ;;  %v14189_v56 = vsel %vm3225_vm2, %v6419_v32, %v6420_v54  ;;  %v12517_v54 = vld [vmem:[#allocation9 + $0x944] ss:$16 sps:$4 sm:$0xff]   ;;  %v12515_v32 = vld [vmem:[#allocation9 + $0x940] ss:$16 sps:$4 sm:$0xff]  }
 0x3d0   : > { %6159 = vmatpush1.bf16.msra.mxu1 %v12368_v16  ;;  %v12440_v16 = vld [vmem:[#allocation9 + $0x2e8] ss:$16 sps:$4 sm:$0xff]  }
 0x3d1   : > { %6204 = vmatpush1.bf16.msra.mxu0 %v12371_v19  ;;  %6160 = vmatprep.subr.bf16.mxu1 %v12376_v26  ;;  %v12443_v19 = vld [vmem:[#allocation9 + $0x8c0] ss:$16 sps:$4 sm:$0xff]   ;;  %v12451_v26 = vld [vmem:[#allocation9 + $0x8a4] ss:$16 sps:$4 sm:$0xff]  }
 0x3d2   : > { %6205 = vmatprep.subr.bf16.mxu0 %v12379_v44  ;;  %v12449_v44 = vld [vmem:[#allocation9 + $0x8a0] ss:$16 sps:$4 sm:$0xff]  }
 0x3d4   : > { %6161 = vmatpush1.bf16.msra.mxu1 %v12374_v21  ;;  %v12454_v21 = vld [vmem:[#allocation9 + $0x2ac] ss:$16 sps:$4 sm:$0xff]  }
 0x3d5   : > { %6206 = vmatpush1.bf16.msra.mxu0 %v12377_v38  ;;  %6162 = vmatprep.subr.bf16.mxu1 %v12382_v8  ;;  %v12457_v38 = vld [vmem:[#allocation9 + $0x884] ss:$16 sps:$4 sm:$0xff]   ;;  %v12452_v8 = vld [vmem:[#allocation9 + $0x2a8] ss:$16 sps:$4 sm:$0xff]  }
 0x3d6   : > { %6207 = vmatprep.subr.bf16.mxu0 %v12385_v34  ;;  %v12455_v34 = vld [vmem:[#allocation9 + $0x880] ss:$16 sps:$4 sm:$0xff]  }
 0x3d8   : > { %6163 = vmatpush1.bf16.msra.mxu1 %v12380_v39  ;;  %v12460_v39 = vld [vmem:[#allocation9 + $0x28c] ss:$16 sps:$4 sm:$0xff]  }
 0x3d9   : > { %6208 = vmatpush1.bf16.msra.mxu0 %v12383_v5  ;;  %6164 = vmatprep.subr.bf16.mxu1 %v12388_v41  ;;  %v12463_v5 = vld [vmem:[#allocation9 + $0x864] ss:$16 sps:$4 sm:$0xff]   ;;  %v12458_v41 = vld [vmem:[#allocation9 + $0x288] ss:$16 sps:$4 sm:$0xff]  }
 0x3da   : > { %6209 = vmatprep.subr.bf16.mxu0 %v12391_v42  ;;  %v12461_v42 = vld [vmem:[#allocation9 + $0x860] ss:$16 sps:$4 sm:$0xff]  }
 0x3dc   : > { %6165 = vmatpush1.bf16.msra.mxu1 %v12386_v22  ;;  %v12466_v22 = vld [vmem:[#allocation9 + $0x26c] ss:$16 sps:$4 sm:$0xff]  }
 0x3dd   : > { %6210 = vmatpush2.bf16.msra.mxu0 %v12389_v49  ;;  %6166 = vmatprep.subr.bf16.mxu1 %v12394_v0  ;;  %v12469_v49 = vld [vmem:[#allocation9 + $0x844] ss:$16 sps:$4 sm:$0xff]   ;;  %v12464_v0 = vld [vmem:[#allocation9 + $0x268] ss:$16 sps:$4 sm:$0xff]  }
 0x3de   : > { %6211 = vmatprep.subr.bf16.mxu0 %v12397_v47  ;;  %v12467_v47 = vld [vmem:[#allocation9 + $0x840] ss:$16 sps:$4 sm:$0xff]  }
 0x3e0   : > { %6167 = vmatpush2.bf16.msra.mxu1 %v12392_v53  ;;  %v12472_v53 = vld [vmem:[#allocation9 + $0x24c] ss:$16 sps:$4 sm:$0xff]  }
 0x3e1   : > { %6212 = vmatpush2.bf16.msra.mxu0 %v12395_v60  ;;  %6168 = vmatprep.subr.bf16.mxu1 %v12400_v3  ;;  %v12475_v60 = vld [vmem:[#allocation9 + $0x824] ss:$16 sps:$4 sm:$0xff]   ;;  %v12470_v3 = vld [vmem:[#allocation9 + $0x248] ss:$16 sps:$4 sm:$0xff]  }
 0x3e2   : > { %6213 = vmatprep.subr.bf16.mxu0 %v12403_v4  ;;  %v12473_v4 = vld [vmem:[#allocation9 + $0x820] ss:$16 sps:$4 sm:$0xff]  }
 0x3e4   : > { %6169 = vmatpush2.bf16.msra.mxu1 %v12398_v24  ;;  %v12478_v24 = vld [vmem:[#allocation9 + $0x22c] ss:$16 sps:$4 sm:$0xff]  }
 0x3e5   : > { %6214 = vmatpush2.bf16.msra.mxu0 %v12401_v17  ;;  %6170 = vmatprep.subr.bf16.mxu1 %v12406_v45  ;;  %v12481_v17 = vld [vmem:[#allocation9 + $0x804] ss:$16 sps:$4 sm:$0xff]   ;;  %v12476_v45 = vld [vmem:[#allocation9 + $0x228] ss:$16 sps:$4 sm:$0xff]  }
 0x3e6   : > { %6215 = vmatprep.subr.bf16.mxu0 %v12409_v11  ;;  %v12479_v11 = vld [vmem:[#allocation9 + $0x800] ss:$16 sps:$4 sm:$0xff]  }
 0x3e8   : > { %6171 = vmatpush2.bf16.msra.mxu1 %v12404_v33  ;;  %v12484_v33 = vld [vmem:[#allocation9 + $0x20c] ss:$16 sps:$4 sm:$0xff]  }
 0x3e9   : > { %6216 = vmatpush2.bf16.msra.mxu0 %v12407_v28  ;;  %6172 = vmatprep.subr.bf16.mxu1 %v12412_v63  ;;  %v12487_v28 = vld [vmem:[#allocation9 + $0x9e4] ss:$16 sps:$4 sm:$0xff]   ;;  %v12482_v63 = vld [vmem:[#allocation9 + $0x208] ss:$16 sps:$4 sm:$0xff]  }
 0x3ea   : > { %6217 = vmatprep.subr.bf16.mxu0 %v12415_v35  ;;  %v12485_v35 = vld [vmem:[#allocation9 + $0x9e0] ss:$16 sps:$4 sm:$0xff]  }
 0x3ec   : > { %6173 = vmatpush2.bf16.msra.mxu1 %v12410_v25  ;;  %v12490_v25 = vld [vmem:[#allocation9 + $0x3ec] ss:$16 sps:$4 sm:$0xff]  }
 0x3ed   : > { %6218 = vmatpush2.bf16.msra.mxu0 %v12413_v50  ;;  %6174 = vmatprep.subr.bf16.mxu1 %v12418_v37  ;;  %v12493_v50 = vld [vmem:[#allocation9 + $0x9c4] ss:$16 sps:$4 sm:$0xff]   ;;  %v12488_v37 = vld [vmem:[#allocation9 + $0x3e8] ss:$16 sps:$4 sm:$0xff]  }
 0x3ee   : > { %6219 = vmatprep.subr.bf16.mxu0 %v12421_v20  ;;  %v12491_v20 = vld [vmem:[#allocation9 + $0x9c0] ss:$16 sps:$4 sm:$0xff]  }
 0x3f0   : > { %6175 = vmatpush2.bf16.msra.mxu1 %v12416_v1  ;;  %v12496_v1 = vld [vmem:[#allocation9 + $0x3cc] ss:$16 sps:$4 sm:$0xff]  }
 0x3f1   : > { %6220 = vmatpush2.bf16.msra.mxu0 %v12419_v7  ;;  %6176 = vmatprep.subr.bf16.mxu1 %v12424_v6  ;;  %v12499_v7 = vld [vmem:[#allocation9 + $0x9a4] ss:$16 sps:$4 sm:$0xff]   ;;  %v12494_v6 = vld [vmem:[#allocation9 + $0x3c8] ss:$16 sps:$4 sm:$0xff]  }
 0x3f2   : > { %6221 = vmatprep.subr.bf16.mxu0 %v12427_v62  ;;  %v12497_v62 = vld [vmem:[#allocation9 + $0x9a0] ss:$16 sps:$4 sm:$0xff]  }
 0x3f4   : > { %6177 = vmatpush2.bf16.msra.mxu1 %v12422_v40  ;;  %v12502_v40 = vld [vmem:[#allocation9 + $0x3ac] ss:$16 sps:$4 sm:$0xff]  }
 0x3f5   : > { %6222 = vmatpush2.bf16.msra.mxu0 %v12425_v9  ;;  %6178 = vmatprep.subr.bf16.mxu1 %v12430_v2  ;;  %v12505_v9 = vld [vmem:[#allocation9 + $0x984] ss:$16 sps:$4 sm:$0xff]   ;;  %v12500_v2 = vld [vmem:[#allocation9 + $0x3a8] ss:$16 sps:$4 sm:$0xff]  }
 0x3f6   : > { %6223 = vmatprep.subr.bf16.mxu0 %v12433_v58  ;;  %v12503_v58 = vld [vmem:[#allocation9 + $0x980] ss:$16 sps:$4 sm:$0xff]  }
 0x3f8   : > { %6179 = vmatpush2.bf16.msra.mxu1 %v12428_v29  ;;  %v12508_v29 = vld [vmem:[#allocation9 + $0x38c] ss:$16 sps:$4 sm:$0xff]  }
 0x3f9   : > { %6224 = vmatpush2.bf16.msra.mxu0 %v12431_v43  ;;  %6180 = vmatprep.subr.bf16.mxu1 %v12436_v57  ;;  %v12511_v43 = vld [vmem:[#allocation9 + $0x964] ss:$16 sps:$4 sm:$0xff]   ;;  %v12506_v57 = vld [vmem:[#allocation9 + $0x388] ss:$16 sps:$4 sm:$0xff]  }
 0x3fa   : > { %7072 = vmatprep.subr.bf16.mxu0 %v12439_v13  ;;  %v12509_v13 = vld [vmem:[#allocation9 + $0x960] ss:$16 sps:$4 sm:$0xff]  }
 0x3fc   : > { %6181 = vmatpush2.bf16.msra.mxu1 %v12434_v12  ;;  %6226 = vmatmul.mubr.bf16.vlgmr.msra.gmra.mxu0 %v14125_v55  ;;  %v12514_v12 = vld [vmem:[#allocation9 + $0x36c] ss:$16 sps:$4 sm:$0xff]  }
 0x3fd   : > { %7073 = vmatpush1.bf16.msra.mxu0 %v12437_v51  ;;  %7104 = vmatprep.mubr.bf16.mxu0 %v14189_v56  ;;  %v12512_v51 = vld [vmem:[#allocation9 + $0x368] ss:$16 sps:$4 sm:$0xff]  }
 0x3fe   : > { %6236 = vmatprep.subr.bf16.mxu1 %v12442_v18  ;;  %7074 = vmatprep.subr.bf16.mxu0 %v12445_v14  ;;  %v12520_v18 = vld [vmem:[#allocation9 + $0x34c] ss:$16 sps:$4 sm:$0xff]   ;;  %v12523_v14 = vld [vmem:[#allocation9 + $0x924] ss:$16 sps:$4 sm:$0xff]  }
 0x3ff   : > { %6183 = vmatmul.mubr.bf16.vlgmr.msra.gmra.mxu1 %v14160_v52 }
 0x400   : > { %6237 = vmatpush1.bf16.msra.mxu1 %v12440_v16  ;;  %6268 = vmatprep.mubr.bf16.mxu1 %v14162_v23  ;;  %v12518_v16 = vld [vmem:[#allocation9 + $0x348] ss:$16 sps:$4 sm:$0xff]  }
 0x401   : > { %7075 = vmatpush1.bf16.msra.mxu0 %v12443_v19  ;;  %6238 = vmatprep.subr.bf16.mxu1 %v12448_v15  ;;  %v12521_v19 = vld [vmem:[#allocation9 + $0x920] ss:$16 sps:$4 sm:$0xff]   ;;  %v12526_v15 = vld [vmem:[#allocation9 + $0x32c] ss:$16 sps:$4 sm:$0xff]  }
 0x402   : > { %7076 = vmatprep.subr.bf16.mxu0 %v12451_v26  ;;  %v12529_v26 = vld [vmem:[#allocation9 + $0x904] ss:$16 sps:$4 sm:$0xff]  }
 0x404   : > { %6239 = vmatpush1.bf16.msra.mxu1 %v12446_v46  ;;  %v12524_v46 = vld [vmem:[#allocation9 + $0x328] ss:$16 sps:$4 sm:$0xff]  }
 0x405   : > { %7077 = vmatpush1.bf16.msra.mxu0 %v12449_v44  ;;  %6240 = vmatprep.subr.bf16.mxu1 %v12454_v21  ;;  %v12527_v44 = vld [vmem:[#allocation9 + $0x900] ss:$16 sps:$4 sm:$0xff]   ;;  %v12532_v21 = vld [vmem:[#allocation9 + $0x30c] ss:$16 sps:$4 sm:$0xff]  }
 0x406   : > { %7078 = vmatprep.subr.bf16.mxu0 %v12457_v38  ;;  %v12535_v38 = vld [vmem:[#allocation9 + $0x8ec] ss:$16 sps:$4 sm:$0xff]  }
 0x408   : > { %6241 = vmatpush1.bf16.msra.mxu1 %v12452_v8  ;;  %v6417_v8 = vrot.slane %v14131_v48, 1  ;;  %v6425_v48 = vrot.slane %v14162_v23, 1  ;;  %v12553_v23 = vld [vmem:[#allocation9 + $0x88c] ss:$16 sps:$4 sm:$0xff]  }
 0x409   : > { %7079 = vmatpush1.bf16.msra.mxu0 %v12455_v34  ;;  %6242 = vmatprep.subr.bf16.mxu1 %v12460_v39  ;;  %v12530_v34 = vld [vmem:[#allocation9 + $0x308] ss:$16 sps:$4 sm:$0xff]   ;;  %v6416_v39 = vrot.slane %v14125_v55, 1  ;;  %v12544_v55 = vld [vmem:[#allocation9 + $0xac4] ss:$16 sps:$4 sm:$0xff]  }
 0x40a   : > { %7080 = vmatprep.subr.bf16.mxu0 %v12463_v5  ;;  %v12533_v5 = vld [vmem:[#allocation9 + $0x8e8] ss:$16 sps:$4 sm:$0xff]  }
 0x40c   : > { %6243 = vmatpush1.bf16.msra.mxu1 %v12458_v41  ;;  %v12538_v41 = vld [vmem:[#allocation9 + $0xae4] ss:$16 sps:$4 sm:$0xff]  }
 0x40d   : > { %7081 = vmatpush1.bf16.msra.mxu0 %v12461_v42  ;;  %6244 = vmatprep.subr.bf16.mxu1 %v12466_v22  ;;  %v12541_v42 = vld [vmem:[#allocation9 + $0x8cc] ss:$16 sps:$4 sm:$0xff]   ;;  %v14197_v22 = vsel %vm3225_vm2, %v6416_v39, %v6417_v8  ;;  %v12608_v39 = vld [vmem:[#allocation9 + $0xb60] ss:$16 sps:$4 sm:$0xff]  }
 0x40e   : > { %7082 = vmatprep.subr.bf16.mxu0 %v12469_v49  ;;  %v6426_v49 = vrot.slane %v14168_v36, 1  ;;  %v12542_v36 = vld [vmem:[#allocation9 + $0xac0] ss:$16 sps:$4 sm:$0xff]   ;;  %v12613_v8 = vld [vmem:[#allocation9 + $0x94c] ss:$16 sps:$4 sm:$0xff]  }
 0x410   : > { %6245 = vmatpush1.bf16.msra.mxu1 %v12464_v0  ;;  %v12536_v0 = vld [vmem:[#allocation9 + $0xae0] ss:$16 sps:$4 sm:$0xff]  }
 0x411   : > { %7083 = vmatpush1.bf16.msra.mxu0 %v12467_v47  ;;  %6246 = vmatprep.subr.bf16.mxu1 %v12472_v53  ;;  %v12539_v47 = vld [vmem:[#allocation9 + $0x8c8] ss:$16 sps:$4 sm:$0xff]   ;;  %v12547_v53 = vld [vmem:[#allocation9 + $0x8ac] ss:$16 sps:$4 sm:$0xff]  }
 0x412   : > { %7084 = vmatprep.subr.bf16.mxu0 %v12475_v60  ;;  %v14205_v60 = vsel %vm3225_vm2, %v6425_v48, %v6426_v49 }
 0x414   : > { %6247 = vmatpush1.bf16.msra.mxu1 %v12470_v3  ;;  %v12545_v3 = vld [vmem:[#allocation9 + $0x8a8] ss:$16 sps:$4 sm:$0xff]  }
 0x415   : > { %7085 = vmatpush1.bf16.msra.mxu0 %v12473_v4  ;;  %6248 = vmatprep.subr.bf16.mxu1 %v12478_v24  ;;  %v12548_v4 = vld [vmem:[#allocation9 + $0xaa0] ss:$16 sps:$4 sm:$0xff]   ;;  %v12551_v24 = vld [vmem:[#allocation9 + $0x888] ss:$16 sps:$4 sm:$0xff]  }
 0x416   : > { %7086 = vmatprep.subr.bf16.mxu0 %v12481_v17  ;;  %v12556_v17 = vld [vmem:[#allocation9 + $0xa84] ss:$16 sps:$4 sm:$0xff]  }
 0x418   : > { %6249 = vmatpush1.bf16.msra.mxu1 %v12476_v45  ;;  %v12559_v45 = vld [vmem:[#allocation9 + $0x86c] ss:$16 sps:$4 sm:$0xff]  }
 0x419   : > { %7087 = vmatpush1.bf16.msra.mxu0 %v12479_v11  ;;  %6250 = vmatprep.subr.bf16.mxu1 %v12484_v33  ;;  %v12554_v11 = vld [vmem:[#allocation9 + $0xa80] ss:$16 sps:$4 sm:$0xff]   ;;  %v12557_v33 = vld [vmem:[#allocation9 + $0x868] ss:$16 sps:$4 sm:$0xff]  }
 0x41a   : > { %7088 = vmatprep.subr.bf16.mxu0 %v12487_v28  ;;  %v12562_v28 = vld [vmem:[#allocation9 + $0xa64] ss:$16 sps:$4 sm:$0xff]  }
 0x41c   : > { %6251 = vmatpush1.bf16.msra.mxu1 %v12482_v63  ;;  %v12565_v63 = vld [vmem:[#allocation9 + $0x84c] ss:$16 sps:$4 sm:$0xff]  }
 0x41d   : > { %7089 = vmatpush2.bf16.msra.mxu0 %v12485_v35  ;;  %6252 = vmatprep.subr.bf16.mxu1 %v12490_v25  ;;  %v12560_v35 = vld [vmem:[#allocation9 + $0xa60] ss:$16 sps:$4 sm:$0xff]   ;;  %v12563_v25 = vld [vmem:[#allocation9 + $0x848] ss:$16 sps:$4 sm:$0xff]  }
 0x41e   : > { %7090 = vmatprep.subr.bf16.mxu0 %v12493_v50  ;;  %v12568_v50 = vld [vmem:[#allocation9 + $0xa44] ss:$16 sps:$4 sm:$0xff]  }
 0x420   : > { %6253 = vmatpush2.bf16.msra.mxu1 %v12488_v37  ;;  %v12571_v37 = vld [vmem:[#allocation9 + $0x82c] ss:$16 sps:$4 sm:$0xff]  }
 0x421   : > { %7091 = vmatpush2.bf16.msra.mxu0 %v12491_v20  ;;  %6254 = vmatprep.subr.bf16.mxu1 %v12496_v1  ;;  %v12566_v20 = vld [vmem:[#allocation9 + $0xa40] ss:$16 sps:$4 sm:$0xff]   ;;  %v12569_v1 = vld [vmem:[#allocation9 + $0x828] ss:$16 sps:$4 sm:$0xff]  }
 0x422   : > { %7092 = vmatprep.subr.bf16.mxu0 %v12499_v7  ;;  %v12574_v7 = vld [vmem:[#allocation9 + $0xa24] ss:$16 sps:$4 sm:$0xff]  }
 0x424   : > { %6255 = vmatpush2.bf16.msra.mxu1 %v12494_v6  ;;  %v12577_v6 = vld [vmem:[#allocation9 + $0x80c] ss:$16 sps:$4 sm:$0xff]  }
 0x425   : > { %7093 = vmatpush2.bf16.msra.mxu0 %v12497_v62  ;;  %6256 = vmatprep.subr.bf16.mxu1 %v12502_v40  ;;  %v12572_v62 = vld [vmem:[#allocation9 + $0xa20] ss:$16 sps:$4 sm:$0xff]   ;;  %v12575_v40 = vld [vmem:[#allocation9 + $0x808] ss:$16 sps:$4 sm:$0xff]  }
 0x426   : > { %7094 = vmatprep.subr.bf16.mxu0 %v12505_v9  ;;  %v12580_v9 = vld [vmem:[#allocation9 + $0xa04] ss:$16 sps:$4 sm:$0xff]  }
 0x428   : > { %6257 = vmatpush2.bf16.msra.mxu1 %v12500_v2  ;;  %v12583_v2 = vld [vmem:[#allocation9 + $0x9ec] ss:$16 sps:$4 sm:$0xff]  }
 0x429   : > { %7095 = vmatpush2.bf16.msra.mxu0 %v12503_v58  ;;  %6258 = vmatprep.subr.bf16.mxu1 %v12508_v29  ;;  %v12578_v58 = vld [vmem:[#allocation9 + $0xa00] ss:$16 sps:$4 sm:$0xff]   ;;  %v12581_v29 = vld [vmem:[#allocation9 + $0x9e8] ss:$16 sps:$4 sm:$0xff]  }
 0x42a   : > { %7096 = vmatprep.subr.bf16.mxu0 %v12511_v43  ;;  %v12586_v43 = vld [vmem:[#allocation9 + $0xbe4] ss:$16 sps:$4 sm:$0xff]  }
 0x42c   : > { %6259 = vmatpush2.bf16.msra.mxu1 %v12506_v57  ;;  %v12589_v57 = vld [vmem:[#allocation9 + $0x9cc] ss:$16 sps:$4 sm:$0xff]  }
 0x42d   : > { %7097 = vmatpush2.bf16.msra.mxu0 %v12509_v13  ;;  %6260 = vmatprep.subr.bf16.mxu1 %v12514_v12  ;;  %v12584_v13 = vld [vmem:[#allocation9 + $0xbe0] ss:$16 sps:$4 sm:$0xff]   ;;  %v12587_v12 = vld [vmem:[#allocation9 + $0x9c8] ss:$16 sps:$4 sm:$0xff]  }
 0x42e   : > { %7098 = vmatprep.subr.bf16.mxu0 %v12517_v54  ;;  %v12592_v54 = vld [vmem:[#allocation9 + $0xbc4] ss:$16 sps:$4 sm:$0xff]  }
 0x430   : > { %6261 = vmatpush2.bf16.msra.mxu1 %v12512_v51  ;;  %v12595_v51 = vld [vmem:[#allocation9 + $0x9ac] ss:$16 sps:$4 sm:$0xff]  }
 0x431   : > { %7099 = vmatpush2.bf16.msra.mxu0 %v12515_v32  ;;  %6262 = vmatprep.subr.bf16.mxu1 %v12520_v18  ;;  %v12590_v32 = vld [vmem:[#allocation9 + $0xbc0] ss:$16 sps:$4 sm:$0xff]   ;;  %v12593_v18 = vld [vmem:[#allocation9 + $0x9a8] ss:$16 sps:$4 sm:$0xff]  }
 0x432   : > { %7100 = vmatprep.subr.bf16.mxu0 %v12523_v14  ;;  %v12598_v14 = vld [vmem:[#allocation9 + $0xba4] ss:$16 sps:$4 sm:$0xff]  }
 0x434   : > { %6263 = vmatpush2.bf16.msra.mxu1 %v12518_v16  ;;  %v12601_v16 = vld [vmem:[#allocation9 + $0x98c] ss:$16 sps:$4 sm:$0xff]  }
 0x435   : > { %7101 = vmatpush2.bf16.msra.mxu0 %v12521_v19  ;;  %6264 = vmatprep.subr.bf16.mxu1 %v12526_v15  ;;  %v12596_v19 = vld [vmem:[#allocation9 + $0xba0] ss:$16 sps:$4 sm:$0xff]   ;;  %v12599_v15 = vld [vmem:[#allocation9 + $0x988] ss:$16 sps:$4 sm:$0xff]  }
 0x436   : > { %7102 = vmatprep.subr.bf16.mxu0 %v12529_v26  ;;  %v12604_v26 = vld [vmem:[#allocation9 + $0xb84] ss:$16 sps:$4 sm:$0xff]  }
 0x438   : > { %6265 = vmatpush2.bf16.msra.mxu1 %v12524_v46  ;;  %v12607_v46 = vld [vmem:[#allocation9 + $0x96c] ss:$16 sps:$4 sm:$0xff]  }
 0x439   : > { %7103 = vmatpush2.bf16.msra.mxu0 %v12527_v44  ;;  %6266 = vmatprep.subr.bf16.mxu1 %v12532_v21  ;;  %v12602_v44 = vld [vmem:[#allocation9 + $0xb80] ss:$16 sps:$4 sm:$0xff]   ;;  %v12605_v21 = vld [vmem:[#allocation9 + $0x968] ss:$16 sps:$4 sm:$0xff]  }
 0x43a   : > { %7158 = vmatprep.subr.bf16.mxu0 %v12535_v38  ;;  %v12610_v38 = vld [vmem:[#allocation9 + $0xb64] ss:$16 sps:$4 sm:$0xff]  }
 0x43c   : > { %6267 = vmatpush2.bf16.msra.mxu1 %v12530_v34  ;;  %7105 = vmatmul.mubr.bf16.vlgmr.msra.gmra.mxu0 %v14197_v22  ;;  %v14208_v34 = vpop.f32.mrf.mxu0 }
 0x43d   : > { %7159 = vmatpush1.bf16.msra.mxu0 %v12533_v5  ;;  %7190 = vmatprep.mubr.bf16.mxu0 %v14189_v56  ;;  %v12550_v56 = vld [vmem:[#allocation9 + $0xaa4] ss:$16 sps:$4 sm:$0xff]   ;;  %v12611_v5 = vld [vmem:[#allocation9 + $0x948] ss:$16 sps:$4 sm:$0xff]  }
 0x43e   : > { %7115 = vmatprep.subr.bf16.mxu1 %v12538_v41  ;;  %7160 = vmatprep.subr.bf16.mxu0 %v12541_v42  ;;  %v12616_v41 = vld [vmem:[#allocation9 + $0xb44] ss:$16 sps:$4 sm:$0xff]   ;;  %v12619_v42 = vld [vmem:[#allocation9 + $0x92c] ss:$16 sps:$4 sm:$0xff]   ;;  %v14210_v49 = vpop.f32.mrf.mxu0 }
 0x43f   : > { %6269 = vmatmul.mubr.bf16.vlgmr.msra.gmra.mxu1 %v14160_v52  ;;  %v14212_v48 = vpop.f32.mrf.mxu1 }
 0x440   : > { %7116 = vmatpush1.bf16.msra.mxu1 %v12536_v0  ;;  %7147 = vmatprep.mubr.bf16.mxu1 %v14205_v60  ;;  %v12614_v0 = vld [vmem:[#allocation9 + $0xb40] ss:$16 sps:$4 sm:$0xff]  }
 0x441   : > { %7161 = vmatpush1.bf16.msra.mxu0 %v12539_v47  ;;  %7117 = vmatprep.subr.bf16.mxu1 %v12544_v55  ;;  %v12617_v47 = vld [vmem:[#allocation9 + $0x928] ss:$16 sps:$4 sm:$0xff]   ;;  %v12622_v55 = vld [vmem:[#allocation9 + $0xb24] ss:$16 sps:$4 sm:$0xff]  }
 0x442   : > { %7162 = vmatprep.subr.bf16.mxu0 %v12547_v53  ;;  %v12625_v53 = vld [vmem:[#allocation9 + $0x90c] ss:$16 sps:$4 sm:$0xff]  }
 0x444   : > { %7118 = vmatpush1.bf16.msra.mxu1 %v12542_v36  ;;  %v14214_v36 = vpop.f32.mrf.mxu0 }
 0x445   : > { %7163 = vmatpush1.bf16.msra.mxu0 %v12545_v3  ;;  %7119 = vmatprep.subr.bf16.mxu1 %v12550_v56  ;;  %v12620_v3 = vld [vmem:[#allocation9 + $0xb20] ss:$16 sps:$4 sm:$0xff]   ;;  %v14216_v56 = vpop.f32.mrf.mxu1 }
 0x446   : > { %7164 = vmatprep.subr.bf16.mxu0 %v12553_v23  ;;  %v12623_v23 = vld [vmem:[#allocation9 + $0x908] ss:$16 sps:$4 sm:$0xff]  }
 0x448   : > { %7120 = vmatpush1.bf16.msra.mxu1 %v12548_v4  ;;  %v12628_v4 = vld [vmem:[#allocation9 + $0xb04] ss:$16 sps:$4 sm:$0xff]  }
 0x449   : > { %7165 = vmatpush1.bf16.msra.mxu0 %v12551_v24  ;;  %7121 = vmatprep.subr.bf16.mxu1 %v12556_v17  ;;  %v14218_v24 = vpop.f32.mrf.mxu0  ;;  %v12626_v17 = vld [vmem:[#allocation9 + $0xb00] ss:$16 sps:$4 sm:$0xff]  }
 0x44a   : > { %7166 = vmatprep.subr.bf16.mxu0 %v12559_v45 }
 0x44b   : > { %v14220_v45 = vpop.f32.mrf.mxu0 }
 0x44c   : > { %7122 = vmatpush1.bf16.msra.mxu1 %v12554_v11  ;;  %v14222_v11 = vpop.f32.mrf.mxu1 }
 0x44d   : > { %7167 = vmatpush1.bf16.msra.mxu0 %v12557_v33  ;;  %7123 = vmatprep.subr.bf16.mxu1 %v12562_v28  ;;  %v12631_v33 = vld [vmem:[#allocation9 + $0xaec] ss:$16 sps:$4 sm:$0xff]   ;;  %v6423_v28 = vrot.slane %v14165_v30, 1  ;;  %v12632_v30 = vld [vmem:[#allocation9 + $0xac8] ss:$16 sps:$4 sm:$0xff]  }
 0x44e   : > { %7168 = vmatprep.subr.bf16.mxu0 %v12565_v63  ;;  %v6422_v63 = vrot.slane %v14160_v52, 1 }
 0x450   : > { %7124 = vmatpush1.bf16.msra.mxu1 %v12560_v35  ;;  %v12629_v35 = vld [vmem:[#allocation9 + $0xae8] ss:$16 sps:$4 sm:$0xff]  }
 0x451   : > { %7169 = vmatpush1.bf16.msra.mxu0 %v12563_v25  ;;  %7125 = vmatprep.subr.bf16.mxu1 %v12568_v50  ;;  %v14227_v25 = vpop.f32.mrf.mxu0  ;;  %v14229_v50 = vpop.f32.mrf.mxu1 }
 0x452   : > { %7170 = vmatprep.subr.bf16.mxu0 %v12571_v37  ;;  %v12634_v37 = vld [vmem:[#allocation9 + $0xacc] ss:$16 sps:$4 sm:$0xff]  }
 0x454   : > { %7126 = vmatpush1.bf16.msra.mxu1 %v12566_v20  ;;  %v14232_v20 = vsel %vm3225_vm2, %v6422_v63, %v6423_v28  ;;  %v12701_v28 = vld [vmem:[#allocation12 + $0x1e0] ss:$16 sps:$4 sm:$0xff]   ;;  %v12706_v63 = vld [vmem:[#allocation12 + $0x1c4] ss:$16 sps:$4 sm:$0xff]  }
 0x455   : > { %7171 = vmatpush1.bf16.msra.mxu0 %v12569_v1  ;;  %7127 = vmatprep.subr.bf16.mxu1 %v12574_v7  ;;  %v12637_v7 = vld [vmem:[#allocation9 + $0xaac] ss:$16 sps:$4 sm:$0xff]  }
 0x456   : > { %7172 = vmatprep.subr.bf16.mxu0 %v12577_v6 }
 0x458   : > { %7128 = vmatpush1.bf16.msra.mxu1 %v12572_v62  ;;  %v12635_v62 = vld [vmem:[#allocation9 + $0xaa8] ss:$16 sps:$4 sm:$0xff]  }
 0x459   : > { %7173 = vmatpush1.bf16.msra.mxu0 %v12575_v40  ;;  %7129 = vmatprep.subr.bf16.mxu1 %v12580_v9 }
 0x45a   : > { %7174 = vmatprep.subr.bf16.mxu0 %v12583_v2  ;;  %v12640_v2 = vld [vmem:[#allocation9 + $0xa8c] ss:$16 sps:$4 sm:$0xff]  }
 0x45c   : > { %7130 = vmatpush1.bf16.msra.mxu1 %v12578_v58 }
 0x45d   : > { %7175 = vmatpush2.bf16.msra.mxu0 %v12581_v29  ;;  %7131 = vmatprep.subr.bf16.mxu1 %v12586_v43  ;;  %v12677_v29 = vld [vmem:[#allocation12 + $0xe0] ss:$16 sps:$4 sm:$0xff]   ;;  %v12679_v43 = vld [vmem:[#allocation12 + $0xe4] ss:$16 sps:$4 sm:$0xff]  }
 0x45e   : > { %7176 = vmatprep.subr.bf16.mxu0 %v12589_v57  ;;  %v12638_v57 = vld [vmem:[#allocation9 + $0xa88] ss:$16 sps:$4 sm:$0xff]  }
 0x460   : > { %7132 = vmatpush2.bf16.msra.mxu1 %v12584_v13  ;;  %v12643_v13 = vld [vmem:[#allocation9 + $0xa6c] ss:$16 sps:$4 sm:$0xff]  }
 0x461   : > { %7177 = vmatpush2.bf16.msra.mxu0 %v12587_v12  ;;  %7133 = vmatprep.subr.bf16.mxu1 %v12592_v54  ;;  %v12680_v12 = vld [vmem:[#allocation12 + $0xc0] ss:$16 sps:$4 sm:$0xff]   ;;  %v12685_v54 = vld [vmem:[#allocation12 + $0xa4] ss:$16 sps:$4 sm:$0xff]  }
 0x462   : > { %7178 = vmatprep.subr.bf16.mxu0 %v12595_v51  ;;  %v12641_v51 = vld [vmem:[#allocation9 + $0xa68] ss:$16 sps:$4 sm:$0xff]  }
 0x464   : > { %7134 = vmatpush2.bf16.msra.mxu1 %v12590_v32  ;;  %v12646_v32 = vld [vmem:[#allocation9 + $0xa4c] ss:$16 sps:$4 sm:$0xff]  }
 0x465   : > { %7179 = vmatpush2.bf16.msra.mxu0 %v12593_v18  ;;  %7135 = vmatprep.subr.bf16.mxu1 %v12598_v14  ;;  %v12683_v18 = vld [vmem:[#allocation12 + $0xa0] ss:$16 sps:$4 sm:$0xff]   ;;  %v12688_v14 = vld [vmem:[#allocation12 + $0x84] ss:$16 sps:$4 sm:$0xff]  }
 0x466   : > { %7180 = vmatprep.subr.bf16.mxu0 %v12601_v16  ;;  %v12644_v16 = vld [vmem:[#allocation9 + $0xa48] ss:$16 sps:$4 sm:$0xff]  }
 0x468   : > { %7136 = vmatpush2.bf16.msra.mxu1 %v12596_v19  ;;  %v12649_v19 = vld [vmem:[#allocation9 + $0xa2c] ss:$16 sps:$4 sm:$0xff]  }
 0x469   : > { %7181 = vmatpush2.bf16.msra.mxu0 %v12599_v15  ;;  %7137 = vmatprep.subr.bf16.mxu1 %v12604_v26  ;;  %v12686_v15 = vld [vmem:[#allocation12 + $0x80] ss:$16 sps:$4 sm:$0xff]   ;;  %v12691_v26 = vld [vmem:[#allocation12 + $0x64] ss:$16 sps:$4 sm:$0xff]  }
 0x46a   : > { %7182 = vmatprep.subr.bf16.mxu0 %v12607_v46  ;;  %v12647_v46 = vld [vmem:[#allocation9 + $0xa28] ss:$16 sps:$4 sm:$0xff]  }
 0x46c   : > { %7138 = vmatpush2.bf16.msra.mxu1 %v12602_v44  ;;  %v12652_v44 = vld [vmem:[#allocation9 + $0xa0c] ss:$16 sps:$4 sm:$0xff]  }
 0x46d   : > { %7183 = vmatpush2.bf16.msra.mxu0 %v12605_v21  ;;  %7139 = vmatprep.subr.bf16.mxu1 %v12610_v38  ;;  %v12689_v21 = vld [vmem:[#allocation12 + $0x60] ss:$16 sps:$4 sm:$0xff]   ;;  %v12694_v38 = vld [vmem:[#allocation12 + $0x44] ss:$16 sps:$4 sm:$0xff]  }
 0x46e   : > { %7184 = vmatprep.subr.bf16.mxu0 %v12613_v8  ;;  %v12650_v8 = vld [vmem:[#allocation9 + $0xa08] ss:$16 sps:$4 sm:$0xff]  }
 0x470   : > { %7140 = vmatpush2.bf16.msra.mxu1 %v12608_v39  ;;  %v12655_v39 = vld [vmem:[#allocation9 + $0xbec] ss:$16 sps:$4 sm:$0xff]  }
 0x471   : > { %7185 = vmatpush2.bf16.msra.mxu0 %v12611_v5  ;;  %7141 = vmatprep.subr.bf16.mxu1 %v12616_v41  ;;  %v12692_v5 = vld [vmem:[#allocation12 + $0x40] ss:$16 sps:$4 sm:$0xff]   ;;  %v12697_v41 = vld [vmem:[#allocation12 + $0x24] ss:$16 sps:$4 sm:$0xff]  }
 0x472   : > { %7186 = vmatprep.subr.bf16.mxu0 %v12619_v42  ;;  %v12653_v42 = vld [vmem:[#allocation9 + $0xbe8] ss:$16 sps:$4 sm:$0xff]  }
 0x474   : > { %7142 = vmatpush2.bf16.msra.mxu1 %v12614_v0  ;;  %v12658_v0 = vld [vmem:[#allocation9 + $0xbcc] ss:$16 sps:$4 sm:$0xff]  }
 0x475   : > { %7187 = vmatpush2.bf16.msra.mxu0 %v12617_v47  ;;  %7143 = vmatprep.subr.bf16.mxu1 %v12622_v55  ;;  %v12695_v47 = vld [vmem:[#allocation12 + $0x20] ss:$16 sps:$4 sm:$0xff]   ;;  %v12700_v55 = vld [vmem:[#allocation12 + $0x4] ss:$16 sps:$4 sm:$0xff]  }
 0x476   : > { %7188 = vmatprep.subr.bf16.mxu0 %v12625_v53  ;;  %v12656_v53 = vld [vmem:[#allocation9 + $0xbc8] ss:$16 sps:$4 sm:$0xff]  }
 0x478   : > { %7144 = vmatpush2.bf16.msra.mxu1 %v12620_v3  ;;  %v12661_v3 = vld [vmem:[#allocation9 + $0xbac] ss:$16 sps:$4 sm:$0xff]  }
 0x479   : > { %7189 = vmatpush2.bf16.msra.mxu0 %v12623_v23  ;;  %7145 = vmatprep.subr.bf16.mxu1 %v12628_v4  ;;  %v12698_v23 = vld [vmem:[#allocation12] ss:$16 sps:$4 sm:$0xff]   ;;  %v12703_v4 = vld [vmem:[#allocation12 + $0x1e4] ss:$16 sps:$4 sm:$0xff]  }
 0x47a   : > { %8092 = vmatprep.subr.bf16.mxu0 %v12679_v43  ;;  %v12673_v43 = vld [vmem:[#allocation9 + $0xb2c] ss:$16 sps:$4 sm:$0xff]  }
 0x47c   : > { %7146 = vmatpush2.bf16.msra.mxu1 %v12626_v17  ;;  %7191 = vmatmul.mubr.bf16.vlgmr.msra.gmra.mxu0 %v14197_v22  ;;  %v14238_v22 = vpop.f32.mrf.mxu0  ;;  %v12659_v17 = vld [vmem:[#allocation9 + $0xba8] ss:$16 sps:$4 sm:$0xff]  }
 0x47d   : > { %7201 = vmatprep.subr.bf16.mxu1 %v12631_v33  ;;  %8093 = vmatpush1.bf16.msra.mxu0 %v12677_v29  ;;  %v12664_v33 = vld [vmem:[#allocation9 + $0xb8c] ss:$16 sps:$4 sm:$0xff]   ;;  %v12668_v29 = vld [vmem:[#allocation9 + $0xb48] ss:$16 sps:$4 sm:$0xff]  }
 0x47e   : > { %v5421_v40 = vpop.f32.mrf.mxu0 }
 0x47f   : > { %v14234_v1 = vpop.f32.mrf.mxu1  ;;  %7148 = vmatmul.mubr.bf16.vlgmr.msra.gmra.mxu1 %v14232_v20 }
 0x480   : > { %7202 = vmatpush1.bf16.msra.mxu1 %v12629_v35  ;;  %7233 = vmatprep.mubr.bf16.mxu1 %v14205_v60  ;;  %v12682_v60 = vld [vmem:[#allocation12 + $0xc4] ss:$16 sps:$4 sm:$0xff]  }
 0x481   : > { %v14240_v52 = vpop.f32.mrf.mxu1  ;;  %7203 = vmatprep.subr.bf16.mxu1 %v12634_v37  ;;  %8094 = vmatprep.subr.bf16.mxu0 %v12682_v60  ;;  %v12662_v35 = vld [vmem:[#allocation9 + $0xb88] ss:$16 sps:$4 sm:$0xff]   ;;  %v12667_v37 = vld [vmem:[#allocation9 + $0xb6c] ss:$16 sps:$4 sm:$0xff]  }
 0x482   : > { %8095 = vmatpush1.bf16.msra.mxu0 %v12680_v12 }
 0x483   : > { %v14242_v6 = vpop.f32.mrf.mxu1  ;;  %8096 = vmatprep.subr.bf16.mxu0 %v12685_v54  ;;  %v12674_v54 = vld [vmem:[#allocation9 + $0xb08] ss:$16 sps:$4 sm:$0xff]  }
 0x484   : > { %7204 = vmatpush1.bf16.msra.mxu1 %v12632_v30  ;;  %v12704_v30 = vld [vmem:[#allocation12 + $0x1c0] ss:$16 sps:$4 sm:$0xff]  }
 0x485   : > { %v5464_v9 = vpop.f32.mrf.mxu1  ;;  %7205 = vmatprep.subr.bf16.mxu1 %v12637_v7  ;;  %v12709_v7 = vld [vmem:[#allocation12 + $0x1a4] ss:$16 sps:$4 sm:$0xff]  }
 0x486   : > { %v14244_v58 = vadd.f32 %v5464_v9, %v5421_v40  ;;  %8097 = vmatpush1.bf16.msra.mxu0 %v12683_v18  ;;  %v12670_v40 = vld [vmem:[#allocation9 + $0xb4c] ss:$16 sps:$4 sm:$0xff]   ;;  %v12707_v9 = vld [vmem:[#allocation12 + $0x1a0] ss:$16 sps:$4 sm:$0xff]  }
 0x487   : > { %8098 = vmatprep.subr.bf16.mxu0 %v12688_v14  ;;  %v12710_v14 = vld [vmem:[#allocation12 + $0x180] ss:$16 sps:$4 sm:$0xff]  }
 0x488   : > { %7206 = vmatpush1.bf16.msra.mxu1 %v12635_v62  ;;  %v12665_v62 = vld [vmem:[#allocation9 + $0xb68] ss:$16 sps:$4 sm:$0xff]  }
 0x489   : > { %7207 = vmatprep.subr.bf16.mxu1 %v12640_v2  ;;  %v14246_v2 = vpop.f32.mrf.mxu0 }
 0x48a   : > { %8099 = vmatpush1.bf16.msra.mxu0 %v12686_v15 }
 0x48b   : > { %8100 = vmatprep.subr.bf16.mxu0 %v12691_v26  ;;  %v14248_v60 = vpop.f32.mrf.mxu0 }
 0x48c   : > { %7208 = vmatpush1.bf16.msra.mxu1 %v12638_v57  ;;  %v12671_v57 = vld [vmem:[#allocation9 + $0xb28] ss:$16 sps:$4 sm:$0xff]  }
 0x48d   : > { %7209 = vmatprep.subr.bf16.mxu1 %v12643_v13  ;;  %v12676_v13 = vld [vmem:[#allocation9 + $0xb0c] ss:$16 sps:$4 sm:$0xff]   ;;  %v14250_v12 = vpop.f32.mrf.mxu0 }
 0x48e   : > { %8101 = vmatpush1.bf16.msra.mxu0 %v12689_v21  ;;  %v12715_v21 = vld [vmem:[#allocation12 + $0x164] ss:$16 sps:$4 sm:$0xff]  }
 0x48f   : > { %8102 = vmatprep.subr.bf16.mxu0 %v12694_v38 }
 0x490   : > { %7210 = vmatpush1.bf16.msra.mxu1 %v12641_v51  ;;  %v14252_v51 = vpop.f32.mrf.mxu0 }
 0x491   : > { %7211 = vmatprep.subr.bf16.mxu1 %v12646_v32  ;;  %v5459_v32 = vadd.f32 %v14234_v1, %v14220_v45 }
 0x492   : > { %8103 = vmatpush1.bf16.msra.mxu0 %v12692_v5  ;;  %v12724_v5 = vld [vmem:[#allocation12 + $0x104] ss:$16 sps:$4 sm:$0xff]  }
 0x493   : > { %8104 = vmatprep.subr.bf16.mxu0 %v12697_v41  ;;  %v12727_v41 = vld [vmem:[#allocation12 + $0x2e4] ss:$16 sps:$4 sm:$0xff]  }
 0x494   : > { %7212 = vmatpush1.bf16.msra.mxu1 %v12644_v16  ;;  %v12712_v16 = vld [vmem:[#allocation12 + $0x184] ss:$16 sps:$4 sm:$0xff]  }
 0x495   : > { %7213 = vmatprep.subr.bf16.mxu1 %v12649_v19  ;;  %v5461_v19 = vadd.f32 %v14240_v52, %v14227_v25  ;;  %v12718_v52 = vld [vmem:[#allocation12 + $0x144] ss:$16 sps:$4 sm:$0xff]  }
 0x496   : > { %8105 = vmatpush1.bf16.msra.mxu0 %v12695_v47  ;;  %v12733_v47 = vld [vmem:[#allocation12 + $0x2c4] ss:$16 sps:$4 sm:$0xff]  }
 0x497   : > { %8106 = vmatprep.subr.bf16.mxu0 %v12700_v55  ;;  %v12737_v55 = vld [vmem:[#allocation12 + $0x2a0] ss:$16 sps:$4 sm:$0xff]  }
 0x498   : > { %7214 = vmatpush1.bf16.msra.mxu1 %v12647_v46  ;;  %v5463_v46 = vadd.f32 %v14242_v6, %v14238_v22  ;;  %v12721_v22 = vld [vmem:[#allocation12 + $0x124] ss:$16 sps:$4 sm:$0xff]   ;;  %v12719_v6 = vld [vmem:[#allocation12 + $0x120] ss:$16 sps:$4 sm:$0xff]  }
 0x499   : > { %7215 = vmatprep.subr.bf16.mxu1 %v12652_v44 }
 0x49a   : > { %8107 = vmatpush1.bf16.msra.mxu0 %v12698_v23  ;;  %v12745_v23 = vld [vmem:[#allocation12 + $0x284] ss:$16 sps:$4 sm:$0xff]  }
 0x49b   : > { %8108 = vmatprep.subr.bf16.mxu0 %v12703_v4  ;;  %v12749_v4 = vld [vmem:[#allocation12 + $0x260] ss:$16 sps:$4 sm:$0xff]  }
 0x49c   : > { %7216 = vmatpush1.bf16.msra.mxu1 %v12650_v8  ;;  %v12713_v8 = vld [vmem:[#allocation12 + $0x160] ss:$16 sps:$4 sm:$0xff]  }
 0x49d   : > { %7217 = vmatprep.subr.bf16.mxu1 %v12655_v39  ;;  %v12716_v39 = vld [vmem:[#allocation12 + $0x140] ss:$16 sps:$4 sm:$0xff]  }
 0x49e   : > { %8109 = vmatpush2.bf16.msra.mxu0 %v12701_v28  ;;  %v12757_v28 = vld [vmem:[#allocation12 + $0x244] ss:$16 sps:$4 sm:$0xff]  }
 0x49f   : > { %8110 = vmatprep.subr.bf16.mxu0 %v12706_v63  ;;  %v12761_v63 = vld [vmem:[#allocation12 + $0x220] ss:$16 sps:$4 sm:$0xff]  }
 0x4a0   : > { %7218 = vmatpush2.bf16.msra.mxu1 %v12653_v42  ;;  %v12730_v42 = vld [vmem:[#allocation12 + $0xec] ss:$16 sps:$4 sm:$0xff]  }
 0x4a1   : > { %7219 = vmatprep.subr.bf16.mxu1 %v12658_v0  ;;  %v12725_v0 = vld [vmem:[#allocation12 + $0x2e0] ss:$16 sps:$4 sm:$0xff]  }
 0x4a2   : > { %8111 = vmatpush2.bf16.msra.mxu0 %v12704_v30  ;;  %v12769_v30 = vld [vmem:[#allocation12 + $0x204] ss:$16 sps:$4 sm:$0xff]  }
 0x4a3   : > { %8112 = vmatprep.subr.bf16.mxu0 %v12709_v7  ;;  %v12773_v7 = vld [vmem:[#allocation12 + $0x3e0] ss:$16 sps:$4 sm:$0xff]  }
 0x4a4   : > { %7220 = vmatpush2.bf16.msra.mxu1 %v12656_v53  ;;  %v12739_v53 = vld [vmem:[#allocation12 + $0x2a4] ss:$16 sps:$4 sm:$0xff]  }
 0x4a5   : > { %7221 = vmatprep.subr.bf16.mxu1 %v12661_v3  ;;  %v12743_v3 = vld [vmem:[#allocation12 + $0x280] ss:$16 sps:$4 sm:$0xff]  }
 0x4a6   : > { %8113 = vmatpush2.bf16.msra.mxu0 %v12707_v9  ;;  %v12779_v9 = vld [vmem:[#allocation12 + $0x3c0] ss:$16 sps:$4 sm:$0xff]  }
 0x4a7   : > { %8114 = vmatprep.subr.bf16.mxu0 %v12712_v16 }
 0x4a8   : > { %7222 = vmatpush2.bf16.msra.mxu1 %v12659_v17  ;;  %v12751_v17 = vld [vmem:[#allocation12 + $0x264] ss:$16 sps:$4 sm:$0xff]  }
 0x4a9   : > { %7223 = vmatprep.subr.bf16.mxu1 %v12664_v33  ;;  %v12755_v33 = vld [vmem:[#allocation12 + $0x240] ss:$16 sps:$4 sm:$0xff]  }
 0x4aa   : > { %8115 = vmatpush2.bf16.msra.mxu0 %v12710_v14 }
 0x4ab   : > { %8116 = vmatprep.subr.bf16.mxu0 %v12715_v21  ;;  %v12797_v21 = vld [vmem:[#allocation12 + $0x360] ss:$16 sps:$4 sm:$0xff]  }
 0x4ac   : > { %7224 = vmatpush2.bf16.msra.mxu1 %v12662_v35  ;;  %v12763_v35 = vld [vmem:[#allocation12 + $0x224] ss:$16 sps:$4 sm:$0xff]  }
 0x4ad   : > { %7225 = vmatprep.subr.bf16.mxu1 %v12667_v37  ;;  %v12767_v37 = vld [vmem:[#allocation12 + $0x200] ss:$16 sps:$4 sm:$0xff]  }
 0x4ae   : > { %8117 = vmatpush2.bf16.msra.mxu0 %v12713_v8 }
 0x4af   : > { %8118 = vmatprep.subr.bf16.mxu0 %v12718_v52 }
 0x4b0   : > { %7226 = vmatpush2.bf16.msra.mxu1 %v12665_v62  ;;  %v12775_v62 = vld [vmem:[#allocation12 + $0x3e4] ss:$16 sps:$4 sm:$0xff]  }
 0x4b1   : > { %7227 = vmatprep.subr.bf16.mxu1 %v12670_v40 }
 0x4b2   : > { %8119 = vmatpush2.bf16.msra.mxu0 %v12716_v39  ;;  %v12805_v39 = vld [vmem:[#allocation12 + $0x344] ss:$16 sps:$4 sm:$0xff]  }
 0x4b3   : > { %8120 = vmatprep.subr.bf16.mxu0 %v12721_v22 }
 0x4b4   : > { %7228 = vmatpush2.bf16.msra.mxu1 %v12668_v29  ;;  %v12781_v29 = vld [vmem:[#allocation12 + $0x3c4] ss:$16 sps:$4 sm:$0xff]  }
 0x4b5   : > { %7229 = vmatprep.subr.bf16.mxu1 %v12673_v43 }
 0x4b6   : > { %8121 = vmatpush2.bf16.msra.mxu0 %v12719_v6  ;;  %v12811_v6 = vld [vmem:[#allocation12 + $0x324] ss:$16 sps:$4 sm:$0xff]  }
 0x4b7   : > { %8122 = vmatprep.subr.bf16.mxu0 %v12724_v5  ;;  %v12817_v5 = vld [vmem:[#allocation12 + $0x304] ss:$16 sps:$4 sm:$0xff]  }
 0x4b8   : > { %7230 = vmatpush2.bf16.msra.mxu1 %v12671_v57  ;;  %v12785_v57 = vld [vmem:[#allocation12 + $0x3a0] ss:$16 sps:$4 sm:$0xff]  }
 0x4b9   : > { %7231 = vmatprep.subr.bf16.mxu1 %v12676_v13  ;;  %v12787_v13 = vld [vmem:[#allocation12 + $0x3a4] ss:$16 sps:$4 sm:$0xff]  }
 0x4bc   : > { %7232 = vmatpush2.bf16.msra.mxu1 %v12674_v54  ;;  %v6227_v18 = vpop.f32.mrf.mxu0 }
 0x4bd   : > { %v14258_v15 = vadd.f32 %v6227_v18, %v5459_v32  ;;  %8135 = vmatprep.subr.bf16.mxu1 %v12727_v41  ;;  %v12791_v32 = vld [vmem:[#allocation12 + $0x380] ss:$16 sps:$4 sm:$0xff]   ;;  %v12793_v18 = vld [vmem:[#allocation12 + $0x384] ss:$16 sps:$4 sm:$0xff]   ;;  %v12823_v41 = vld [vmem:[#allocation12 + $0x2ec] ss:$16 sps:$4 sm:$0xff]  }
 0x4be   : > { %v6229_v26 = vpop.f32.mrf.mxu0 }
 0x4bf   : > { %v14262_v44 = vadd.f32 %v6229_v26, %v5461_v19  ;;  %7234 = vmatmul.mubr.bf16.vlgmr.msra.gmra.mxu1 %v14232_v20  ;;  %v12722_v20 = vld [vmem:[#allocation12 + $0x100] ss:$16 sps:$4 sm:$0xff]   ;;  %v6184_v40 = vpop.f32.mrf.mxu1 }
 0x4c0   : > { %v6231_v45 = vpop.f32.mrf.mxu0  ;;  %8123 = vmatpush2.bf16.msra.mxu0 %v12722_v20  ;;  %8136 = vmatpush1.bf16.msra.mxu1 %v12725_v0  ;;  %v12809_v20 = vld [vmem:[#allocation12 + $0x320] ss:$16 sps:$4 sm:$0xff]  }
 0x4c1   : > { %v14265_v1 = vadd.f32 %v6231_v45, %v5463_v46  ;;  %8178 = vmatprep.subr.bf16.mxu0 %v12730_v42  ;;  %8137 = vmatprep.subr.bf16.mxu1 %v12733_v47  ;;  %v6186_v43 = vpop.f32.mrf.mxu1  ;;  %v12799_v46 = vld [vmem:[#allocation12 + $0x364] ss:$16 sps:$4 sm:$0xff]   ;;  %v5373_v42 = vadd.f32 %v14212_v48, %v14208_v34 }
 0x4c2   : > { %v6233_v38 = vpop.f32.mrf.mxu0 }
 0x4c3   : > { %v14268_v25 = vadd.f32 %v6233_v38, %v14244_v58  ;;  %v12731_v58 = vld [vmem:[#allocation12 + $0x2c0] ss:$16 sps:$4 sm:$0xff]   ;;  %v6188_v54 = vpop.f32.mrf.mxu1 }
 0x4c4   : > { %8138 = vmatpush1.bf16.msra.mxu1 %v12731_v58  ;;  %v6142_v58 = vadd.f32 %v14246_v2, %v5373_v42  ;;  %v12754_v42 = vld [vmem:[#allocation12 + $0x6c] ss:$16 sps:$4 sm:$0xff]  }
 0x4c5   : > { %8139 = vmatprep.subr.bf16.mxu1 %v12739_v53  ;;  %v6190_v14 = vpop.f32.mrf.mxu1 }
 0x4c8   : > { %8140 = vmatpush1.bf16.msra.mxu1 %v12737_v55  ;;  %v5377_v55 = vadd.f32 %v14222_v11, %v14214_v36 }
 0x4c9   : > { %8141 = vmatprep.subr.bf16.mxu1 %v12745_v23  ;;  %v14290_v23 = vld [vmem:[#allocation11] sm:$0xf] }
 0x4ca   : > { %v7261_v2 = vrot.slane %v14290_v23, %v14109_v10  ;;  %v7257_v36 = vrot.slane %v14290_v23, %v14101_v61 }
 0x4cc   : > { %8142 = vmatpush1.bf16.msra.mxu1 %v12743_v3 }
 0x4cd   : > { %8143 = vmatprep.subr.bf16.mxu1 %v12751_v17  ;;  %v6185_v17 = vadd.f32 %v6184_v40, %v6142_v58  ;;  %v12758_v58 = vld [vmem:[#allocation12 + $0x48] ss:$16 sps:$4 sm:$0xff]  }
 0x4d0   : > { %8144 = vmatpush1.bf16.msra.mxu1 %v12749_v4  ;;  %v5379_v4 = vadd.f32 %v14229_v50, %v14218_v24 }
 0x4d1   : > { %8145 = vmatprep.subr.bf16.mxu1 %v12757_v28 }
 0x4d4   : > { %8146 = vmatpush1.bf16.msra.mxu1 %v12755_v33  ;;  %v6146_v33 = vadd.f32 %v14250_v12, %v5377_v55  ;;  %v12764_v55 = vld [vmem:[#allocation12 + $0x28] ss:$16 sps:$4 sm:$0xff]  }
 0x4d5   : > { %8147 = vmatprep.subr.bf16.mxu1 %v12763_v35 }
 0x4d8   : > { %8148 = vmatpush1.bf16.msra.mxu1 %v12761_v63  ;;  %v6189_v63 = vadd.f32 %v6188_v54, %v6146_v33  ;;  %v737_v54 = vld [vmem:[%s13844_s5 + $0x8] sm:$0xff]  ;;  %v12790_v33 = vld [vmem:[#allocation12 + $0x1ac] ss:$16 sps:$4 sm:$0xff]  }
 0x4d9   : > { %8149 = vmatprep.subr.bf16.mxu1 %v12769_v30 }
 0x4dc   : > { %8150 = vmatpush1.bf16.msra.mxu1 %v12767_v37 }
 0x4dd   : > { %8151 = vmatprep.subr.bf16.mxu1 %v12775_v62 }
 0x4e0   : > { %8152 = vmatpush2.bf16.msra.mxu1 %v12773_v7 }
 0x4e1   : > { %8153 = vmatprep.subr.bf16.mxu1 %v12781_v29 }
 0x4e4   : > { %8154 = vmatpush2.bf16.msra.mxu1 %v12779_v9 }
 0x4e5   : > { %8155 = vmatprep.subr.bf16.mxu1 %v12787_v13 }
 0x4e8   : > { %8156 = vmatpush2.bf16.msra.mxu1 %v12785_v57  ;;  %v740_v57 = vld [vmem:[%s13844_s5 + $0x20] sm:$0xff] }
 0x4e9   : > { %8157 = vmatprep.subr.bf16.mxu1 %v12793_v18  ;;  %v741_v18 = vld [vmem:[%s13844_s5 + $0x28] sm:$0xff] }
 0x4ec   : > { %8158 = vmatpush2.bf16.msra.mxu1 %v12791_v32 }
 0x4ed   : > { %8159 = vmatprep.subr.bf16.mxu1 %v12799_v46 }
 0x4f0   : > { %8160 = vmatpush2.bf16.msra.mxu1 %v12797_v21 }
 0x4f1   : > { %8161 = vmatprep.subr.bf16.mxu1 %v12805_v39  ;;  %v12728_v39 = vld [vmem:[#allocation12 + $0xe8] ss:$16 sps:$4 sm:$0xff]  }
 0x4ff   : > { %v6270_v16 = vpop.f32.mrf.mxu1 }
 0x500   : > { %v14271_v19 = vadd.f32 %v6270_v16, %v14258_v15  ;;  %v12803_v15 = vld [vmem:[#allocation12 + $0x340] ss:$16 sps:$4 sm:$0xff]   ;;  %v736_v16 = vld [vmem:[%s13844_s5] sm:$0xff] }
 0x501   : > { %v6272_v26 = vpop.f32.mrf.mxu1  ;;  %8162 = vmatpush2.bf16.msra.mxu1 %v12803_v15 }
 0x502   : > { %v14274_v45 = vadd.f32 %v6272_v26, %v14262_v44  ;;  %8163 = vmatprep.subr.bf16.mxu1 %v12811_v6  ;;  %v12815_v44 = vld [vmem:[#allocation12 + $0x300] ss:$16 sps:$4 sm:$0xff]   ;;  %v12736_v6 = vld [vmem:[#allocation12 + $0xcc] ss:$16 sps:$4 sm:$0xff]  }
 0x503   : > { %v6274_v38 = vpop.f32.mrf.mxu1 }
 0x504   : > { %v14277_v8 = vadd.f32 %v6274_v38, %v14265_v1  ;;  %v7106_v1 = vpop.f32.mrf.mxu0 }
 0x505   : > { %v6276_v52 = vpop.f32.mrf.mxu1  ;;  %8164 = vmatpush2.bf16.msra.mxu1 %v12809_v20  ;;  %v12734_v20 = vld [vmem:[#allocation12 + $0xc8] ss:$16 sps:$4 sm:$0xff]  }
 0x506   : > { %v14280_v22 = vadd.f32 %v6276_v52, %v14268_v25  ;;  %8165 = vmatprep.subr.bf16.mxu1 %v12817_v5  ;;  %v7108_v0 = vpop.f32.mrf.mxu0  ;;  %v5375_v25 = vadd.f32 %v14216_v56, %v14210_v49  ;;  %v12740_v5 = vld [vmem:[#allocation12 + $0xa8] ss:$16 sps:$4 sm:$0xff]  }
 0x508   : > { %v6144_v53 = vadd.f32 %v14248_v60, %v5375_v25  ;;  %v7110_v34 = vpop.f32.mrf.mxu0  ;;  %v6148_v60 = vadd.f32 %v14252_v51, %v5379_v4  ;;  %v12760_v25 = vld [vmem:[#allocation12 + $0x4c] ss:$16 sps:$4 sm:$0xff]  }
 0x509   : > { %8166 = vmatpush2.bf16.msra.mxu1 %v12815_v44  ;;  %v12742_v44 = vld [vmem:[#allocation12 + $0xac] ss:$16 sps:$4 sm:$0xff]  }
 0x50a   : > { %8221 = vmatprep.subr.bf16.mxu1 %v12823_v41  ;;  %v6187_v49 = vadd.f32 %v6186_v43, %v6144_v53  ;;  %v7112_v35 = vpop.f32.mrf.mxu0  ;;  %v6191_v37 = vadd.f32 %v6190_v14, %v6148_v60  ;;  %v12748_v41 = vld [vmem:[#allocation12 + $0x8c] ss:$16 sps:$4 sm:$0xff]  }
 0x50b   : > { %v12772_v53 = vld [vmem:[#allocation12 + $0xc] ss:$16 sps:$4 sm:$0xff]  }
 0x50c   : > { %v12778_v4 = vld [vmem:[#allocation12 + $0x1ec] ss:$16 sps:$4 sm:$0xff]  }
 0x53f   : > { %v7149_v47 = vpop.f32.mrf.mxu1 }
 0x540   : > { %v7150_v3 = vadd.f32 %v7149_v47, %v7106_v1  ;;  %v12746_v1 = vld [vmem:[#allocation12 + $0x88] ss:$16 sps:$4 sm:$0xff]   ;;  %v12766_v47 = vld [vmem:[#allocation12 + $0x2c] ss:$16 sps:$4 sm:$0xff]  }
 0x541   : > { %v7151_v48 = vpop.f32.mrf.mxu1 }
 0x542   : > { %v7152_v56 = vadd.f32 %v7151_v48, %v7108_v0  ;;  %v7244_v28 = vadd.f32 %v7150_v3, %v6185_v17  ;;  %v12752_v0 = vld [vmem:[#allocation12 + $0x68] ss:$16 sps:$4 sm:$0xff]  }
 0x543   : > { %v7153_v11 = vpop.f32.mrf.mxu1  ;;  %v12770_v3 = vld [vmem:[#allocation12 + $0x8] ss:$16 sps:$4 sm:$0xff]  }
 0x544   : > { %v7245_v24 = vadd.f32 %v7152_v56, %v6187_v49  ;;  %v7154_v50 = vadd.f32 %v7153_v11, %v7110_v34  ;;  %v7274_v40 = vadd.f32 %v7257_v36, %v7244_v28  ;;  %v12776_v17 = vld [vmem:[#allocation12 + $0x1e8] ss:$16 sps:$4 sm:$0xff]   ;;  %v12784_v34 = vld [vmem:[#allocation12 + $0x1cc] ss:$16 sps:$4 sm:$0xff]   ;;  %v7192_v56 = vpop.f32.mrf.mxu0 }
 0x545   : > { %v7155_v12 = vpop.f32.mrf.mxu1  ;;  %v12782_v48 = vld [vmem:[#allocation12 + $0x1c8] ss:$16 sps:$4 sm:$0xff]   ;;  %v12802_v11 = vld [vmem:[#allocation12 + $0x16c] ss:$16 sps:$4 sm:$0xff]  }
 0x546   : > { %v7275_v30 = vadd.f32 %v7261_v2, %v7245_v24  ;;  %v7248_v7 = vadd.f32 %v7154_v50, %v6189_v63  ;;  %v7156_v62 = vadd.f32 %v7155_v12, %v7112_v35  ;;  %v7282_v51 = vmul.f32 0.1, %v7274_v40  ;;  %v12788_v49 = vld [vmem:[#allocation12 + $0x1a8] ss:$16 sps:$4 sm:$0xff]   ;;  %v12808_v12 = vld [vmem:[#allocation12 + $0x14c] ss:$16 sps:$4 sm:$0xff]  }
 0x547   : > { %v12794_v28 = vld [vmem:[#allocation12 + $0x188] ss:$16 sps:$4 sm:$0xff]  }
 0x548   : > { %v7278_v9 = vadd.f32 %v7257_v36, %v7248_v7  ;;  %v7249_v29 = vadd.f32 %v7156_v62, %v6191_v37  ;;  %v7283_v43 = vmul.f32 0.1, %v7275_v30  ;;  %v14310_v38 = vadd.f32 %v7282_v51, %v736_v16  ;;  %v7194_v36 = vpop.f32.mrf.mxu0  ;;  %v12800_v24 = vld [vmem:[#allocation12 + $0x168] ss:$16 sps:$4 sm:$0xff]  }
 0x549   : > { %v7269_v30 = vrot.slane %v14290_v23, %v14148_v59  ;;  %v7265_v62 = vrot.slane %v14290_v23, %v14145_v31 }
 0x54a   : > { %v7286_v13 = vmul.f32 0.1, %v7278_v9  ;;  %v7279_v32 = vadd.f32 %v7261_v2, %v7249_v29  ;;  %v14306_v21 = vadd.f32 %v7283_v43, %v737_v54  ;;  %v12796_v2 = vld [vmem:[#allocation12 + $0x18c] ss:$16 sps:$4 sm:$0xff]   ;;  %v7196_v50 = vpop.f32.mrf.mxu0  ;;  %v12806_v43 = vld [vmem:[#allocation12 + $0x148] ss:$16 sps:$4 sm:$0xff]  }
 0x54c   : > { %v7287_v26 = vmul.f32 0.1, %v7279_v32  ;;  %v14304_v46 = vadd.f32 %v7286_v13, %v740_v57  ;;  %v7198_v57 = vpop.f32.mrf.mxu0  ;;  %v12814_v32 = vld [vmem:[#allocation12 + $0x12c] ss:$16 sps:$4 sm:$0xff]  }
 0x54e   : > { %v14308_v14 = vadd.f32 %v7287_v26, %v741_v18  ;;  %v14316_v15 = vpack.c.bf16 %v14304_v46, %v14310_v38  ;;  %v12820_v26 = vld [vmem:[#allocation12 + $0x10c] ss:$16 sps:$4 sm:$0xff]  }
 0x550   : > { %v7299_v52 = vpack.c.bf16 %v14308_v14, %v14306_v21 }
 0x552   : > { %8124 = vmatprep.mubr.bf16.mxu0 %v7299_v52 }
 0x553   : > { %8125 = vmatmul.mubr.bf16.vlgmr.msra.gmra.mxu0 %v14316_v15 }
 0x554   : > { %8179 = vmatpush1.bf16.msra.mxu0 %v12728_v39  ;;  %8210 = vmatprep.mubr.bf16.mxu0 %v7299_v52  ;;  %v742_v39 = vld [vmem:[%s13844_s5 + $0x30] sm:$0xff] }
 0x555   : > { %8180 = vmatprep.subr.bf16.mxu0 %v12736_v6 }
 0x558   : > { %8181 = vmatpush1.bf16.msra.mxu0 %v12734_v20 }
 0x559   : > { %8182 = vmatprep.subr.bf16.mxu0 %v12742_v44 }
 0x55c   : > { %8183 = vmatpush1.bf16.msra.mxu0 %v12740_v5  ;;  %v739_v5 = vld [vmem:[%s13844_s5 + $0x18] sm:$0xff] }
 0x55d   : > { %8184 = vmatprep.subr.bf16.mxu0 %v12748_v41  ;;  %v743_v41 = vld [vmem:[%s13844_s5 + $0x38] sm:$0xff] }
 0x560   : > { %8185 = vmatpush1.bf16.msra.mxu0 %v12746_v1  ;;  %v738_v1 = vld [vmem:[%s13844_s5 + $0x10] sm:$0xff] }
 0x561   : > { %8186 = vmatprep.subr.bf16.mxu0 %v12754_v42 }
 0x564   : > { %8187 = vmatpush1.bf16.msra.mxu0 %v12752_v0 }
 0x565   : > { %8188 = vmatprep.subr.bf16.mxu0 %v12760_v25 }
 0x568   : > { %8189 = vmatpush1.bf16.msra.mxu0 %v12758_v58 }
 0x569   : > { %8190 = vmatprep.subr.bf16.mxu0 %v12766_v47 }
 0x56c   : > { %8191 = vmatpush1.bf16.msra.mxu0 %v12764_v55  ;;  %v12821_v55 = vld [vmem:[#allocation12 + $0x2e8] ss:$16 sps:$4 sm:$0xff]  }
 0x56d   : > { %8192 = vmatprep.subr.bf16.mxu0 %v12772_v53 }
 0x570   : > { %8193 = vmatpush1.bf16.msra.mxu0 %v12770_v3  ;;  %v12826_v3 = vld [vmem:[#allocation12 + $0x2cc] ss:$16 sps:$4 sm:$0xff]  }
 0x571   : > { %8194 = vmatprep.subr.bf16.mxu0 %v12778_v4  ;;  %v12824_v4 = vld [vmem:[#allocation12 + $0x2c8] ss:$16 sps:$4 sm:$0xff]  }
 0x574   : > { %8195 = vmatpush2.bf16.msra.mxu0 %v12776_v17  ;;  %v12829_v17 = vld [vmem:[#allocation12 + $0x2ac] ss:$16 sps:$4 sm:$0xff]  }
 0x575   : > { %8196 = vmatprep.subr.bf16.mxu0 %v12784_v34  ;;  %v12827_v34 = vld [vmem:[#allocation12 + $0x2a8] ss:$16 sps:$4 sm:$0xff]  }
 0x578   : > { %8197 = vmatpush2.bf16.msra.mxu0 %v12782_v48  ;;  %v12832_v48 = vld [vmem:[#allocation12 + $0x28c] ss:$16 sps:$4 sm:$0xff]  }
 0x579   : > { %8198 = vmatprep.subr.bf16.mxu0 %v12790_v33  ;;  %v12869_v33 = vld [vmem:[#allocation15 + $0xe0] ss:$16 sps:$4 sm:$0xff]  }
 0x57c   : > { %8199 = vmatpush2.bf16.msra.mxu0 %v12788_v49  ;;  %v12871_v49 = vld [vmem:[#allocation15 + $0xe4] ss:$16 sps:$4 sm:$0xff]  }
 0x57d   : > { %8200 = vmatprep.subr.bf16.mxu0 %v12796_v2  ;;  %v12830_v2 = vld [vmem:[#allocation12 + $0x288] ss:$16 sps:$4 sm:$0xff]  }
 0x57f   : > { %v7235_v60 = vpop.f32.mrf.mxu1 }
 0x580   : > { %v7236_v63 = vadd.f32 %v7235_v60, %v7192_v56  ;;  %8201 = vmatpush2.bf16.msra.mxu0 %v12794_v28  ;;  %v12874_v56 = vld [vmem:[#allocation15 + $0xc4] ss:$16 sps:$4 sm:$0xff]   ;;  %v12835_v28 = vld [vmem:[#allocation12 + $0x26c] ss:$16 sps:$4 sm:$0xff]  }
 0x581   : > { %v7237_v35 = vpop.f32.mrf.mxu1  ;;  %8202 = vmatprep.subr.bf16.mxu0 %v12802_v11  ;;  %v12833_v11 = vld [vmem:[#allocation12 + $0x268] ss:$16 sps:$4 sm:$0xff]   ;;  %v12838_v60 = vld [vmem:[#allocation12 + $0x24c] ss:$16 sps:$4 sm:$0xff]  }
 0x582   : > { %v7238_v37 = vadd.f32 %v7237_v35, %v7194_v36  ;;  %v7246_v7 = vadd.f32 %v7236_v63, %v14271_v19  ;;  %v12877_v36 = vld [vmem:[#allocation15 + $0xa4] ss:$16 sps:$4 sm:$0xff]   ;;  %v12875_v63 = vld [vmem:[#allocation15 + $0xa0] ss:$16 sps:$4 sm:$0xff]   ;;  %v12841_v35 = vld [vmem:[#allocation12 + $0x22c] ss:$16 sps:$4 sm:$0xff]  }
 0x583   : > { %v7239_v40 = vpop.f32.mrf.mxu1 }
 0x584   : > { %v7247_v9 = vadd.f32 %v7238_v37, %v14274_v45  ;;  %v7240_v29 = vadd.f32 %v7239_v40, %v7196_v50  ;;  %8203 = vmatpush2.bf16.msra.mxu0 %v12800_v24  ;;  %v7276_v18 = vadd.f32 %v7265_v62, %v7246_v7  ;;  %v12812_v45 = vld [vmem:[#allocation12 + $0x128] ss:$16 sps:$4 sm:$0xff]   ;;  %v12844_v7 = vld [vmem:[#allocation12 + $0x20c] ss:$16 sps:$4 sm:$0xff]  }
 0x585   : > { %v7241_v13 = vpop.f32.mrf.mxu1  ;;  %8204 = vmatprep.subr.bf16.mxu0 %v12808_v12  ;;  %v12880_v24 = vld [vmem:[#allocation15 + $0x84] ss:$16 sps:$4 sm:$0xff]   ;;  %v12878_v12 = vld [vmem:[#allocation15 + $0x80] ss:$16 sps:$4 sm:$0xff]  }
 0x586   : > { %v7277_v51 = vadd.f32 %v7269_v30, %v7247_v9  ;;  %v7250_v54 = vadd.f32 %v7240_v29, %v14277_v8  ;;  %v7242_v19 = vadd.f32 %v7241_v13, %v7198_v57  ;;  %v7284_v44 = vmul.f32 0.1, %v7276_v18  ;;  %v12818_v8 = vld [vmem:[#allocation12 + $0x108] ss:$16 sps:$4 sm:$0xff]   ;;  %v12847_v29 = vld [vmem:[#allocation12 + $0x3ec] ss:$16 sps:$4 sm:$0xff]  }
 0x587   : > { %v12836_v50 = vld [vmem:[#allocation12 + $0x248] ss:$16 sps:$4 sm:$0xff]   ;;  %v12853_v18 = vld [vmem:[#allocation12 + $0x3ac] ss:$16 sps:$4 sm:$0xff]  }
 0x588   : > { %v7280_v23 = vadd.f32 %v7265_v62, %v7250_v54  ;;  %v7251_v16 = vadd.f32 %v7242_v19, %v14280_v22  ;;  %8205 = vmatpush2.bf16.msra.mxu0 %v12806_v43  ;;  %v7285_v52 = vmul.f32 0.1, %v7277_v51  ;;  %v14337_v58 = vadd.f32 %v7284_v44, %v738_v1  ;;  %v12883_v37 = vld [vmem:[#allocation15 + $0x64] ss:$16 sps:$4 sm:$0xff]   ;;  %v12881_v62 = vld [vmem:[#allocation15 + $0x60] ss:$16 sps:$4 sm:$0xff]  }
 0x589   : > { %8206 = vmatprep.subr.bf16.mxu0 %v12814_v32  ;;  %v12886_v40 = vld [vmem:[#allocation15 + $0x44] ss:$16 sps:$4 sm:$0xff]   ;;  %v12884_v43 = vld [vmem:[#allocation15 + $0x40] ss:$16 sps:$4 sm:$0xff]   ;;  %v12850_v32 = vld [vmem:[#allocation12 + $0x3cc] ss:$16 sps:$4 sm:$0xff]  }
 0x58a   : > { %v7288_v6 = vmul.f32 0.1, %v7280_v23  ;;  %v7281_v20 = vadd.f32 %v7269_v30, %v7251_v16  ;;  %v14333_v25 = vadd.f32 %v7285_v52, %v739_v5  ;;  %v12839_v30 = vld [vmem:[#allocation12 + $0x228] ss:$16 sps:$4 sm:$0xff]   ;;  %v12887_v51 = vld [vmem:[#allocation15 + $0x20] ss:$16 sps:$4 sm:$0xff]  }
 0x58b   : > { %v12842_v9 = vld [vmem:[#allocation12 + $0x208] ss:$16 sps:$4 sm:$0xff]   ;;  %v12890_v23 = vld [vmem:[#allocation15] ss:$16 sps:$4 sm:$0xff]   ;;  %v12862_v1 = vld [vmem:[#allocation12 + $0x34c] ss:$16 sps:$4 sm:$0xff]  }
 0x58c   : > { %v7289_v42 = vmul.f32 0.1, %v7281_v20  ;;  %8207 = vmatpush2.bf16.msra.mxu0 %v12812_v45  ;;  %v14331_v0 = vadd.f32 %v7288_v6, %v742_v39  ;;  %v12889_v57 = vld [vmem:[#allocation15 + $0x24] ss:$16 sps:$4 sm:$0xff]   ;;  %v12893_v52 = vld [vmem:[#allocation15 + $0x1e0] ss:$16 sps:$4 sm:$0xff]  }
 0x58d   : > { %8208 = vmatprep.subr.bf16.mxu0 %v12820_v26  ;;  %v12845_v13 = vld [vmem:[#allocation12 + $0x3e8] ss:$16 sps:$4 sm:$0xff]   ;;  %v12856_v26 = vld [vmem:[#allocation12 + $0x38c] ss:$16 sps:$4 sm:$0xff]   ;;  %v12896_v44 = vld [vmem:[#allocation15 + $0x1c0] ss:$16 sps:$4 sm:$0xff]  }
 0x58e   : > { %v14335_v22 = vadd.f32 %v7289_v42, %v743_v41  ;;  %v14343_v53 = vpack.c.bf16 %v14331_v0, %v14337_v58  ;;  %v12892_v54 = vld [vmem:[#allocation15 + $0x4] ss:$16 sps:$4 sm:$0xff]   ;;  %v12859_v20 = vld [vmem:[#allocation12 + $0x36c] ss:$16 sps:$4 sm:$0xff]   ;;  %v12899_v42 = vld [vmem:[#allocation15 + $0x1a0] ss:$16 sps:$4 sm:$0xff]  }
 0x58f   : > { %v12848_v19 = vld [vmem:[#allocation12 + $0x3c8] ss:$16 sps:$4 sm:$0xff]  }
 0x590   : > { %8209 = vmatpush2.bf16.msra.mxu0 %v12818_v8  ;;  %v7301_v47 = vpack.c.bf16 %v14335_v22, %v14333_v25  ;;  %v12895_v16 = vld [vmem:[#allocation15 + $0x1e4] ss:$16 sps:$4 sm:$0xff]  }
 0x591   : > { %9066 = vmatprep.subr.bf16.mxu0 %v12871_v49  ;;  %v12851_v45 = vld [vmem:[#allocation12 + $0x3a8] ss:$16 sps:$4 sm:$0xff]  }
 0x592   : > { %8167 = vmatprep.mubr.bf16.mxu1 %v7301_v47  ;;  %v12898_v39 = vld [vmem:[#allocation15 + $0x1c4] ss:$16 sps:$4 sm:$0xff]  }
 0x593   : > { %8211 = vmatmul.mubr.bf16.vlgmr.msra.gmra.mxu0 %v14316_v15  ;;  %8168 = vmatmul.mubr.bf16.vlgmr.msra.gmra.mxu1 %v14343_v53  ;;  %v12872_v15 = vld [vmem:[#allocation15 + $0xc0] ss:$16 sps:$4 sm:$0xff]   ;;  %v12854_v6 = vld [vmem:[#allocation12 + $0x388] ss:$16 sps:$4 sm:$0xff]  }
 0x594   : > { %8222 = vmatpush1.bf16.msra.mxu1 %v12821_v55  ;;  %8253 = vmatprep.mubr.bf16.mxu1 %v7301_v47  ;;  %v12901_v5 = vld [vmem:[#allocation15 + $0x1a4] ss:$16 sps:$4 sm:$0xff]   ;;  %v12865_v55 = vld [vmem:[#allocation12 + $0x32c] ss:$16 sps:$4 sm:$0xff]  }
 0x595   : > { %8223 = vmatprep.subr.bf16.mxu1 %v12826_v3  ;;  %9067 = vmatpush1.bf16.msra.mxu0 %v12869_v33  ;;  %v12857_v41 = vld [vmem:[#allocation12 + $0x368] ss:$16 sps:$4 sm:$0xff]   ;;  %v12902_v3 = vld [vmem:[#allocation15 + $0x180] ss:$16 sps:$4 sm:$0xff]  }
 0x596   : > { %9068 = vmatprep.subr.bf16.mxu0 %v12874_v56  ;;  %v12904_v8 = vld [vmem:[#allocation15 + $0x184] ss:$16 sps:$4 sm:$0xff]   ;;  %v12908_v56 = vld [vmem:[#allocation15 + $0x140] ss:$16 sps:$4 sm:$0xff]  }
 0x597   : > { %v12860_v47 = vld [vmem:[#allocation12 + $0x348] ss:$16 sps:$4 sm:$0xff]  }
 0x598   : > { %8224 = vmatpush1.bf16.msra.mxu1 %v12824_v4  ;;  %v12907_v4 = vld [vmem:[#allocation15 + $0x164] ss:$16 sps:$4 sm:$0xff]  }
 0x599   : > { %8225 = vmatprep.subr.bf16.mxu1 %v12829_v17  ;;  %9069 = vmatpush1.bf16.msra.mxu0 %v12872_v15  ;;  %v12863_v17 = vld [vmem:[#allocation12 + $0x328] ss:$16 sps:$4 sm:$0xff]  }
 0x59a   : > { %9070 = vmatprep.subr.bf16.mxu0 %v12877_v36  ;;  %v12866_v33 = vld [vmem:[#allocation12 + $0x308] ss:$16 sps:$4 sm:$0xff]   ;;  %v12914_v36 = vld [vmem:[#allocation15 + $0x100] ss:$16 sps:$4 sm:$0xff]  }
 0x59b   : > { %v12910_v49 = vld [vmem:[#allocation15 + $0x144] ss:$16 sps:$4 sm:$0xff]  }
 0x59c   : > { %8226 = vmatpush1.bf16.msra.mxu1 %v12827_v34  ;;  %v12868_v34 = vld [vmem:[#allocation12 + $0x30c] ss:$16 sps:$4 sm:$0xff]   ;;  %v12916_v15 = vld [vmem:[#allocation15 + $0x104] ss:$16 sps:$4 sm:$0xff]  }
 0x59d   : > { %8227 = vmatprep.subr.bf16.mxu1 %v12832_v48  ;;  %9071 = vmatpush1.bf16.msra.mxu0 %v12875_v63  ;;  %v12905_v48 = vld [vmem:[#allocation15 + $0x160] ss:$16 sps:$4 sm:$0xff]   ;;  %v12922_v63 = vld [vmem:[#allocation15 + $0xec] ss:$16 sps:$4 sm:$0xff]  }
 0x59e   : > { %9072 = vmatprep.subr.bf16.mxu0 %v12880_v24  ;;  %v12923_v24 = vld [vmem:[#allocation15 + $0x2c0] ss:$16 sps:$4 sm:$0xff]  }
 0x5a0   : > { %8228 = vmatpush1.bf16.msra.mxu1 %v12830_v2  ;;  %v12913_v2 = vld [vmem:[#allocation15 + $0x124] ss:$16 sps:$4 sm:$0xff]  }
 0x5a1   : > { %8229 = vmatprep.subr.bf16.mxu1 %v12835_v28  ;;  %9073 = vmatpush1.bf16.msra.mxu0 %v12878_v12  ;;  %v12911_v28 = vld [vmem:[#allocation15 + $0x120] ss:$16 sps:$4 sm:$0xff]  }
 0x5a2   : > { %9074 = vmatprep.subr.bf16.mxu0 %v12883_v37  ;;  %v12935_v12 = vld [vmem:[#allocation15 + $0x280] ss:$16 sps:$4 sm:$0xff]   ;;  %v12937_v37 = vld [vmem:[#allocation15 + $0x284] ss:$16 sps:$4 sm:$0xff]  }
 0x5a4   : > { %8230 = vmatpush1.bf16.msra.mxu1 %v12833_v11  ;;  %v12917_v11 = vld [vmem:[#allocation15 + $0x2e0] ss:$16 sps:$4 sm:$0xff]  }
 0x5a5   : > { %8231 = vmatprep.subr.bf16.mxu1 %v12838_v60  ;;  %9075 = vmatpush1.bf16.msra.mxu0 %v12881_v62  ;;  %v12919_v60 = vld [vmem:[#allocation15 + $0x2e4] ss:$16 sps:$4 sm:$0xff]   ;;  %v12947_v62 = vld [vmem:[#allocation15 + $0x240] ss:$16 sps:$4 sm:$0xff]  }
 0x5a6   : > { %9076 = vmatprep.subr.bf16.mxu0 %v12886_v40  ;;  %v12949_v40 = vld [vmem:[#allocation15 + $0x244] ss:$16 sps:$4 sm:$0xff]  }
 0x5a8   : > { %8232 = vmatpush1.bf16.msra.mxu1 %v12836_v50  ;;  %v12929_v50 = vld [vmem:[#allocation15 + $0x2a0] ss:$16 sps:$4 sm:$0xff]  }
 0x5a9   : > { %8233 = vmatprep.subr.bf16.mxu1 %v12841_v35  ;;  %9077 = vmatpush1.bf16.msra.mxu0 %v12884_v43  ;;  %v12931_v35 = vld [vmem:[#allocation15 + $0x2a4] ss:$16 sps:$4 sm:$0xff]   ;;  %v12959_v43 = vld [vmem:[#allocation15 + $0x200] ss:$16 sps:$4 sm:$0xff]  }
 0x5aa   : > { %9078 = vmatprep.subr.bf16.mxu0 %v12889_v57  ;;  %v12961_v57 = vld [vmem:[#allocation15 + $0x204] ss:$16 sps:$4 sm:$0xff]  }
 0x5ac   : > { %8234 = vmatpush1.bf16.msra.mxu1 %v12839_v30  ;;  %v12941_v30 = vld [vmem:[#allocation15 + $0x260] ss:$16 sps:$4 sm:$0xff]  }
 0x5ad   : > { %8235 = vmatprep.subr.bf16.mxu1 %v12844_v7  ;;  %9079 = vmatpush1.bf16.msra.mxu0 %v12887_v51  ;;  %v12943_v7 = vld [vmem:[#allocation15 + $0x264] ss:$16 sps:$4 sm:$0xff]   ;;  %v12971_v51 = vld [vmem:[#allocation15 + $0x3c0] ss:$16 sps:$4 sm:$0xff]  }
 0x5ae   : > { %9080 = vmatprep.subr.bf16.mxu0 %v12892_v54  ;;  %v12973_v54 = vld [vmem:[#allocation15 + $0x3c4] ss:$16 sps:$4 sm:$0xff]  }
 0x5b0   : > { %8236 = vmatpush1.bf16.msra.mxu1 %v12842_v9  ;;  %v12953_v9 = vld [vmem:[#allocation15 + $0x220] ss:$16 sps:$4 sm:$0xff]  }
 0x5b1   : > { %8237 = vmatprep.subr.bf16.mxu1 %v12847_v29  ;;  %9081 = vmatpush1.bf16.msra.mxu0 %v12890_v23  ;;  %v12955_v29 = vld [vmem:[#allocation15 + $0x224] ss:$16 sps:$4 sm:$0xff]   ;;  %v12983_v23 = vld [vmem:[#allocation15 + $0x380] ss:$16 sps:$4 sm:$0xff]  }
 0x5b2   : > { %9082 = vmatprep.subr.bf16.mxu0 %v12895_v16  ;;  %v12985_v16 = vld [vmem:[#allocation15 + $0x384] ss:$16 sps:$4 sm:$0xff]  }
 0x5b4   : > { %8238 = vmatpush2.bf16.msra.mxu1 %v12845_v13  ;;  %v12965_v13 = vld [vmem:[#allocation15 + $0x3e0] ss:$16 sps:$4 sm:$0xff]  }
 0x5b5   : > { %8239 = vmatprep.subr.bf16.mxu1 %v12850_v32  ;;  %9083 = vmatpush2.bf16.msra.mxu0 %v12893_v52  ;;  %v12967_v32 = vld [vmem:[#allocation15 + $0x3e4] ss:$16 sps:$4 sm:$0xff]  }
 0x5b6   : > { %9084 = vmatprep.subr.bf16.mxu0 %v12898_v39  ;;  %v12997_v52 = vld [vmem:[#allocation15 + $0x344] ss:$16 sps:$4 sm:$0xff]   ;;  %v12995_v39 = vld [vmem:[#allocation15 + $0x340] ss:$16 sps:$4 sm:$0xff]  }
 0x5b8   : > { %8240 = vmatpush2.bf16.msra.mxu1 %v12848_v19  ;;  %v12977_v19 = vld [vmem:[#allocation15 + $0x3a0] ss:$16 sps:$4 sm:$0xff]  }
 0x5b9   : > { %8241 = vmatprep.subr.bf16.mxu1 %v12853_v18  ;;  %9085 = vmatpush2.bf16.msra.mxu0 %v12896_v44  ;;  %v12979_v18 = vld [vmem:[#allocation15 + $0x3a4] ss:$16 sps:$4 sm:$0xff]  }
 0x5ba   : > { %9086 = vmatprep.subr.bf16.mxu0 %v12901_v5  ;;  %v13009_v44 = vld [vmem:[#allocation15 + $0x304] ss:$16 sps:$4 sm:$0xff]   ;;  %v13007_v5 = vld [vmem:[#allocation15 + $0x300] ss:$16 sps:$4 sm:$0xff]  }
 0x5bc   : > { %8242 = vmatpush2.bf16.msra.mxu1 %v12851_v45  ;;  %v12989_v45 = vld [vmem:[#allocation15 + $0x360] ss:$16 sps:$4 sm:$0xff]  }
 0x5bd   : > { %8243 = vmatprep.subr.bf16.mxu1 %v12856_v26  ;;  %9087 = vmatpush2.bf16.msra.mxu0 %v12899_v42  ;;  %v12991_v26 = vld [vmem:[#allocation15 + $0x364] ss:$16 sps:$4 sm:$0xff]  }
 0x5be   : > { %9088 = vmatprep.subr.bf16.mxu0 %v12904_v8  ;;  %v14348_v8 = vld [vmem:[#allocation14] sm:$0xf] }
 0x5c0   : > { %8244 = vmatpush2.bf16.msra.mxu1 %v12854_v6  ;;  %v13003_v6 = vld [vmem:[#allocation15 + $0x324] ss:$16 sps:$4 sm:$0xff]  }
 0x5c1   : > { %8245 = vmatprep.subr.bf16.mxu1 %v12859_v20  ;;  %9089 = vmatpush2.bf16.msra.mxu0 %v12902_v3  ;;  %v13001_v20 = vld [vmem:[#allocation15 + $0x320] ss:$16 sps:$4 sm:$0xff]   ;;  %v7435_v3 = vrot.slane %v14348_v8, %v14101_v61 }
 0x5c2   : > { %9090 = vmatprep.subr.bf16.mxu0 %v12907_v4 }
 0x5c4   : > { %8246 = vmatpush2.bf16.msra.mxu1 %v12857_v41  ;;  %v13015_v41 = vld [vmem:[#allocation15 + $0x2ec] ss:$16 sps:$4 sm:$0xff]  }
 0x5c5   : > { %8247 = vmatprep.subr.bf16.mxu1 %v12862_v1  ;;  %9091 = vmatpush2.bf16.msra.mxu0 %v12905_v48 }
 0x5c6   : > { %9092 = vmatprep.subr.bf16.mxu0 %v12910_v49 }
 0x5c8   : > { %8248 = vmatpush2.bf16.msra.mxu1 %v12860_v47 }
 0x5c9   : > { %8249 = vmatprep.subr.bf16.mxu1 %v12865_v55  ;;  %9093 = vmatpush2.bf16.msra.mxu0 %v12908_v56  ;;  %v7439_v55 = vrot.slane %v14348_v8, %v14109_v10 }
 0x5ca   : > { %9094 = vmatprep.subr.bf16.mxu0 %v12913_v2 }
 0x5cc   : > { %8250 = vmatpush2.bf16.msra.mxu1 %v12863_v17 }
 0x5cd   : > { %8251 = vmatprep.subr.bf16.mxu1 %v12868_v34  ;;  %9095 = vmatpush2.bf16.msra.mxu0 %v12911_v28 }
 0x5ce   : > { %9096 = vmatprep.subr.bf16.mxu0 %v12916_v15 }
 0x5d0   : > { %8252 = vmatpush2.bf16.msra.mxu1 %v12866_v33 }
 0x5d1   : > { %9097 = vmatpush2.bf16.msra.mxu0 %v12914_v36  ;;  %9109 = vmatprep.subr.bf16.mxu1 %v12919_v60 }
 0x5d2   : > { %9152 = vmatprep.subr.bf16.mxu0 %v12922_v63 }
 0x5d3   : > { %8254 = vmatmul.mubr.bf16.vlgmr.msra.gmra.mxu1 %v14343_v53  ;;  %v12925_v53 = vld [vmem:[#allocation15 + $0x2c4] ss:$16 sps:$4 sm:$0xff]  }
 0x5d4   : > { %9110 = vmatpush1.bf16.msra.mxu1 %v12917_v11 }
 0x5d5   : > { %9111 = vmatprep.subr.bf16.mxu1 %v12925_v53 }
 0x5d8   : > { %9112 = vmatpush1.bf16.msra.mxu1 %v12923_v24 }
 0x5d9   : > { %9113 = vmatprep.subr.bf16.mxu1 %v12931_v35 }
 0x5dc   : > { %9114 = vmatpush1.bf16.msra.mxu1 %v12929_v50 }
 0x5dd   : > { %9115 = vmatprep.subr.bf16.mxu1 %v12937_v37 }
 0x5e0   : > { %9116 = vmatpush1.bf16.msra.mxu1 %v12935_v12  ;;  %v12920_v12 = vld [vmem:[#allocation15 + $0xe8] ss:$16 sps:$4 sm:$0xff]  }
 0x5e1   : > { %9117 = vmatprep.subr.bf16.mxu1 %v12943_v7  ;;  %v12926_v7 = vld [vmem:[#allocation15 + $0xc8] ss:$16 sps:$4 sm:$0xff]  }
 0x5e4   : > { %9118 = vmatpush1.bf16.msra.mxu1 %v12941_v30  ;;  %v12928_v30 = vld [vmem:[#allocation15 + $0xcc] ss:$16 sps:$4 sm:$0xff]  }
 0x5e5   : > { %9119 = vmatprep.subr.bf16.mxu1 %v12949_v40  ;;  %v12932_v40 = vld [vmem:[#allocation15 + $0xa8] ss:$16 sps:$4 sm:$0xff]  }
 0x5e8   : > { %9120 = vmatpush1.bf16.msra.mxu1 %v12947_v62  ;;  %v12934_v62 = vld [vmem:[#allocation15 + $0xac] ss:$16 sps:$4 sm:$0xff]  }
 0x5e9   : > { %9121 = vmatprep.subr.bf16.mxu1 %v12955_v29  ;;  %v12938_v29 = vld [vmem:[#allocation15 + $0x88] ss:$16 sps:$4 sm:$0xff]  }
 0x5ec   : > { %9122 = vmatpush1.bf16.msra.mxu1 %v12953_v9  ;;  %v12940_v9 = vld [vmem:[#allocation15 + $0x8c] ss:$16 sps:$4 sm:$0xff]  }
 0x5ed   : > { %9123 = vmatprep.subr.bf16.mxu1 %v12961_v57  ;;  %v12944_v57 = vld [vmem:[#allocation15 + $0x68] ss:$16 sps:$4 sm:$0xff]  }
 0x5f0   : > { %9124 = vmatpush1.bf16.msra.mxu1 %v12959_v43  ;;  %v12946_v43 = vld [vmem:[#allocation15 + $0x6c] ss:$16 sps:$4 sm:$0xff]  }
 0x5f1   : > { %9125 = vmatprep.subr.bf16.mxu1 %v12967_v32  ;;  %v12950_v32 = vld [vmem:[#allocation15 + $0x48] ss:$16 sps:$4 sm:$0xff]  }
 0x5f4   : > { %9126 = vmatpush2.bf16.msra.mxu1 %v12965_v13  ;;  %v12952_v13 = vld [vmem:[#allocation15 + $0x4c] ss:$16 sps:$4 sm:$0xff]  }
 0x5f5   : > { %9127 = vmatprep.subr.bf16.mxu1 %v12973_v54  ;;  %v12956_v54 = vld [vmem:[#allocation15 + $0x28] ss:$16 sps:$4 sm:$0xff]  }
 0x5f8   : > { %9128 = vmatpush2.bf16.msra.mxu1 %v12971_v51  ;;  %v12958_v51 = vld [vmem:[#allocation15 + $0x2c] ss:$16 sps:$4 sm:$0xff]  }
 0x5f9   : > { %9129 = vmatprep.subr.bf16.mxu1 %v12979_v18  ;;  %v12962_v18 = vld [vmem:[#allocation15 + $0x8] ss:$16 sps:$4 sm:$0xff]  }
 0x5fc   : > { %9130 = vmatpush2.bf16.msra.mxu1 %v12977_v19  ;;  %v12964_v19 = vld [vmem:[#allocation15 + $0xc] ss:$16 sps:$4 sm:$0xff]  }
 0x5fd   : > { %9131 = vmatprep.subr.bf16.mxu1 %v12985_v16  ;;  %v12968_v16 = vld [vmem:[#allocation15 + $0x1e8] ss:$16 sps:$4 sm:$0xff]  }
 0x600   : > { %9132 = vmatpush2.bf16.msra.mxu1 %v12983_v23  ;;  %v12970_v23 = vld [vmem:[#allocation15 + $0x1ec] ss:$16 sps:$4 sm:$0xff]  }
 0x601   : > { %9133 = vmatprep.subr.bf16.mxu1 %v12991_v26  ;;  %v12974_v26 = vld [vmem:[#allocation15 + $0x1c8] ss:$16 sps:$4 sm:$0xff]  }
 0x604   : > { %9134 = vmatpush2.bf16.msra.mxu1 %v12989_v45  ;;  %v12976_v45 = vld [vmem:[#allocation15 + $0x1cc] ss:$16 sps:$4 sm:$0xff]  }
 0x605   : > { %9135 = vmatprep.subr.bf16.mxu1 %v12997_v52  ;;  %v12982_v52 = vld [vmem:[#allocation15 + $0x1ac] ss:$16 sps:$4 sm:$0xff]  }
 0x608   : > { %9136 = vmatpush2.bf16.msra.mxu1 %v12995_v39  ;;  %v12980_v39 = vld [vmem:[#allocation15 + $0x1a8] ss:$16 sps:$4 sm:$0xff]  }
 0x609   : > { %9137 = vmatprep.subr.bf16.mxu1 %v13003_v6  ;;  %v12988_v6 = vld [vmem:[#allocation15 + $0x18c] ss:$16 sps:$4 sm:$0xff]  }
 0x60c   : > { %9138 = vmatpush2.bf16.msra.mxu1 %v13001_v20 }
 0x60d   : > { %9139 = vmatprep.subr.bf16.mxu1 %v13009_v44  ;;  %v12986_v44 = vld [vmem:[#allocation15 + $0x188] ss:$16 sps:$4 sm:$0xff]  }
 0x610   : > { %9140 = vmatpush2.bf16.msra.mxu1 %v13007_v5  ;;  %v12994_v5 = vld [vmem:[#allocation15 + $0x16c] ss:$16 sps:$4 sm:$0xff]  }
 0x611   : > { %9195 = vmatprep.subr.bf16.mxu1 %v13015_v41 }
 0x613   : > { %v8126_v1 = vpop.f32.mrf.mxu0 }
 0x614   : > { %v8127_v49 = vadd.f32 %v8126_v1, %v7435_v3  ;;  %v12992_v1 = vld [vmem:[#allocation15 + $0x168] ss:$16 sps:$4 sm:$0xff]  }
 0x615   : > { %v8128_v42 = vpop.f32.mrf.mxu0 }
 0x616   : > { %v8129_v48 = vadd.f32 %v8128_v42, %v7439_v55  ;;  %v13000_v42 = vld [vmem:[#allocation15 + $0x14c] ss:$16 sps:$4 sm:$0xff]  }
 0x617   : > { %v8130_v47 = vpop.f32.mrf.mxu0 }
 0x618   : > { %v8131_v33 = vadd.f32 %v8130_v47, %v7435_v3  ;;  %v12998_v3 = vld [vmem:[#allocation15 + $0x148] ss:$16 sps:$4 sm:$0xff]  }
 0x619   : > { %v8132_v17 = vpop.f32.mrf.mxu0 }
 0x61a   : > { %v8133_v2 = vadd.f32 %v8132_v17, %v7439_v55  ;;  %v7447_v55 = vrot.slane %v14348_v8, %v14148_v59 }
 0x653   : > { %v8169_v4 = vpop.f32.mrf.mxu1  ;;  %v8212_v20 = vpop.f32.mrf.mxu0 }
 0x654   : > { %v8170_v36 = vadd.f32 %v8169_v4, %v8127_v49  ;;  %v7443_v4 = vrot.slane %v14348_v8, %v14145_v31  ;;  %v13010_v8 = vld [vmem:[#allocation15 + $0x108] ss:$16 sps:$4 sm:$0xff]  }
 0x655   : > { %v8171_v34 = vpop.f32.mrf.mxu1  ;;  %v8214_v41 = vpop.f32.mrf.mxu0 }
 0x656   : > { %v8172_v28 = vadd.f32 %v8171_v34, %v8129_v48  ;;  %v8264_v50 = vmax.f32 %v8170_v36, 0.0  ;;  %v13006_v34 = vld [vmem:[#allocation15 + $0x12c] ss:$16 sps:$4 sm:$0xff]   ;;  %v8215_v49 = vadd.f32 %v8214_v41, %v7447_v55 }
 0x657   : > { %v8173_v56 = vpop.f32.mrf.mxu1  ;;  %v8216_v47 = vpop.f32.mrf.mxu0  ;;  %v13012_v36 = vld [vmem:[#allocation15 + $0x10c] ss:$16 sps:$4 sm:$0xff]  }
 0x658   : > { %v8174_v15 = vadd.f32 %v8173_v56, %v8131_v33  ;;  %v8265_v24 = vmax.f32 %v8172_v28, 0.0  ;;  %v8217_v56 = vadd.f32 %v8216_v47, %v7443_v4  ;;  %v8213_v28 = vadd.f32 %v8212_v20, %v7443_v4  ;;  %v13028_v20 = vld [vmem:[#allocation15 + $0x248] ss:$16 sps:$4 sm:$0xff]   ;;  %v13036_v41 = vld [vmem:[#allocation15 + $0x20c] ss:$16 sps:$4 sm:$0xff]  }
 0x659   : > { %v8175_v11 = vpop.f32.mrf.mxu1  ;;  %v8218_v48 = vpop.f32.mrf.mxu0  ;;  %v13037_v47 = vld [vmem:[#allocation15 + $0x3e8] ss:$16 sps:$4 sm:$0xff]   ;;  %v13045_v4 = vld [vmem:[#allocation15 + $0x3ac] ss:$16 sps:$4 sm:$0xff]  }
 0x65a   : > { %v8176_v60 = vadd.f32 %v8175_v11, %v8133_v2  ;;  %v8268_v63 = vmax.f32 %v8174_v15, 0.0  ;;  %v13004_v2 = vld [vmem:[#allocation15 + $0x128] ss:$16 sps:$4 sm:$0xff]   ;;  %v8219_v11 = vadd.f32 %v8218_v48, %v7447_v55  ;;  %v13042_v55 = vld [vmem:[#allocation15 + $0x3cc] ss:$16 sps:$4 sm:$0xff]  }
 0x65b   : > { %v13046_v48 = vld [vmem:[#allocation15 + $0x388] ss:$16 sps:$4 sm:$0xff]  }
 0x65c   : > { %v8269_v53 = vmax.f32 %v8176_v60, 0.0  ;;  %v14354_v37 = vpack.c.bf16 %v8268_v63, %v8264_v50 }
 0x65e   : > { %v8273_v35 = vpack.c.bf16 %v8269_v53, %v8265_v24 }
 0x660   : > { %9098 = vmatprep.mubr.bf16.mxu0 %v8273_v35 }
 0x661   : > { %9099 = vmatmul.mubr.bf16.vlgmr.msra.gmra.mxu0 %v14354_v37 }
 0x662   : > { %9153 = vmatpush1.bf16.msra.mxu0 %v12920_v12  ;;  %9184 = vmatprep.mubr.bf16.mxu0 %v8273_v35 }
 0x663   : > { %9154 = vmatprep.subr.bf16.mxu0 %v12928_v30 }
 0x666   : > { %9155 = vmatpush1.bf16.msra.mxu0 %v12926_v7 }
 0x667   : > { %9156 = vmatprep.subr.bf16.mxu0 %v12934_v62 }
 0x66a   : > { %9157 = vmatpush1.bf16.msra.mxu0 %v12932_v40  ;;  %v13013_v40 = vld [vmem:[#allocation15 + $0x2e8] ss:$16 sps:$4 sm:$0xff]  }
 0x66b   : > { %9158 = vmatprep.subr.bf16.mxu0 %v12940_v9 }
 0x66e   : > { %9159 = vmatpush1.bf16.msra.mxu0 %v12938_v29  ;;  %v13018_v29 = vld [vmem:[#allocation15 + $0x2cc] ss:$16 sps:$4 sm:$0xff]  }
 0x66f   : > { %9160 = vmatprep.subr.bf16.mxu0 %v12946_v43  ;;  %v13016_v43 = vld [vmem:[#allocation15 + $0x2c8] ss:$16 sps:$4 sm:$0xff]  }
 0x672   : > { %9161 = vmatpush1.bf16.msra.mxu0 %v12944_v57  ;;  %v13021_v57 = vld [vmem:[#allocation15 + $0x2ac] ss:$16 sps:$4 sm:$0xff]  }
 0x673   : > { %9162 = vmatprep.subr.bf16.mxu0 %v12952_v13  ;;  %v13019_v13 = vld [vmem:[#allocation15 + $0x2a8] ss:$16 sps:$4 sm:$0xff]  }
 0x676   : > { %9163 = vmatpush1.bf16.msra.mxu0 %v12950_v32  ;;  %v13024_v32 = vld [vmem:[#allocation15 + $0x28c] ss:$16 sps:$4 sm:$0xff]  }
 0x677   : > { %9164 = vmatprep.subr.bf16.mxu0 %v12958_v51  ;;  %v9297_v51 = vld [vmem:[%s14695_s14 + $0xf8] sm:$0xff] }
 0x67a   : > { %9165 = vmatpush1.bf16.msra.mxu0 %v12956_v54  ;;  %v9281_v54 = vld [vmem:[%s14695_s14 + $0x78] sm:$0xff] }
 0x67b   : > { %9166 = vmatprep.subr.bf16.mxu0 %v12964_v19  ;;  %v9280_v19 = vld [vmem:[%s14695_s14 + $0x70] sm:$0xff] }
 0x67e   : > { %9167 = vmatpush1.bf16.msra.mxu0 %v12962_v18  ;;  %v13022_v18 = vld [vmem:[#allocation15 + $0x288] ss:$16 sps:$4 sm:$0xff]  }
 0x67f   : > { %9168 = vmatprep.subr.bf16.mxu0 %v12970_v23  ;;  %v9295_v23 = vld [vmem:[%s14695_s14 + $0xe8] sm:$0xff] }
 0x682   : > { %9169 = vmatpush2.bf16.msra.mxu0 %v12968_v16  ;;  %v13027_v16 = vld [vmem:[#allocation15 + $0x26c] ss:$16 sps:$4 sm:$0xff]  }
 0x683   : > { %9170 = vmatprep.subr.bf16.mxu0 %v12976_v45  ;;  %v9279_v45 = vld [vmem:[%s14695_s14 + $0x68] sm:$0xff] }
 0x686   : > { %9171 = vmatpush2.bf16.msra.mxu0 %v12974_v26  ;;  %v9294_v26 = vld [vmem:[%s14695_s14 + $0xe0] sm:$0xff] }
 0x687   : > { %9172 = vmatprep.subr.bf16.mxu0 %v12982_v52  ;;  %v9278_v52 = vld [vmem:[%s14695_s14 + $0x60] sm:$0xff] }
 0x68a   : > { %9173 = vmatpush2.bf16.msra.mxu0 %v12980_v39  ;;  %v13025_v39 = vld [vmem:[#allocation15 + $0x268] ss:$16 sps:$4 sm:$0xff]  }
 0x68b   : > { %9174 = vmatprep.subr.bf16.mxu0 %v12988_v6  ;;  %v13030_v6 = vld [vmem:[#allocation15 + $0x24c] ss:$16 sps:$4 sm:$0xff]  }
 0x68e   : > { %9175 = vmatpush2.bf16.msra.mxu0 %v12986_v44  ;;  %v13033_v44 = vld [vmem:[#allocation15 + $0x22c] ss:$16 sps:$4 sm:$0xff]  }
 0x68f   : > { %9176 = vmatprep.subr.bf16.mxu0 %v12994_v5  ;;  %v13031_v5 = vld [vmem:[#allocation15 + $0x228] ss:$16 sps:$4 sm:$0xff]  }
 0x692   : > { %9177 = vmatpush2.bf16.msra.mxu0 %v12992_v1  ;;  %v13034_v1 = vld [vmem:[#allocation15 + $0x208] ss:$16 sps:$4 sm:$0xff]  }
 0x693   : > { %v8255_v17 = vpop.f32.mrf.mxu1  ;;  %9178 = vmatprep.subr.bf16.mxu0 %v13000_v42  ;;  %v13039_v42 = vld [vmem:[#allocation15 + $0x3ec] ss:$16 sps:$4 sm:$0xff]  }
 0x694   : > { %v8256_v24 = vadd.f32 %v8255_v17, %v8213_v28  ;;  %v13043_v17 = vld [vmem:[#allocation15 + $0x3a8] ss:$16 sps:$4 sm:$0xff]   ;;  %v13057_v28 = vld [vmem:[#allocation15 + $0x32c] ss:$16 sps:$4 sm:$0xff]  }
 0x695   : > { %v8257_v33 = vpop.f32.mrf.mxu1 }
 0x696   : > { %9179 = vmatpush2.bf16.msra.mxu0 %v12998_v3  ;;  %v8258_v60 = vadd.f32 %v8257_v33, %v8215_v49  ;;  %v8266_v7 = vmax.f32 %v8256_v24, 0.0  ;;  %v13040_v3 = vld [vmem:[#allocation15 + $0x3c8] ss:$16 sps:$4 sm:$0xff]   ;;  %v13051_v33 = vld [vmem:[#allocation15 + $0x36c] ss:$16 sps:$4 sm:$0xff]  }
 0x697   : > { %v8259_v15 = vpop.f32.mrf.mxu1  ;;  %9180 = vmatprep.subr.bf16.mxu0 %v13006_v34  ;;  %v13048_v34 = vld [vmem:[#allocation15 + $0x38c] ss:$16 sps:$4 sm:$0xff]   ;;  %v13049_v49 = vld [vmem:[#allocation15 + $0x368] ss:$16 sps:$4 sm:$0xff]  }
 0x698   : > { %v8260_v63 = vadd.f32 %v8259_v15, %v8217_v56  ;;  %v8267_v12 = vmax.f32 %v8258_v60, 0.0  ;;  %v13054_v56 = vld [vmem:[#allocation15 + $0x34c] ss:$16 sps:$4 sm:$0xff]   ;;  %v13055_v15 = vld [vmem:[#allocation15 + $0x328] ss:$16 sps:$4 sm:$0xff]  }
 0x699   : > { %v8261_v53 = vpop.f32.mrf.mxu1  ;;  %v9293_v60 = vld [vmem:[%s14695_s14 + $0xd8] sm:$0xff]  ;;  %v9292_v24 = vld [vmem:[%s14695_s14 + $0xd0] sm:$0xff] }
 0x69a   : > { %v8262_v50 = vadd.f32 %v8261_v53, %v8219_v11  ;;  %9181 = vmatpush2.bf16.msra.mxu0 %v13004_v2  ;;  %v8270_v35 = vmax.f32 %v8260_v63, 0.0  ;;  %v13052_v2 = vld [vmem:[#allocation15 + $0x348] ss:$16 sps:$4 sm:$0xff]   ;;  %v9277_v63 = vld [vmem:[%s14695_s14 + $0x58] sm:$0xff] }
 0x69b   : > { %9182 = vmatprep.subr.bf16.mxu0 %v13012_v36  ;;  %v13060_v36 = vld [vmem:[#allocation15 + $0x30c] ss:$16 sps:$4 sm:$0xff]   ;;  %v13058_v11 = vld [vmem:[#allocation15 + $0x308] ss:$16 sps:$4 sm:$0xff]  }
 0x69c   : > { %v8271_v30 = vmax.f32 %v8262_v50, 0.0  ;;  %v14361_v9 = vpack.c.bf16 %v8270_v35, %v8266_v7  ;;  %v9276_v53 = vld [vmem:[%s14695_s14 + $0x50] sm:$0xff]  ;;  %v9291_v50 = vld [vmem:[%s14695_s14 + $0xc8] sm:$0xff]  ;;  %v9290_v35 = vld [vmem:[%s14695_s14 + $0xc0] sm:$0xff] }
 0x69d   : > { %v9273_v7 = vld [vmem:[%s14695_s14 + $0x38] sm:$0xff] }
 0x69e   : > { %v8275_v62 = vpack.c.bf16 %v8271_v30, %v8267_v12  ;;  %9183 = vmatpush2.bf16.msra.mxu0 %v13010_v8  ;;  %v9275_v8 = vld [vmem:[%s14695_s14 + $0x48] sm:$0xff]  ;;  %v9274_v12 = vld [vmem:[%s14695_s14 + $0x40] sm:$0xff]  ;;  %v9289_v30 = vld [vmem:[%s14695_s14 + $0xb8] sm:$0xff] }
 0x69f   : > { %11183 = vmatprep.subr.mxu0 %v9297_v51  ;;  %v9284_v51 = vld [vmem:[%s14695_s14 + $0x90] sm:$0xff] }
 0x6a0   : > { %9141 = vmatprep.mubr.bf16.mxu1 %v8275_v62 }
 0x6a1   : > { %9142 = vmatmul.mubr.bf16.vlgmr.msra.gmra.mxu1 %v14361_v9  ;;  %9185 = vmatmul.mubr.bf16.vlgmr.msra.gmra.mxu0 %v14354_v37  ;;  %v9296_v37 = vld [vmem:[%s14695_s14 + $0xf0] sm:$0xff] }
 0x6a2   : > { %9196 = vmatpush1.bf16.msra.mxu1 %v13013_v40  ;;  %9227 = vmatprep.mubr.bf16.mxu1 %v8275_v62  ;;  %v9288_v62 = vld [vmem:[%s14695_s14 + $0xb0] sm:$0xff] }
 0x6a3   : > { %9197 = vmatprep.subr.bf16.mxu1 %v13018_v29  ;;  %11184 = vmatpush3.msra.mxu0 %v9281_v54  ;;  %v9272_v40 = vld [vmem:[%s14695_s14 + $0x30] sm:$0xff]  ;;  %v9271_v29 = vld [vmem:[%s14695_s14 + $0x28] sm:$0xff] }
 0x6a4   : > { %11185 = vmatprep.subr.mxu0 %v9296_v37  ;;  %v9268_v54 = vld [vmem:[%s14695_s14 + $0x10] sm:$0xff]  ;;  %v9283_v37 = vld [vmem:[%s14695_s14 + $0x88] sm:$0xff] }
 0x6a5   : > { %11186 = vmatpush3.msra.mxu0 %v9280_v19  ;;  %v9267_v19 = vld [vmem:[%s14695_s14 + $0x8] sm:$0xff] }
 0x6a6   : > { %9198 = vmatpush1.bf16.msra.mxu1 %v13016_v43  ;;  %11187 = vmatprep.subr.mxu0 %v9295_v23  ;;  %v9286_v43 = vld [vmem:[%s14695_s14 + $0xa0] sm:$0xff] }
 0x6a7   : > { %9199 = vmatprep.subr.bf16.mxu1 %v13021_v57  ;;  %11188 = vmatpush3.msra.mxu0 %v9279_v45  ;;  %v9270_v57 = vld [vmem:[%s14695_s14 + $0x20] sm:$0xff]  ;;  %v9313_v45 = vld [vmem:[%s14695_s14 + $0x178] sm:$0xff] }
 0x6a8   : > { %11189 = vmatprep.subr.mxu0 %v9294_v26  ;;  %v9266_v23 = vld [vmem:[%s14695_s14] sm:$0xff]  ;;  %v9328_v26 = vld [vmem:[%s14695_s14 + $0x1f0] sm:$0xff] }
 0x6a9   : > { %11190 = vmatpush3.msra.mxu0 %v9278_v52  ;;  %v9312_v52 = vld [vmem:[%s14695_s14 + $0x170] sm:$0xff] }
 0x6aa   : > { %9200 = vmatpush1.bf16.msra.mxu1 %v13019_v13  ;;  %11191 = vmatprep.subr.mxu0 %v9293_v60  ;;  %v9285_v13 = vld [vmem:[%s14695_s14 + $0x98] sm:$0xff]  ;;  %v9300_v60 = vld [vmem:[%s14695_s14 + $0x110] sm:$0xff] }
 0x6ab   : > { %9201 = vmatprep.subr.bf16.mxu1 %v13024_v32  ;;  %11192 = vmatpush3.msra.mxu0 %v9277_v63  ;;  %v9269_v32 = vld [vmem:[%s14695_s14 + $0x18] sm:$0xff]  ;;  %v9315_v63 = vld [vmem:[%s14695_s14 + $0x188] sm:$0xff] }
 0x6ac   : > { %11193 = vmatprep.subr.mxu0 %v9292_v24  ;;  %v9299_v24 = vld [vmem:[%s14695_s14 + $0x108] sm:$0xff] }
 0x6ad   : > { %11194 = vmatpush3.msra.mxu0 %v9276_v53  ;;  %v9314_v53 = vld [vmem:[%s14695_s14 + $0x180] sm:$0xff] }
 0x6ae   : > { %9202 = vmatpush1.bf16.msra.mxu1 %v13022_v18  ;;  %11195 = vmatprep.subr.mxu0 %v9291_v50  ;;  %v9282_v18 = vld [vmem:[%s14695_s14 + $0x80] sm:$0xff] }
 0x6af   : > { %9203 = vmatprep.subr.bf16.mxu1 %v13027_v16  ;;  %11196 = vmatpush3.msra.mxu0 %v9275_v8  ;;  %v9329_v16 = vld [vmem:[%s14695_s14 + $0x1f8] sm:$0xff]  ;;  %v9298_v50 = vld [vmem:[%s14695_s14 + $0x100] sm:$0xff] }
 0x6b0   : > { %11197 = vmatprep.subr.mxu0 %v9290_v35 }
 0x6b1   : > { %11198 = vmatpush3.msra.mxu0 %v9274_v12  ;;  %v8404_v12 = vld [vmem:[#allocation17] sm:$0xf] }
 0x6b2   : > { %9204 = vmatpush1.bf16.msra.mxu1 %v13025_v39  ;;  %11199 = vmatprep.subr.mxu0 %v9289_v30  ;;  %v9327_v39 = vld [vmem:[%s14695_s14 + $0x1e8] sm:$0xff] }
 0x6b3   : > { %9205 = vmatprep.subr.bf16.mxu1 %v13030_v6  ;;  %11200 = vmatpush3.msra.mxu0 %v9273_v7  ;;  %v9311_v6 = vld [vmem:[%s14695_s14 + $0x168] sm:$0xff]  ;;  %v8409_v7 = vrot.slane %v8404_v12, %v14101_v61 }
 0x6b4   : > { %11201 = vmatprep.subr.mxu0 %v9288_v62 }
 0x6b5   : > { %11202 = vmatpush3.msra.mxu0 %v9272_v40  ;;  %v8413_v40 = vrot.slane %v8404_v12, %v14109_v10 }
 0x6b6   : > { %9206 = vmatpush1.bf16.msra.mxu1 %v13028_v20  ;;  %v9326_v20 = vld [vmem:[%s14695_s14 + $0x1e0] sm:$0xff] }
 0x6b7   : > { %9207 = vmatprep.subr.bf16.mxu1 %v13033_v44  ;;  %v9310_v44 = vld [vmem:[%s14695_s14 + $0x160] sm:$0xff] }
 0x6ba   : > { %9208 = vmatpush1.bf16.msra.mxu1 %v13031_v5  ;;  %v9325_v5 = vld [vmem:[%s14695_s14 + $0x1d8] sm:$0xff] }
 0x6bb   : > { %9209 = vmatprep.subr.bf16.mxu1 %v13036_v41  ;;  %v9309_v41 = vld [vmem:[%s14695_s14 + $0x158] sm:$0xff] }
 0x6be   : > { %9210 = vmatpush1.bf16.msra.mxu1 %v13034_v1  ;;  %v9324_v1 = vld [vmem:[%s14695_s14 + $0x1d0] sm:$0xff] }
 0x6bf   : > { %9211 = vmatprep.subr.bf16.mxu1 %v13039_v42  ;;  %v9308_v42 = vld [vmem:[%s14695_s14 + $0x150] sm:$0xff] }
 0x6c2   : > { %9212 = vmatpush2.bf16.msra.mxu1 %v13037_v47  ;;  %v9323_v47 = vld [vmem:[%s14695_s14 + $0x1c8] sm:$0xff] }
 0x6c3   : > { %9213 = vmatprep.subr.bf16.mxu1 %v13042_v55  ;;  %v9307_v55 = vld [vmem:[%s14695_s14 + $0x148] sm:$0xff] }
 0x6c6   : > { %9214 = vmatpush2.bf16.msra.mxu1 %v13040_v3  ;;  %v9322_v3 = vld [vmem:[%s14695_s14 + $0x1c0] sm:$0xff] }
 0x6c7   : > { %9215 = vmatprep.subr.bf16.mxu1 %v13045_v4  ;;  %v9306_v4 = vld [vmem:[%s14695_s14 + $0x140] sm:$0xff] }
 0x6ca   : > { %9216 = vmatpush2.bf16.msra.mxu1 %v13043_v17  ;;  %v9321_v17 = vld [vmem:[%s14695_s14 + $0x1b8] sm:$0xff] }
 0x6cb   : > { %9217 = vmatprep.subr.bf16.mxu1 %v13048_v34  ;;  %v9305_v34 = vld [vmem:[%s14695_s14 + $0x138] sm:$0xff] }
 0x6ce   : > { %9218 = vmatpush2.bf16.msra.mxu1 %v13046_v48  ;;  %v9320_v48 = vld [vmem:[%s14695_s14 + $0x1b0] sm:$0xff] }
 0x6cf   : > { %9219 = vmatprep.subr.bf16.mxu1 %v13051_v33  ;;  %v9304_v33 = vld [vmem:[%s14695_s14 + $0x130] sm:$0xff] }
 0x6d2   : > { %9220 = vmatpush2.bf16.msra.mxu1 %v13049_v49  ;;  %v9319_v49 = vld [vmem:[%s14695_s14 + $0x1a8] sm:$0xff] }
 0x6d3   : > { %9221 = vmatprep.subr.bf16.mxu1 %v13054_v56  ;;  %v9303_v56 = vld [vmem:[%s14695_s14 + $0x128] sm:$0xff] }
 0x6d6   : > { %9222 = vmatpush2.bf16.msra.mxu1 %v13052_v2  ;;  %v9318_v2 = vld [vmem:[%s14695_s14 + $0x1a0] sm:$0xff] }
 0x6d7   : > { %9223 = vmatprep.subr.bf16.mxu1 %v13057_v28  ;;  %v9302_v28 = vld [vmem:[%s14695_s14 + $0x120] sm:$0xff] }
 0x6da   : > { %9224 = vmatpush2.bf16.msra.mxu1 %v13055_v15  ;;  %v9317_v15 = vld [vmem:[%s14695_s14 + $0x198] sm:$0xff] }
 0x6db   : > { %9225 = vmatprep.subr.bf16.mxu1 %v13060_v36  ;;  %v9301_v36 = vld [vmem:[%s14695_s14 + $0x118] sm:$0xff] }
 0x6de   : > { %9226 = vmatpush2.bf16.msra.mxu1 %v13058_v11  ;;  %v9316_v11 = vld [vmem:[%s14695_s14 + $0x190] sm:$0xff] }
 0x6df   : > { %11218 = vmatprep.subr.mxu1 %v9329_v16 }
 0x6e1   : > { %9228 = vmatmul.mubr.bf16.vlgmr.msra.gmra.mxu1 %v14361_v9  ;;  %v9287_v9 = vld [vmem:[%s14695_s14 + $0xa8] sm:$0xff] }
 0x6e2   : > { %11203 = vmatprep.subr.mxu0 %v9287_v9  ;;  %11219 = vmatpush3.msra.mxu1 %v9313_v45 }
 0x6e3   : > { %11204 = vmatpush3.msra.mxu0 %v9271_v29  ;;  %11220 = vmatprep.subr.mxu1 %v9328_v26 }
 0x6e4   : > { %11205 = vmatprep.subr.mxu0 %v9286_v43  ;;  %11221 = vmatpush3.msra.mxu1 %v9312_v52 }
 0x6e5   : > { %11206 = vmatpush3.msra.mxu0 %v9270_v57  ;;  %11222 = vmatprep.subr.mxu1 %v9327_v39 }
 0x6e6   : > { %11207 = vmatprep.subr.mxu0 %v9285_v13  ;;  %11223 = vmatpush3.msra.mxu1 %v9311_v6 }
 0x6e7   : > { %11208 = vmatpush3.msra.mxu0 %v9269_v32  ;;  %11224 = vmatprep.subr.mxu1 %v9326_v20 }
 0x6e8   : > { %11209 = vmatprep.subr.mxu0 %v9284_v51  ;;  %11225 = vmatpush3.msra.mxu1 %v9310_v44 }
 0x6e9   : > { %11210 = vmatpush3.msra.mxu0 %v9268_v54  ;;  %11226 = vmatprep.subr.mxu1 %v9325_v5 }
 0x6ea   : > { %11211 = vmatprep.subr.mxu0 %v9283_v37  ;;  %11227 = vmatpush3.msra.mxu1 %v9309_v41 }
 0x6eb   : > { %11212 = vmatpush3.msra.mxu0 %v9267_v19  ;;  %11228 = vmatprep.subr.mxu1 %v9324_v1 }
 0x6ec   : > { %11213 = vmatprep.subr.mxu0 %v9282_v18  ;;  %11229 = vmatpush3.msra.mxu1 %v9308_v42 }
 0x6ed   : > { %11214 = vmatpush3.msra.mxu0 %v9266_v23  ;;  %11230 = vmatprep.subr.mxu1 %v9323_v47 }
 0x6ee   : > { %11260 = vmatprep.subr.mxu0 %v13513_v27  ;;  %11231 = vmatpush3.msra.mxu1 %v9307_v55 }
 0x6ef   : > { %11232 = vmatprep.subr.mxu1 %v9322_v3 }
 0x6f0   : > { %11233 = vmatpush3.msra.mxu1 %v9306_v4 }
 0x6f1   : > { %11234 = vmatprep.subr.mxu1 %v9321_v17  ;;  %v8417_v17 = vrot.slane %v8404_v12, %v14145_v31 }
 0x6f2   : > { %11235 = vmatpush3.msra.mxu1 %v9305_v34 }
 0x6f3   : > { %11236 = vmatprep.subr.mxu1 %v9320_v48  ;;  %v8421_v48 = vrot.slane %v8404_v12, %v14148_v59 }
 0x6f4   : > { %11237 = vmatpush3.msra.mxu1 %v9304_v33 }
 0x6f5   : > { %11238 = vmatprep.subr.mxu1 %v9319_v49 }
 0x6f6   : > { %11239 = vmatpush3.msra.mxu1 %v9303_v56 }
 0x6f7   : > { %11240 = vmatprep.subr.mxu1 %v9318_v2 }
 0x6f8   : > { %11241 = vmatpush3.msra.mxu1 %v9302_v28 }
 0x6f9   : > { %11242 = vmatprep.subr.mxu1 %v9317_v15 }
 0x6fa   : > { %11243 = vmatpush3.msra.mxu1 %v9301_v36 }
 0x6fb   : > { %11244 = vmatprep.subr.mxu1 %v9316_v11 }
 0x6fc   : > { %11245 = vmatpush3.msra.mxu1 %v9300_v60 }
 0x6fd   : > { %11246 = vmatprep.subr.mxu1 %v9315_v63 }
 0x6fe   : > { %11247 = vmatpush3.msra.mxu1 %v9299_v24 }
 0x6ff   : > { %11248 = vmatprep.subr.mxu1 %v9314_v53 }
 0x700   : > { %11249 = vmatpush3.msra.mxu1 %v9298_v50 }
 0x701   : > { %11271 = vmatprep.subr.mxu1 %v13513_v27 }
 0x721   : > { %v9100_v8 = vpop.f32.mrf.mxu0 }
 0x722   : > { %v9101_v43 = vadd.f32 %v9100_v8, %v8409_v7 }
 0x723   : > { %v9102_v35 = vpop.f32.mrf.mxu0 }
 0x724   : > { %v9103_v32 = vadd.f32 %v9102_v35, %v8413_v40 }
 0x725   : > { %v9104_v30 = vpop.f32.mrf.mxu0 }
 0x726   : > { %v9105_v57 = vadd.f32 %v9104_v30, %v8409_v7 }
 0x727   : > { %v9106_v9 = vpop.f32.mrf.mxu0 }
 0x728   : > { %v9107_v51 = vadd.f32 %v9106_v9, %v8413_v40 }
 0x761   : > { %v9143_v62 = vpop.f32.mrf.mxu1  ;;  %v9186_v55 = vpop.f32.mrf.mxu0 }
 0x762   : > { %v14562_v54 = vadd.f32 %v9143_v62, %v9101_v43  ;;  %v9187_v56 = vadd.f32 %v9186_v55, %v8417_v17  ;;  %v9651_v55 = vld [vmem:[#allocation23 + $0x78] sm:$0xff] }
 0x763   : > { %v9145_v29 = vpop.f32.mrf.mxu1  ;;  %v9188_v3 = vpop.f32.mrf.mxu0 }
 0x764   : > { %v14566_v18 = vadd.f32 %v9145_v29, %v9103_v32  ;;  %v9189_v15 = vadd.f32 %v9188_v3, %v8421_v48  ;;  %v9472_v32 = vld [vmem:[%s14749_s20 + $0x10] sm:$0xff] }
 0x765   : > { %v9147_v13 = vpop.f32.mrf.mxu1  ;;  %v9190_v4 = vpop.f32.mrf.mxu0  ;;  %v9648_v3 = vld [vmem:[#allocation23 + $0x60] sm:$0xff] }
 0x766   : > { %v14564_v37 = vadd.f32 %v9147_v13, %v9105_v57  ;;  %v9191_v2 = vadd.f32 %v9190_v4, %v8417_v17  ;;  %v9473_v13 = vld [vmem:[%s14749_s20 + $0x18] sm:$0xff]  ;;  %v9650_v4 = vld [vmem:[#allocation23 + $0x70] sm:$0xff] }
 0x767   : > { %v9149_v19 = vpop.f32.mrf.mxu1  ;;  %v9192_v33 = vpop.f32.mrf.mxu0  ;;  %v9645_v17 = vld [vmem:[#allocation23 + $0x48] sm:$0xff] }
 0x768   : > { %v9238_v23 = vadd.f32 %v14564_v37, %v14562_v54  ;;  %v14570_v16 = vadd.f32 %v9149_v19, %v9107_v51  ;;  %v9193_v36 = vadd.f32 %v9192_v33, %v8421_v48  ;;  %v9471_v51 = vld [vmem:[%s14749_s20 + $0x8] sm:$0xff]  ;;  %v9470_v19 = vld [vmem:[%s14749_s20] sm:$0xff]  ;;  %v9644_v48 = vld [vmem:[#allocation23 + $0x40] sm:$0xff] }
 0x769   : > { %v9646_v33 = vld [vmem:[#allocation23 + $0x50] sm:$0xff] }
 0x76a   : > { %v9239_v10 = vrot.slane %v9238_v23, 4  ;;  %v9245_v45 = vadd.f32 %v14570_v16, %v14566_v18 }
 0x76c   : > { %v9240_v26 = vadd.f32 %v9239_v10, %v9238_v23  ;;  %v9246_v52 = vrot.slane %v9245_v45, 4 }
 0x76e   : > { %v9241_v39 = vrot.slane %v9240_v26, 2  ;;  %v9247_v6 = vadd.f32 %v9246_v52, %v9245_v45 }
 0x770   : > { %v9242_v20 = vadd.f32 %v9241_v39, %v9240_v26  ;;  %v9248_v44 = vrot.slane %v9247_v6, 2 }
 0x772   : > { %v9249_v5 = vadd.f32 %v9248_v44, %v9247_v6  ;;  %v9243_v41 = vrot.slane %v9242_v20, 1  ;;  %v9474_v44 = vld [vmem:[#allocation18] sm:$0x1] }
 0x774   : > { %v9250_v1 = vrot.slane %v9249_v5, 1  ;;  %v9244_v47 = vadd.f32 %v9243_v41, %v9242_v20  ;;  %v9550_v20 = vld [vmem:[#allocation20] sm:$0x3] }
 0x776   : > { %v9251_v42 = vadd.f32 %v9250_v1, %v9249_v5 }
 0x778   : > { %9394 = vmatprep.mubr.f32.mxu0 %v9251_v42 }
 0x779   : > { %9395 = vmatmul.mubr.f32.vlgmr.msra.gmra.mxu0 %v9244_v47  ;;  %v9649_v47 = vld [vmem:[#allocation23 + $0x68] sm:$0xff] }
 0x77a   : > { %11261 = vmatpush3.msra.mxu0 %v9473_v13  ;;  %11268 = vmatprep.mubr.msk.f32.mxu0 %vm13514_vm5, %v13513_v27 }
 0x77b   : > { %11262 = vmatprep.subr.mxu0 %v13513_v27 }
 0x77c   : > { %11263 = vmatpush3.msra.mxu0 %v9472_v32 }
 0x77d   : > { %11264 = vmatprep.subr.mxu0 %v13513_v27 }
 0x77e   : > { %11265 = vmatpush3.msra.mxu0 %v9471_v51 }
 0x77f   : > { %11266 = vmatprep.subr.mxu0 %v13513_v27 }
 0x780   : > { %11267 = vmatpush3.msra.mxu0 %v9470_v19 }
 0x781   : > { %9750 = vmatprep.subr.mxu0 %v9651_v55 }
 0x7a1   : > { %v9229_v34 = vpop.f32.mrf.mxu1 }
 0x7a2   : > { %v14576_v11 = vadd.f32 %v9229_v34, %v9187_v56  ;;  %v9647_v34 = vld [vmem:[#allocation23 + $0x58] sm:$0xff] }
 0x7a3   : > { %v9231_v49 = vpop.f32.mrf.mxu1  ;;  %v9643_v56 = vld [vmem:[#allocation23 + $0x38] sm:$0xff] }
 0x7a4   : > { %v14580_v24 = vadd.f32 %v9231_v49, %v9189_v15  ;;  %v9641_v49 = vld [vmem:[#allocation23 + $0x28] sm:$0xff]  ;;  %v9639_v15 = vld [vmem:[#allocation23 + $0x18] sm:$0xff] }
 0x7a5   : > { %v9233_v28 = vpop.f32.mrf.mxu1 }
 0x7a6   : > { %v14578_v60 = vadd.f32 %v9233_v28, %v9191_v2  ;;  %v9640_v2 = vld [vmem:[#allocation23 + $0x20] sm:$0xff]  ;;  %v9642_v28 = vld [vmem:[#allocation23 + $0x30] sm:$0xff] }
 0x7a7   : > { %v9235_v63 = vpop.f32.mrf.mxu1 }
 0x7a8   : > { %v9252_v31 = vadd.f32 %v14578_v60, %v14576_v11  ;;  %v14584_v53 = vadd.f32 %v9235_v63, %v9193_v36  ;;  %v9636_v36 = vld [vmem:[#allocation23] sm:$0xff]  ;;  %v9638_v63 = vld [vmem:[#allocation23 + $0x10] sm:$0xff] }
 0x7aa   : > { %v9253_v59 = vrot.slane %v9252_v31, 4  ;;  %v9259_v50 = vadd.f32 %v14584_v53, %v14580_v24 }
 0x7ac   : > { %v9254_v8 = vadd.f32 %v9253_v59, %v9252_v31  ;;  %v9260_v35 = vrot.slane %v9259_v50, 4  ;;  %v9551_v31 = vld [vmem:[#allocation21] sm:$0x1] }
 0x7ae   : > { %v9255_v12 = vrot.slane %v9254_v8, 2  ;;  %v9261_v30 = vadd.f32 %v9260_v35, %v9259_v50 }
 0x7b0   : > { %v9256_v7 = vadd.f32 %v9255_v12, %v9254_v8  ;;  %v9262_v62 = vrot.slane %v9261_v30, 2 }
 0x7b2   : > { %v9263_v40 = vadd.f32 %v9262_v62, %v9261_v30  ;;  %v9257_v9 = vrot.slane %v9256_v7, 1 }
 0x7b4   : > { %v9264_v29 = vrot.slane %v9263_v40, 1  ;;  %v9258_v57 = vadd.f32 %v9257_v9, %v9256_v7 }
 0x7b6   : > { %v9265_v43 = vadd.f32 %v9264_v29, %v9263_v40 }
 0x7b8   : > { %9464 = vmatprep.mubr.f32.mxu1 %v9265_v43 }
 0x7b9   : > { %9465 = vmatmul.mubr.f32.vlgmr.msra.gmra.mxu1 %v9258_v57 }
 0x7ba   : > { %11273 = vmatprep.mubr.msk.f32.mxu1 %vm13514_vm5, %v13513_v27  ;;  %11272 = vmatpush3.msk.msra.mxu1 %vm9556_vm7, %v9550_v20 }
 0x7bb   : > { %9679 = vmatprep.subr.mxu1 %v9649_v47 }
 0x839   : > { %v11215_v23 = vpop.f32.mrf.mxu0 }
 0x83b   : > { %v11216_v10 = vpop.f32.mrf.mxu0 }
 0x83c   : > { %v11217_v52 = vadd.f32 %v11216_v10, %v11215_v23 }
 0x879   : > { %v11250_v45 = vpop.f32.mrf.mxu1 }
 0x87b   : > { %v11251_v26 = vpop.f32.mrf.mxu1 }
 0x87c   : > { %v11252_v39 = vadd.f32 %v11251_v26, %v11250_v45 }
 0x87e   : > { %v9467_v6 = vadd.f32 %v11252_v39, %v11217_v52 }
 0x880   : > { %11269 = vmatmul.mubr.msk.f32.vlgmr.msra.gmra.mxu0 %vm9475_vm6, %v9467_v6 }
 0x881   : > { %9790 = vmatprep.mubr.f32.mxu0 %v13513_v27  ;;  %9751 = vmatpush1.msra.mxu0 %v9650_v4 }
 0x882   : > { %9752 = vmatprep.subr.mxu0 %v9647_v34 }
 0x883   : > { %9753 = vmatpush1.msra.mxu0 %v9646_v33 }
 0x884   : > { %9754 = vmatprep.subr.mxu0 %v9643_v56 }
 0x885   : > { %9755 = vmatpush1.msra.mxu0 %v9642_v28 }
 0x886   : > { %9756 = vmatprep.subr.mxu0 %v9639_v15 }
 0x887   : > { %9757 = vmatpush1.msra.mxu0 %v9638_v63 }
 0x940   : > { %v9545_v5 = vpop.f32.mrf.mxu0 }
 0x941   : > { %v9546_v41 = vadd.f32 %v9545_v5, %v9474_v44 }
 0x942   : > { %v11270_v1 = vpop.f32.mrf.mxu0 }
 0x943   : > { %v9549_v42 = vmax.f32 %v9546_v41, 0.0 }
 0x945   : > { %11274 = vmatmul.mubr.msk.f32.vlgmr.msra.gmra.mxu1 %vm9552_vm8, %v9549_v42 }
 0x946   : > { %9719 = vmatprep.mubr.f32.mxu1 %v13513_v27  ;;  %9680 = vmatpush1.msra.mxu1 %v9648_v3  ;;  %v9637_v27 = vld [vmem:[#allocation23 + $0x8] sm:$0xff] }
 0x947   : > { %9681 = vmatprep.subr.mxu1 %v9645_v17 }
 0x948   : > { %9682 = vmatpush1.msra.mxu1 %v9644_v48 }
 0x949   : > { %9683 = vmatprep.subr.mxu1 %v9641_v49 }
 0x94a   : > { %9684 = vmatpush1.msra.mxu1 %v9640_v2 }
 0x94b   : > { %9685 = vmatprep.subr.mxu1 %v9637_v27 }
 0x94c   : > { %9686 = vmatpush1.msra.mxu1 %v9636_v36 }
 0xa05   : > { %v9626_v59 = vpop.f32.mrf.mxu1 }
 0xa06   : > { %v9627_v50 = vadd.f32 %v9626_v59, %v9551_v31 }
 0xa07   : > { %v11275_v8 = vpop.f32.mrf.mxu1 }
 0xa08   : > { %v11173_v35 = vmul.f32 -1.442695, %v9627_v50 }
 0xa0a   : > { %13061 = vpow2.f32 %v11173_v35 }
 0xa17   : > { %v13062_v12 = vpop.eup %13061 }
 0xa18   : > { %v9633_v30 = vadd.f32 1.0, %v13062_v12 }
 0xa1a   : > { %13063 = vrcp.f32 %v9633_v30 }
 0xa27   : > { %v13064_v7 = vpop.eup %13063 }
 0xa28   : > { %11174 = vmatmul.mubr.msk.f32.vlgmr.msra.gmra.mxu1 %vm9475_vm6, %v13064_v7  ;;  %11175 = vmatmul.mubr.msk.f32.vlgmr.msra.gmra.mxu0 %vm9475_vm6, %v13064_v7 }
 0xae8   : > { %v9721_v62 = vpop.f32.mrf.mxu1  ;;  %v9792_v40 = vpop.f32.mrf.mxu0 }
 0xae9   : > { %v9800_v9 = vrot.slane %v9721_v62, %v14101_v61  ;;  %v9808_v29 = vrot.slane %v9792_v40, %v14101_v61 }
 0xaea   : > { %v9723_v43 = vpop.f32.mrf.mxu1  ;;  %v9794_v57 = vpop.f32.mrf.mxu0 }
 0xaeb   : > { %v9813_v13 = vmul.f32 %v9800_v9, %v14562_v54  ;;  %v9817_v32 = vmul.f32 %v9800_v9, %v14564_v37  ;;  %v9815_v51 = vmul.f32 %v9808_v29, %v14576_v11  ;;  %v9819_v19 = vmul.f32 %v9808_v29, %v14578_v60 }
 0xaec   : > { %v9804_v23 = vrot.slane %v9723_v43, %v14101_v61  ;;  %v9812_v10 = vrot.slane %v9794_v57, %v14101_v61 }
 0xaed   : > { %v9821_v45 = vmul.f32 0.1, %v9813_v13  ;;  %v9825_v26 = vmul.f32 0.1, %v9817_v32  ;;  %v9823_v52 = vmul.f32 0.1, %v9815_v51 }
 0xaee   : > { %v9827_v39 = vmul.f32 0.1, %v9819_v19  ;;  %v9814_v6 = vmul.f32 %v9804_v23, %v14566_v18  ;;  %v9818_v54 = vmul.f32 %v9804_v23, %v14570_v16  ;;  %v9816_v37 = vmul.f32 %v9812_v10, %v14580_v24 }
 0xaef   : > { %v9829_v20 = vadd.f32 %v9821_v45, %v14310_v38  ;;  %v9833_v11 = vadd.f32 %v9825_v26, %v14304_v46  ;;  %v9831_v60 = vadd.f32 %v9823_v52, %v14337_v58  ;;  %v9820_v44 = vmul.f32 %v9812_v10, %v14584_v53 }
 0xaf0   : > { %v9835_v61 = vadd.f32 %v9827_v39, %v14331_v0  ;;  %v9822_v5 = vmul.f32 0.1, %v9814_v6  ;;  %v9826_v18 = vmul.f32 0.1, %v9818_v54  ;;  %v9824_v41 = vmul.f32 0.1, %v9816_v37 }
 0xaf1   : > { %9837 = vst [vmem:[%s714_s4] sm:$0xff] %v9829_v20  ;;  %9841 = vst [vmem:[%s714_s4 + $0x20] sm:$0xff] %v9833_v11  ;;  %v9828_v38 = vmul.f32 0.1, %v9820_v44 }
 0xaf2   : > { %9839 = vst [vmem:[%s714_s4 + $0x10] sm:$0xff] %v9831_v60  ;;  %9843 = vst [vmem:[%s714_s4 + $0x30] sm:$0xff] %v9835_v61  ;;  %v9830_v46 = vadd.f32 %v9822_v5, %v14306_v21  ;;  %v9834_v58 = vadd.f32 %v9826_v18, %v14308_v14  ;;  %v9832_v16 = vadd.f32 %v9824_v41, %v14333_v25 }
 0xaf3   : > { %v9836_v0 = vadd.f32 %v9828_v38, %v14335_v22 }
 0xaf4   : > { %9838 = vst [vmem:[%s714_s4 + $0x8] sm:$0xff] %v9830_v46  ;;  %9842 = vst [vmem:[%s714_s4 + $0x28] sm:$0xff] %v9834_v58 }
 0xaf5   : > { %9840 = vst [vmem:[%s714_s4 + $0x18] sm:$0xff] %v9832_v16  ;;  %9844 = vst [vmem:[%s714_s4 + $0x38] sm:$0xff] %v9836_v0 }
 0xaf6   : > { %13418 = shalt.err (!%p13415_p4)
}
 0xaf7   : > { %s13419_s25 = scalar_lea.hbm %s14635_s29, 1024  ;;  %s13423_s4 = scalar_lea.hbm %s14750_s28, 2048 }
 0xaf8   : > { %p13420_p1 = scmp.ne.s32.totalorder %s14635_s29, %s13419_s25  ;;  %p13424_p5 = scmp.lt.s32.totalorder %s14635_s29, %s14750_s28 }
 0xaf9   : > { %p13425_p8 = scmp.lt.s32.totalorder %s13423_s4, %s13419_s25 }
 0xafa   : > { %p13421_p3 = pnand %p13420_p1, %p14751_p13 }
 0xafb   : > { %p13426_p7 = por %p13425_p8, %p13424_p5 }
 0xafc   : > { %p13422_p12 = pneg %p13421_p3 }
 0xafe   : > { %p13427_p6 = pnand %p13426_p7, %p13422_p12 }
 0xb00   : > { %13430 = shalt.err (!%p13427_p6)
}
 0xb01   : > { %s13516_s10 = smov 512   ;;  %s13517_s2 = smov 32  }
 0xb02   : > { %11327 = dma.vmem_to_hbm [thread:$0]  (%p14751_p13), %s14637_s6, 1024, %s14635_s29, %s9846_s18, %s13516_s10, %s13516_s10, %s13517_s2  }
 0xb03 PF: > { %s9874_s7 = sand.u32 1, %s13481_s21   ;;  %p14752_p0 = scmp.ne.s32.totalorder %s14730_s16, 0 }
 0xb04   : > { %p14753_p2 = scmp.ge.s32.totalorder %s13493_s24, 2  ;;  %s9875_s19 = scalar_lea.sflag [#allocation5], %s9874_s7 }
 0xb06   : > { %p11371_p9 = pnand %p14753_p2, %p14752_p0 }
 0xb08   : > { %p11372_p10 = pneg %p11371_p9 }
 0xb0a   : > { %13476 = dma.done.wait (%p11372_p10), %s9875_s19, 1024  }
 0xb0b   : > { %13478 = vsyncadd (%p11372_p10), %s9875_s19, 4294966272  ;;  %p35_p11 = scmp.ge.s32.totalorder %s13763_s17, 4   ;;  %s14754_s21 = smov %s13485_s22 }
 0xb0c   : > { %s14755_s22 = smov %s13489_s23  ;;  %s14756_s23 = smov %s13774_s0 }
 0xb0d   : > { %s14757_s24 = smov %s13763_s17  ;;  %37 = sbr.rel (!%p35_p11) target bundleno = 22 (0x16), region = 185 }
 0xb12   :  { %9880 = vsyncpa [#allocation4], 1 }
 0xb13   :  { %9882 = vsyncpa [#allocation4 + $0x1], 1 }
 0xb14   :  { %9883 = vsyncpa [#allocation7], 1 }
 0xb15   :  { %9884 = vsyncpa [#allocation10], 1 }
 0xb16   :  { %9885 = vsyncpa [#allocation13], 1 }
 0xb17   :  { %9886 = vsyncpa [#allocation16], 1 }
 0xb18   :  { %9887 = vsyncpa [#allocation19], 1 }
 0xb19   :  { %9888 = vsyncpa [#allocation22], 1 }
 0xb1a   :  { %9889 = vsyncpa [#allocation5], 1 }
 0xb1b   :  { %9891 = vsyncpa [#allocation5 + $0x1], 1 }

</bundles_post_ra>
